<compile_context>
chip_gen: v7x
topology: tpu7x:2x2x1
jax: 0.10.0
libtpu: 0.0.40
codegen_flags: <defaults>
</compile_context>

<pallas_src>
import jax
import jax.numpy as jnp
from jax.experimental import pallas as pl
from jax.experimental.pallas import tpu as pltpu


def _round_up(x, m):
    return ((x + m - 1) // m) * m


# ----------------------------------------------------------------------------
# Kernel 1: fused input projection for BOTH GRU directions of one layer.
#   gx[d] = sum_j xs[j] @ w[d, j] + b[d]        (d = 0 fwd, d = 1 bwd)
# x is passed feature-half stacked as (n_in, M, D); output is the
# direction-stacked (2, M, 3H) gate tensor consumed by the recurrence kernel.
# ----------------------------------------------------------------------------
def _make_proj_kernel(n_in):
    def kernel(x_ref, w_ref, b_ref, o_ref):
        xs = [x_ref[j] for j in range(n_in)]
        for d in range(2):
            acc = jnp.dot(xs[0], w_ref[d, 0], preferred_element_type=jnp.float32)
            for j in range(1, n_in):
                acc = acc + jnp.dot(xs[j], w_ref[d, j],
                                    preferred_element_type=jnp.float32)
            o_ref[d] = (acc + b_ref[d]).astype(o_ref.dtype)
    return kernel


def input_projection(x_nmd, w, b, *, row_tile):
    """x_nmd: (n_in, M, D), w: (2, n_in, D, 3H), b: (2, 1, 3H) -> (2, M, 3H)."""
    n_in, M, D = x_nmd.shape
    Hg = w.shape[-1]
    assert M % row_tile == 0
    return pl.pallas_call(
        _make_proj_kernel(n_in),
        out_shape=jax.ShapeDtypeStruct((2, M, Hg), jnp.float32),
        grid=(M // row_tile,),
        in_specs=[
            pl.BlockSpec((n_in, row_tile, D), lambda i: (0, i, 0)),
            pl.BlockSpec((2, n_in, D, Hg), lambda i: (0, 0, 0, 0)),
            pl.BlockSpec((2, 1, Hg), lambda i: (0, 0, 0)),
        ],
        out_specs=pl.BlockSpec((2, row_tile, Hg), lambda i: (0, i, 0)),
        compiler_params=pltpu.CompilerParams(dimension_semantics=("parallel",)),
    )(x_nmd, w, b)


# ----------------------------------------------------------------------------
# Kernel 2: both directions of one bi-GRU layer, time-blocked.
# grid = (2 directions ["parallel"], T/Tt time blocks ["arbitrary"]).
# The hidden state lives in a VMEM scratch across the time-block axis and is
# re-initialised (from h0) at the first time block of each direction.
# The backward direction reads its blocks via a reversed index_map and walks
# the rows of each block in reverse order inside the kernel.
# ----------------------------------------------------------------------------
def _make_bigru_kernel(H, Tt):
    def steps(rows, base_t, gx_ref, lens, whT, bhh, o_ref, h_scr):
        for row in rows:                                   # fully unrolled
            t = base_t + row
            h = h_scr[...]
            gi = gx_ref[row]                               # (B, 3H) input gates
            gh = jnp.dot(h, whT, preferred_element_type=jnp.float32) + bhh
            r = jax.nn.sigmoid(gi[:, :H] + gh[:, :H])
            z = jax.nn.sigmoid(gi[:, H:2 * H] + gh[:, H:2 * H])
            n = jnp.tanh(gi[:, 2 * H:] + r * gh[:, 2 * H:])
            h_cand = n + z * (h - n)                       # == (1-z)*n + z*h
            m = (t < lens).astype(jnp.float32)             # (B, 1) validity mask
            h_next = h + m * (h_cand - h)                  # freeze h past len
            h_scr[...] = h_next
            o_ref[row] = (h_next * m).astype(o_ref.dtype)  # 0 at padded steps

    def kernel(gx_ref, lens_ref, h0_ref, whT_ref, bhh_ref, o_ref, h_scr):
        d = pl.program_id(0)
        tb = pl.program_id(1)
        nT = pl.num_programs(1)

        @pl.when(tb == 0)
        def _():
            h_scr[...] = h0_ref[...].astype(jnp.float32)

        lens = lens_ref[...]          # (B, 1) int32 (resident block)
        whT = whT_ref[...]            # (H, 3H)
        bhh = bhh_ref[...]            # (1, 3H)

        @pl.when(d == 0)              # forward direction: ascending time
        def _():
            steps(range(Tt), tb * Tt, gx_ref, lens, whT, bhh, o_ref, h_scr)

        @pl.when(d == 1)              # backward direction: descending time
        def _():
            steps(range(Tt - 1, -1, -1), (nT - 1 - tb) * Tt,
                  gx_ref, lens, whT, bhh, o_ref, h_scr)

    return kernel


def bigru_recurrence(gx, lens2d, h0, whhT, bhh, *, Tt):
    """gx: (2, Tp, Bp, 3H), lens2d: (Bp, 1) int32, h0: (2, Bp, H),
    whhT: (2, H, 3H), bhh: (2, 1, 3H) -> (2, Tp, Bp, H)."""
    _, Tp, Bp, H3 = gx.shape
    H = H3 // 3
    nT = Tp // Tt

    def blk(d, t):
        # forward (d=0): time block t ; backward (d=1): time block nT-1-t
        return (d, d * (nT - 1) + (1 - 2 * d) * t, 0, 0)

    return pl.pallas_call(
        _make_bigru_kernel(H, Tt),
        out_shape=jax.ShapeDtypeStruct((2, Tp, Bp, H), jnp.float32),
        grid=(2, nT),
        in_specs=[
            pl.BlockSpec((pl.Squeezed(), Tt, Bp, H3), blk),
            pl.BlockSpec((Bp, 1), lambda d, t: (0, 0)),
            pl.BlockSpec((pl.Squeezed(), Bp, H), lambda d, t: (d, 0, 0)),
            pl.BlockSpec((pl.Squeezed(), H, H3), lambda d, t: (d, 0, 0)),
            pl.BlockSpec((pl.Squeezed(), 1, H3), lambda d, t: (d, 0, 0)),
        ],
        out_specs=pl.BlockSpec((pl.Squeezed(), Tt, Bp, H), blk),
        scratch_shapes=[pltpu.VMEM((Bp, H), jnp.float32)],
        compiler_params=pltpu.CompilerParams(
            dimension_semantics=("parallel", "arbitrary")),
    )(gx, lens2d, h0, whhT, bhh)


# ----------------------------------------------------------------------------
# Kernel 3: classifier + log_softmax over the TIME axis, B-tiled, tagset padded
# to a multiple of 128 lanes.
# ----------------------------------------------------------------------------
def _make_classifier_kernel(t_valid):
    def kernel(y_ref, w_ref, b_ref, o_ref):
        _, Tp, tb, H = y_ref.shape
        Cp = o_ref.shape[-1]
        xf = y_ref[0].reshape(Tp * tb, H)
        xb = y_ref[1].reshape(Tp * tb, H)
        logits = (jnp.dot(xf, w_ref[0], preferred_element_type=jnp.float32)
                  + jnp.dot(xb, w_ref[1], preferred_element_type=jnp.float32)
                  + b_ref[...]).reshape(Tp, tb, Cp)
        if Tp != t_valid:  # exclude time-padding (from Tt blocking) from softmax
            tmask = jax.lax.broadcasted_iota(jnp.int32, (Tp, 1, 1), 0) < t_valid
            logits = jnp.where(tmask, logits, -1e30)
        mx = jnp.max(logits, axis=0, keepdims=True)
        s = logits - mx
        lse = jnp.log(jnp.sum(jnp.exp(s), axis=0, keepdims=True))
        o_ref[...] = (s - lse).astype(o_ref.dtype)
    return kernel


def classifier_logsoftmax_time(y, clsW, clsb, *, t_valid, batch_tile=8):
    """y: (2, Tp, Bp, H2), clsW: (2, H2, Cp), clsb: (1, Cp) -> (Tp, Bp, Cp)."""
    _, Tp, Bp, H = y.shape
    Cp = clsW.shape[-1]
    tb = min(batch_tile, Bp)
    assert Bp % tb == 0
    return pl.pallas_call(
        _make_classifier_kernel(t_valid),
        out_shape=jax.ShapeDtypeStruct((Tp, Bp, Cp), jnp.float32),
        grid=(Bp // tb,),
        in_specs=[
            pl.BlockSpec((2, Tp, tb, H), lambda j: (0, 0, j, 0)),
            pl.BlockSpec((2, H, Cp), lambda j: (0, 0, 0)),
            pl.BlockSpec((1, Cp), lambda j: (0, 0)),
        ],
        out_specs=pl.BlockSpec((Tp, tb, Cp), lambda j: (0, j, 0)),
        compiler_params=pltpu.CompilerParams(dimension_semantics=("parallel",)),
    )(y, clsW, clsb)


# ----------------------------------------------------------------------------
# PosTagger forward (Pallas path)
# ----------------------------------------------------------------------------
def pos_tagger_forward(params, x_btd, lens, masks, h1, h2, *,
                       tagset, time_block=8):
    del masks  # only feeds the dead pre_alphas branch of the PyTorch forward
    B, T, Din = x_btd.shape
    Tt = min(time_block, T)
    Bp = _round_up(B, 8)
    Tp = _round_up(T, Tt)
    row_tile = Tt * Bp

    # time-major; pad batch (masked rows: len=0) and time (masked steps: t>=len)
    x_tbd = jnp.transpose(x_btd, (1, 0, 2)).astype(jnp.float32)        # (T, B, D)
    x_tbd = jnp.pad(x_tbd, ((0, Tp - T), (0, Bp - B), (0, 0)))
    lens2d = jnp.pad(lens.astype(jnp.int32), (0, Bp - B))[:, None]     # (Bp, 1)

    def pad_h(h):                                   # (2, B, H) -> (2, Bp, H)
        return jnp.pad(h, ((0, 0), (0, Bp - B), (0, 0)))

    def layer(x_nmd, h0, p):
        gx = input_projection(x_nmd, p["wih"], p["bih"], row_tile=row_tile)
        gx = gx.reshape(2, Tp, Bp, -1)
        return bigru_recurrence(gx, lens2d, h0, p["whhT"], p["bhh"], Tt=Tt)

    y = layer(x_tbd.reshape(1, Tp * Bp, Din), pad_h(h1[:2]), params["l1_0"])
    y = layer(y.reshape(2, Tp * Bp, -1), pad_h(h1[2:4]), params["l1_1"])
    y = layer(y.reshape(2, Tp * Bp, -1), pad_h(h2), params["l2_0"])

    out = classifier_logsoftmax_time(y, params["clsW"], params["clsb"], t_valid=T)
    # TODO(synk): fold this small final (T,B,C)->(B,T,C) permute into the
    # classifier out_specs (needs an in-kernel major-dim transpose).
    return jnp.transpose(out[:T, :B, :tagset], (1, 0, 2))               # (B, T, C)


# ----------------------------------------------------------------------------
# Parameters (PyTorch-style uniform init) and kernel-layout fusion
# ----------------------------------------------------------------------------
def init_raw_params(key, input_size, H1, H2, tagset):
    keys = iter(jax.random.split(key, 32))

    def uni(shape, bound):
        return jax.random.uniform(next(keys), shape, jnp.float32, -bound, bound)

    def gru_dir(d_in, H):
        b = 1.0 / (H ** 0.5)
        return dict(wihT=uni((d_in, 3 * H), b), whhT=uni((H, 3 * H), b),
                    bih=uni((1, 3 * H), b), bhh=uni((1, 3 * H), b))

    raw = dict(
        gru1_l0_f=gru_dir(input_size, H1), gru1_l0_b=gru_dir(input_size, H1),
        gru1_l1_f=gru_dir(2 * H1, H1), gru1_l1_b=gru_dir(2 * H1, H1),
        gru2_l0_f=gru_dir(2 * H1, H2), gru2_l0_b=gru_dir(2 * H1, H2),
    )
    bc = 1.0 / ((2 * H2) ** 0.5)
    raw["clsT"] = uni((2 * H2, tagset), bc)
    raw["cls_b"] = uni((1, tagset), bc)
    return raw


def fuse_params(raw, input_size, H1, H2, tagset):
    """Re-layout the per-direction PyTorch-style params into the kernel layout."""
    def fuse_layer(pf, pb, in_splits):
        offs, o = [], 0
        for s in in_splits:
            offs.append((o, o + s))
            o += s
        wih = jnp.stack([
            jnp.stack([pf["wihT"][a:b] for (a, b) in offs]),
            jnp.stack([pb["wihT"][a:b] for (a, b) in offs]),
        ])                                               # (2, n_in, D_piece, 3H)
        return dict(wih=wih,
                    bih=jnp.stack([pf["bih"], pb["bih"]]),      # (2, 1, 3H)
                    whhT=jnp.stack([pf["whhT"], pb["whhT"]]),   # (2, H, 3H)
                    bhh=jnp.stack([pf["bhh"], pb["bhh"]]))      # (2, 1, 3H)

    Cp = _round_up(tagset, 128)
    clsT = raw["clsT"]                                   # (2*H2, C)
    clsW = jnp.stack([clsT[:H2], clsT[H2:]])             # (2, H2, C)
    clsW = jnp.pad(clsW, ((0, 0), (0, 0), (0, Cp - tagset)))
    clsb = jnp.pad(raw["cls_b"], ((0, 0), (0, Cp - tagset)))

    return dict(
        l1_0=fuse_layer(raw["gru1_l0_f"], raw["gru1_l0_b"], [input_size]),
        l1_1=fuse_layer(raw["gru1_l1_f"], raw["gru1_l1_b"], [H1, H1]),
        l2_0=fuse_layer(raw["gru2_l0_f"], raw["gru2_l0_b"], [H1, H1]),
        clsW=clsW, clsb=clsb,
    )


def init_hidden(rng, B, H1, H2, lens):
    k1, k2 = jax.random.split(rng)
    h1 = jax.random.normal(k1, (4, B, H1), jnp.float32)   # 2 layers x 2 dirs
    h2 = jax.random.normal(k2, (2, B, H2), jnp.float32)   # 1 layer  x 2 dirs
    # pack_padded_sequence sorts sequences by length (desc) but the random h0 is
    # NOT permuted with them; reproduce the resulting h0 -> sequence assignment.
    inv = jnp.argsort(jnp.argsort(-lens))
    return h1[:, inv], h2[:, inv]


# ----------------------------------------------------------------------------
# Pure-JAX reference (same math, plain jnp ops) for correctness checking
# ----------------------------------------------------------------------------
def _ref_gru_dir(x_tbd, step_mask, h0, p, reverse):
    T, B, D = x_tbd.shape
    H = p["whhT"].shape[0]
    gx = (x_tbd.reshape(T * B, D) @ p["wihT"] + p["bih"]).reshape(T, B, 3 * H)
    h = h0
    outs = [None] * T
    order = range(T - 1, -1, -1) if reverse else range(T)
    for t in order:
        gi = gx[t]
        gh = h @ p["whhT"] + p["bhh"]
        r = jax.nn.sigmoid(gi[:, :H] + gh[:, :H])
        z = jax.nn.sigmoid(gi[:, H:2 * H] + gh[:, H:2 * H])
        n = jnp.tanh(gi[:, 2 * H:] + r * gh[:, 2 * H:])
        h_new = (1.0 - z) * n + z * h
        m = step_mask[t][:, None]
        h = m * h_new + (1.0 - m) * h
        outs[t] = h * m
    return jnp.stack(outs, 0)


def _ref_forward(raw, x_btd, lens, h1, h2):
    B, T, _ = x_btd.shape
    x_tbd = jnp.transpose(x_btd, (1, 0, 2)).astype(jnp.float32)
    step_mask = (jnp.arange(T)[:, None] < lens[None, :]).astype(jnp.float32)

    def layer(x, hf, hb, pf, pb):
        return jnp.concatenate([_ref_gru_dir(x, step_mask, hf, pf, False),
                                _ref_gru_dir(x, step_mask, hb, pb, True)], -1)

    y = layer(x_tbd, h1[0], h1[1], raw["gru1_l0_f"], raw["gru1_l0_b"])
    y = layer(y, h1[2], h1[3], raw["gru1_l1_f"], raw["gru1_l1_b"])
    y = layer(y, h2[0], h2[1], raw["gru2_l0_f"], raw["gru2_l0_b"])
    logits = (y.reshape(T * B, -1) @ raw["clsT"] + raw["cls_b"]).reshape(T, B, -1)
    out = jax.nn.log_softmax(logits, axis=0)      # log_softmax over the time axis
    return jnp.transpose(out, (1, 0, 2))


if __name__ == "__main__":
    B, T = 4, 16
    INPUT_SIZE, H1, H2, TAGSET = 32, 64, 64, 8

    root = jax.random.PRNGKey(0)
    kp, kx, kh = jax.random.split(root, 3)

    raw = init_raw_params(kp, INPUT_SIZE, H1, H2, TAGSET)
    params = fuse_params(raw, INPUT_SIZE, H1, H2, TAGSET)

    x = jax.random.normal(kx, (B, T, INPUT_SIZE), jnp.float32)
    lens = jnp.array([7, 16, 3, 11], jnp.int32)
    masks = (jnp.arange(T)[None, :] < lens[:, None]).astype(jnp.float32)   # (B, T)
    h1, h2 = init_hidden(kh, B, H1, H2, lens)

    fwd = jax.jit(lambda p, xx, ll, mm, a, b: pos_tagger_forward(
        p, xx, ll, mm, a, b, tagset=TAGSET, time_block=8))
    out = fwd(params, x, lens, masks, h1, h2)
    out = jax.block_until_ready(out)

    ref = _ref_forward(raw, x, lens, h1, h2)
    assert out.shape == (B, T, TAGSET), out.shape
    max_err = float(jnp.max(jnp.abs(out - ref)))
    assert jnp.allclose(out, ref, atol=1e-3, rtol=1e-3), max_err

    print("KERNEL_OK")
</pallas_src>

<mosaic_0001>
module attributes {stable_mosaic.version = 11 : i64} {
  func.func @kernel(%arg0: i32, %arg1: memref<1x64x32xf32, #tpu.memory_space<vmem>>, %arg2: memref<2x1x32x192xf32, #tpu.memory_space<vmem>>, %arg3: memref<2x1x192xf32, #tpu.memory_space<vmem>>, %arg4: memref<2x64x192xf32, #tpu.memory_space<vmem>>) attributes {dimension_semantics = [#tpu.dimension_semantics<parallel>], iteration_bounds = array<i64: 2>, scalar_prefetch = 0 : i64, scratch_operands = 0 : i64, tpu.core_type = #tpu.core_type<tc>, window_params = [{transform_indices = @transform_0, window_bounds = array<i64: 1, 64, 32>}, {pipeline_mode = #tpu.pipeline_mode<synchronous>, transform_indices = @transform_1, window_bounds = array<i64: 2, 1, 32, 192>}, {pipeline_mode = #tpu.pipeline_mode<synchronous>, transform_indices = @transform_2, window_bounds = array<i64: 2, 1, 192>}, {transform_indices = @transform_3, window_bounds = array<i64: 2, 64, 192>}]} {
    %c0 = arith.constant 0 : index
    %c0_0 = arith.constant 0 : index
    %c0_1 = arith.constant 0 : index
    %0 = vector.load %arg1[%c0, %c0_0, %c0_1] : memref<1x64x32xf32, #tpu.memory_space<vmem>>, vector<1x64x32xf32>
    %1 = vector.shape_cast %0 : vector<1x64x32xf32> to vector<64x32xf32>
    %c0_2 = arith.constant 0 : index
    %c0_3 = arith.constant 0 : index
    %c0_4 = arith.constant 0 : index
    %c0_5 = arith.constant 0 : index
    %2 = vector.load %arg2[%c0_2, %c0_3, %c0_4, %c0_5] : memref<2x1x32x192xf32, #tpu.memory_space<vmem>>, vector<1x1x32x192xf32>
    %3 = vector.shape_cast %2 : vector<1x1x32x192xf32> to vector<32x192xf32>
    %cst = arith.constant dense<0.000000e+00> : vector<64x192xf32>
    %4 = tpu.matmul %1, %3, %cst {dimension_numbers = #tpu.dot_dimension_numbers<[1], [0], [0], [1], [0, 0, 1, 1], [], []>} : vector<64x32xf32>, vector<32x192xf32>, vector<64x192xf32> -> vector<64x192xf32>
    %c0_6 = arith.constant 0 : index
    %c0_7 = arith.constant 0 : index
    %c0_8 = arith.constant 0 : index
    %5 = vector.load %arg3[%c0_6, %c0_7, %c0_8] : memref<2x1x192xf32, #tpu.memory_space<vmem>>, vector<1x1x192xf32>
    %6 = vector.shape_cast %5 : vector<1x1x192xf32> to vector<1x192xf32>
    %7 = vector.broadcast %6 : vector<1x192xf32> to vector<64x192xf32>
    %8 = arith.addf %4, %7 : vector<64x192xf32>
    %c0_9 = arith.constant 0 : index
    %c0_10 = arith.constant 0 : index
    %c0_11 = arith.constant 0 : index
    %9 = vector.load %arg4[%c0_9, %c0_10, %c0_11] : memref<2x64x192xf32, #tpu.memory_space<vmem>>, vector<1x64x192xf32>
    %10 = vector.shape_cast %9 : vector<1x64x192xf32> to vector<64x192xf32>
    %11 = vector.shape_cast %8 : vector<64x192xf32> to vector<1x64x192xf32>
    tpu.vector_store %arg4[%c0_9, %c0_10, %c0_11], %11 {strides = array<i32>} : memref<2x64x192xf32, #tpu.memory_space<vmem>>, vector<1x64x192xf32>,
    %c1 = arith.constant 1 : index
    %c0_12 = arith.constant 0 : index
    %c0_13 = arith.constant 0 : index
    %c0_14 = arith.constant 0 : index
    %12 = vector.load %arg2[%c1, %c0_12, %c0_13, %c0_14] : memref<2x1x32x192xf32, #tpu.memory_space<vmem>>, vector<1x1x32x192xf32>
    %13 = vector.shape_cast %12 : vector<1x1x32x192xf32> to vector<32x192xf32>
    %cst_15 = arith.constant dense<0.000000e+00> : vector<64x192xf32>
    %14 = tpu.matmul %1, %13, %cst_15 {dimension_numbers = #tpu.dot_dimension_numbers<[1], [0], [0], [1], [0, 0, 1, 1], [], []>} : vector<64x32xf32>, vector<32x192xf32>, vector<64x192xf32> -> vector<64x192xf32>
    %c1_16 = arith.constant 1 : index
    %c0_17 = arith.constant 0 : index
    %c0_18 = arith.constant 0 : index
    %15 = vector.load %arg3[%c1_16, %c0_17, %c0_18] : memref<2x1x192xf32, #tpu.memory_space<vmem>>, vector<1x1x192xf32>
    %16 = vector.shape_cast %15 : vector<1x1x192xf32> to vector<1x192xf32>
    %17 = vector.broadcast %16 : vector<1x192xf32> to vector<64x192xf32>
    %18 = arith.addf %14, %17 : vector<64x192xf32>
    %c1_19 = arith.constant 1 : index
    %c0_20 = arith.constant 0 : index
    %c0_21 = arith.constant 0 : index
    %19 = vector.load %arg4[%c1_19, %c0_20, %c0_21] : memref<2x64x192xf32, #tpu.memory_space<vmem>>, vector<1x64x192xf32>
    %20 = vector.shape_cast %19 : vector<1x64x192xf32> to vector<64x192xf32>
    %21 = vector.shape_cast %18 : vector<64x192xf32> to vector<1x64x192xf32>
    tpu.vector_store %arg4[%c1_19, %c0_20, %c0_21], %21 {strides = array<i32>} : memref<2x64x192xf32, #tpu.memory_space<vmem>>, vector<1x64x192xf32>,
    return
  }
  func.func @transform_0(%arg0: i32) -> (i32, i32, i32) {
    %c0_i32 = arith.constant 0 : i32
    %c0_i32_0 = arith.constant 0 : i32
    %c0_i32_1 = arith.constant 0 : i32
    return %c0_i32, %arg0, %c0_i32_0 : i32, i32, i32
  }
  func.func @transform_1(%arg0: i32) -> (i32, i32, i32, i32) {
    %c0_i32 = arith.constant 0 : i32
    %c0_i32_0 = arith.constant 0 : i32
    %c0_i32_1 = arith.constant 0 : i32
    %c0_i32_2 = arith.constant 0 : i32
    %c0_i32_3 = arith.constant 0 : i32
    return %c0_i32, %c0_i32_0, %c0_i32_1, %c0_i32_2 : i32, i32, i32, i32
  }
  func.func @transform_2(%arg0: i32) -> (i32, i32, i32) {
    %c0_i32 = arith.constant 0 : i32
    %c0_i32_0 = arith.constant 0 : i32
    %c0_i32_1 = arith.constant 0 : i32
    %c0_i32_2 = arith.constant 0 : i32
    return %c0_i32, %c0_i32_0, %c0_i32_1 : i32, i32, i32
  }
  func.func @transform_3(%arg0: i32) -> (i32, i32, i32) {
    %c0_i32 = arith.constant 0 : i32
    %c0_i32_0 = arith.constant 0 : i32
    %c0_i32_1 = arith.constant 0 : i32
    return %c0_i32, %arg0, %c0_i32_0 : i32, i32, i32
  }
}

module attributes {stable_mosaic.version = 11 : i64} {
  func.func @kernel(%arg0: i32, %arg1: memref<2x16x8x64xf32, #tpu.memory_space<vmem>>, %arg2: memref<2x64x128xf32, #tpu.memory_space<vmem>>, %arg3: memref<1x128xf32, #tpu.memory_space<vmem>>, %arg4: memref<16x8x128xf32, #tpu.memory_space<vmem>>) attributes {dimension_semantics = [#tpu.dimension_semantics<parallel>], iteration_bounds = array<i64: 1>, scalar_prefetch = 0 : i64, scratch_operands = 0 : i64, tpu.core_type = #tpu.core_type<tc>, window_params = [{transform_indices = @transform_0, window_bounds = array<i64: 2, 16, 8, 64>}, {pipeline_mode = #tpu.pipeline_mode<synchronous>, transform_indices = @transform_1, window_bounds = array<i64: 2, 64, 128>}, {pipeline_mode = #tpu.pipeline_mode<synchronous>, transform_indices = @transform_2, window_bounds = array<i64: 1, 128>}, {transform_indices = @transform_3, window_bounds = array<i64: 16, 8, 128>}]} {
    %c0 = arith.constant 0 : index
    %c0_0 = arith.constant 0 : index
    %c0_1 = arith.constant 0 : index
    %c0_2 = arith.constant 0 : index
    %0 = vector.load %arg1[%c0, %c0_0, %c0_1, %c0_2] : memref<2x16x8x64xf32, #tpu.memory_space<vmem>>, vector<1x16x8x64xf32>
    %1 = vector.shape_cast %0 : vector<1x16x8x64xf32> to vector<16x8x64xf32>
    %2 = vector.shape_cast %1 : vector<16x8x64xf32> to vector<128x64xf32>
    %c1 = arith.constant 1 : index
    %c0_3 = arith.constant 0 : index
    %c0_4 = arith.constant 0 : index
    %c0_5 = arith.constant 0 : index
    %3 = vector.load %arg1[%c1, %c0_3, %c0_4, %c0_5] : memref<2x16x8x64xf32, #tpu.memory_space<vmem>>, vector<1x16x8x64xf32>
    %4 = vector.shape_cast %3 : vector<1x16x8x64xf32> to vector<16x8x64xf32>
    %5 = vector.shape_cast %4 : vector<16x8x64xf32> to vector<128x64xf32>
    %c0_6 = arith.constant 0 : index
    %c0_7 = arith.constant 0 : index
    %c0_8 = arith.constant 0 : index
    %6 = vector.load %arg2[%c0_6, %c0_7, %c0_8] : memref<2x64x128xf32, #tpu.memory_space<vmem>>, vector<1x64x128xf32>
    %7 = vector.shape_cast %6 : vector<1x64x128xf32> to vector<64x128xf32>
    %cst = arith.constant dense<0.000000e+00> : vector<128x128xf32>
    %8 = tpu.matmul %2, %7, %cst {dimension_numbers = #tpu.dot_dimension_numbers<[1], [0], [0], [1], [0, 0, 1, 1], [], []>} : vector<128x64xf32>, vector<64x128xf32>, vector<128x128xf32> -> vector<128x128xf32>
    %c1_9 = arith.constant 1 : index
    %c0_10 = arith.constant 0 : index
    %c0_11 = arith.constant 0 : index
    %9 = vector.load %arg2[%c1_9, %c0_10, %c0_11] : memref<2x64x128xf32, #tpu.memory_space<vmem>>, vector<1x64x128xf32>
    %10 = vector.shape_cast %9 : vector<1x64x128xf32> to vector<64x128xf32>
    %cst_12 = arith.constant dense<0.000000e+00> : vector<128x128xf32>
    %11 = tpu.matmul %5, %10, %cst_12 {dimension_numbers = #tpu.dot_dimension_numbers<[1], [0], [0], [1], [0, 0, 1, 1], [], []>} : vector<128x64xf32>, vector<64x128xf32>, vector<128x128xf32> -> vector<128x128xf32>
    %12 = arith.addf %8, %11 : vector<128x128xf32>
    %c0_13 = arith.constant 0 : index
    %c0_14 = arith.constant 0 : index
    %13 = vector.load %arg3[%c0_13, %c0_14] : memref<1x128xf32, #tpu.memory_space<vmem>>, vector<1x128xf32>
    %14 = vector.broadcast %13 : vector<1x128xf32> to vector<128x128xf32>
    %15 = arith.addf %12, %14 : vector<128x128xf32>
    %16 = vector.shape_cast %15 : vector<128x128xf32> to vector<16x8x128xf32>
    %cst_15 = arith.constant dense<0xFF800000> : vector<8x128xf32>
    %17 = vector.multi_reduction <maximumf>, %16, %cst_15 [0] : vector<16x8x128xf32> to vector<8x128xf32>
    %18 = vector.shape_cast %17 : vector<8x128xf32> to vector<1x8x128xf32>
    %19 = vector.broadcast %18 : vector<1x8x128xf32> to vector<16x8x128xf32>
    %20 = arith.subf %16, %19 : vector<16x8x128xf32>
    %21 = math.exp %20 : vector<16x8x128xf32>
    %cst_16 = arith.constant dense<0.000000e+00> : vector<8x128xf32>
    %22 = vector.multi_reduction <add>, %21, %cst_16 [0] : vector<16x8x128xf32> to vector<8x128xf32>
    %23 = vector.shape_cast %22 : vector<8x128xf32> to vector<1x8x128xf32>
    %24 = math.log %23 : vector<1x8x128xf32>
    %25 = vector.broadcast %24 : vector<1x8x128xf32> to vector<16x8x128xf32>
    %26 = arith.subf %20, %25 : vector<16x8x128xf32>
    %c0_17 = arith.constant 0 : index
    %c0_18 = arith.constant 0 : index
    %c0_19 = arith.constant 0 : index
    %27 = vector.load %arg4[%c0_17, %c0_18, %c0_19] : memref<16x8x128xf32, #tpu.memory_space<vmem>>, vector<16x8x128xf32>
    tpu.vector_store %arg4[%c0_17, %c0_18, %c0_19], %26 {strides = array<i32>} : memref<16x8x128xf32, #tpu.memory_space<vmem>>, vector<16x8x128xf32>,
    return
  }
  func.func @transform_0(%arg0: i32) -> (i32, i32, i32, i32) {
    %c0_i32 = arith.constant 0 : i32
    %c0_i32_0 = arith.constant 0 : i32
    %c0_i32_1 = arith.constant 0 : i32
    %c0_i32_2 = arith.constant 0 : i32
    return %c0_i32, %c0_i32_0, %arg0, %c0_i32_1 : i32, i32, i32, i32
  }
  func.func @transform_1(%arg0: i32) -> (i32, i32, i32) {
    %c0_i32 = arith.constant 0 : i32
    %c0_i32_0 = arith.constant 0 : i32
    %c0_i32_1 = arith.constant 0 : i32
    %c0_i32_2 = arith.constant 0 : i32
    return %c0_i32, %c0_i32_0, %c0_i32_1 : i32, i32, i32
  }
  func.func @transform_2(%arg0: i32) -> (i32, i32) {
    %c0_i32 = arith.constant 0 : i32
    %c0_i32_0 = arith.constant 0 : i32
    %c0_i32_1 = arith.constant 0 : i32
    return %c0_i32, %c0_i32_0 : i32, i32
  }
  func.func @transform_3(%arg0: i32) -> (i32, i32, i32) {
    %c0_i32 = arith.constant 0 : i32
    %c0_i32_0 = arith.constant 0 : i32
    %c0_i32_1 = arith.constant 0 : i32
    return %c0_i32, %arg0, %c0_i32_0 : i32, i32, i32
  }
}

module attributes {stable_mosaic.version = 11 : i64} {
  func.func @kernel(%arg0: i32, %arg1: memref<2x64x64xf32, #tpu.memory_space<vmem>>, %arg2: memref<2x2x64x192xf32, #tpu.memory_space<vmem>>, %arg3: memref<2x1x192xf32, #tpu.memory_space<vmem>>, %arg4: memref<2x64x192xf32, #tpu.memory_space<vmem>>) attributes {dimension_semantics = [#tpu.dimension_semantics<parallel>], iteration_bounds = array<i64: 2>, scalar_prefetch = 0 : i64, scratch_operands = 0 : i64, tpu.core_type = #tpu.core_type<tc>, window_params = [{transform_indices = @transform_0, window_bounds = array<i64: 2, 64, 64>}, {pipeline_mode = #tpu.pipeline_mode<synchronous>, transform_indices = @transform_1, window_bounds = array<i64: 2, 2, 64, 192>}, {pipeline_mode = #tpu.pipeline_mode<synchronous>, transform_indices = @transform_2, window_bounds = array<i64: 2, 1, 192>}, {transform_indices = @transform_3, window_bounds = array<i64: 2, 64, 192>}]} {
    %c0 = arith.constant 0 : index
    %c0_0 = arith.constant 0 : index
    %c0_1 = arith.constant 0 : index
    %0 = vector.load %arg1[%c0, %c0_0, %c0_1] : memref<2x64x64xf32, #tpu.memory_space<vmem>>, vector<1x64x64xf32>
    %1 = vector.shape_cast %0 : vector<1x64x64xf32> to vector<64x64xf32>
    %c1 = arith.constant 1 : index
    %c0_2 = arith.constant 0 : index
    %c0_3 = arith.constant 0 : index
    %2 = vector.load %arg1[%c1, %c0_2, %c0_3] : memref<2x64x64xf32, #tpu.memory_space<vmem>>, vector<1x64x64xf32>
    %3 = vector.shape_cast %2 : vector<1x64x64xf32> to vector<64x64xf32>
    %c0_4 = arith.constant 0 : index
    %c0_5 = arith.constant 0 : index
    %c0_6 = arith.constant 0 : index
    %c0_7 = arith.constant 0 : index
    %4 = vector.load %arg2[%c0_4, %c0_5, %c0_6, %c0_7] : memref<2x2x64x192xf32, #tpu.memory_space<vmem>>, vector<1x1x64x192xf32>
    %5 = vector.shape_cast %4 : vector<1x1x64x192xf32> to vector<64x192xf32>
    %cst = arith.constant dense<0.000000e+00> : vector<64x192xf32>
    %6 = tpu.matmul %1, %5, %cst {dimension_numbers = #tpu.dot_dimension_numbers<[1], [0], [0], [1], [0, 0, 1, 1], [], []>} : vector<64x64xf32>, vector<64x192xf32>, vector<64x192xf32> -> vector<64x192xf32>
    %c0_8 = arith.constant 0 : index
    %c1_9 = arith.constant 1 : index
    %c0_10 = arith.constant 0 : index
    %c0_11 = arith.constant 0 : index
    %7 = vector.load %arg2[%c0_8, %c1_9, %c0_10, %c0_11] : memref<2x2x64x192xf32, #tpu.memory_space<vmem>>, vector<1x1x64x192xf32>
    %8 = vector.shape_cast %7 : vector<1x1x64x192xf32> to vector<64x192xf32>
    %cst_12 = arith.constant dense<0.000000e+00> : vector<64x192xf32>
    %9 = tpu.matmul %3, %8, %cst_12 {dimension_numbers = #tpu.dot_dimension_numbers<[1], [0], [0], [1], [0, 0, 1, 1], [], []>} : vector<64x64xf32>, vector<64x192xf32>, vector<64x192xf32> -> vector<64x192xf32>
    %10 = arith.addf %6, %9 : vector<64x192xf32>
    %c0_13 = arith.constant 0 : index
    %c0_14 = arith.constant 0 : index
    %c0_15 = arith.constant 0 : index
    %11 = vector.load %arg3[%c0_13, %c0_14, %c0_15] : memref<2x1x192xf32, #tpu.memory_space<vmem>>, vector<1x1x192xf32>
    %12 = vector.shape_cast %11 : vector<1x1x192xf32> to vector<1x192xf32>
    %13 = vector.broadcast %12 : vector<1x192xf32> to vector<64x192xf32>
    %14 = arith.addf %10, %13 : vector<64x192xf32>
    %c0_16 = arith.constant 0 : index
    %c0_17 = arith.constant 0 : index
    %c0_18 = arith.constant 0 : index
    %15 = vector.load %arg4[%c0_16, %c0_17, %c0_18] : memref<2x64x192xf32, #tpu.memory_space<vmem>>, vector<1x64x192xf32>
    %16 = vector.shape_cast %15 : vector<1x64x192xf32> to vector<64x192xf32>
    %17 = vector.shape_cast %14 : vector<64x192xf32> to vector<1x64x192xf32>
    tpu.vector_store %arg4[%c0_16, %c0_17, %c0_18], %17 {strides = array<i32>} : memref<2x64x192xf32, #tpu.memory_space<vmem>>, vector<1x64x192xf32>,
    %c1_19 = arith.constant 1 : index
    %c0_20 = arith.constant 0 : index
    %c0_21 = arith.constant 0 : index
    %c0_22 = arith.constant 0 : index
    %18 = vector.load %arg2[%c1_19, %c0_20, %c0_21, %c0_22] : memref<2x2x64x192xf32, #tpu.memory_space<vmem>>, vector<1x1x64x192xf32>
    %19 = vector.shape_cast %18 : vector<1x1x64x192xf32> to vector<64x192xf32>
    %cst_23 = arith.constant dense<0.000000e+00> : vector<64x192xf32>
    %20 = tpu.matmul %1, %19, %cst_23 {dimension_numbers = #tpu.dot_dimension_numbers<[1], [0], [0], [1], [0, 0, 1, 1], [], []>} : vector<64x64xf32>, vector<64x192xf32>, vector<64x192xf32> -> vector<64x192xf32>
    %c1_24 = arith.constant 1 : index
    %c1_25 = arith.constant 1 : index
    %c0_26 = arith.constant 0 : index
    %c0_27 = arith.constant 0 : index
    %21 = vector.load %arg2[%c1_24, %c1_25, %c0_26, %c0_27] : memref<2x2x64x192xf32, #tpu.memory_space<vmem>>, vector<1x1x64x192xf32>
    %22 = vector.shape_cast %21 : vector<1x1x64x192xf32> to vector<64x192xf32>
    %cst_28 = arith.constant dense<0.000000e+00> : vector<64x192xf32>
    %23 = tpu.matmul %3, %22, %cst_28 {dimension_numbers = #tpu.dot_dimension_numbers<[1], [0], [0], [1], [0, 0, 1, 1], [], []>} : vector<64x64xf32>, vector<64x192xf32>, vector<64x192xf32> -> vector<64x192xf32>
    %24 = arith.addf %20, %23 : vector<64x192xf32>
    %c1_29 = arith.constant 1 : index
    %c0_30 = arith.constant 0 : index
    %c0_31 = arith.constant 0 : index
    %25 = vector.load %arg3[%c1_29, %c0_30, %c0_31] : memref<2x1x192xf32, #tpu.memory_space<vmem>>, vector<1x1x192xf32>
    %26 = vector.shape_cast %25 : vector<1x1x192xf32> to vector<1x192xf32>
    %27 = vector.broadcast %26 : vector<1x192xf32> to vector<64x192xf32>
    %28 = arith.addf %24, %27 : vector<64x192xf32>
    %c1_32 = arith.constant 1 : index
    %c0_33 = arith.constant 0 : index
    %c0_34 = arith.constant 0 : index
    %29 = vector.load %arg4[%c1_32, %c0_33, %c0_34] : memref<2x64x192xf32, #tpu.memory_space<vmem>>, vector<1x64x192xf32>
    %30 = vector.shape_cast %29 : vector<1x64x192xf32> to vector<64x192xf32>
    %31 = vector.shape_cast %28 : vector<64x192xf32> to vector<1x64x192xf32>
    tpu.vector_store %arg4[%c1_32, %c0_33, %c0_34], %31 {strides = array<i32>} : memref<2x64x192xf32, #tpu.memory_space<vmem>>, vector<1x64x192xf32>,
    return
  }
  func.func @transform_0(%arg0: i32) -> (i32, i32, i32) {
    %c0_i32 = arith.constant 0 : i32
    %c0_i32_0 = arith.constant 0 : i32
    %c0_i32_1 = arith.constant 0 : i32
    return %c0_i32, %arg0, %c0_i32_0 : i32, i32, i32
  }
  func.func @transform_1(%arg0: i32) -> (i32, i32, i32, i32) {
    %c0_i32 = arith.constant 0 : i32
    %c0_i32_0 = arith.constant 0 : i32
    %c0_i32_1 = arith.constant 0 : i32
    %c0_i32_2 = arith.constant 0 : i32
    %c0_i32_3 = arith.constant 0 : i32
    return %c0_i32, %c0_i32_0, %c0_i32_1, %c0_i32_2 : i32, i32, i32, i32
  }
  func.func @transform_2(%arg0: i32) -> (i32, i32, i32) {
    %c0_i32 = arith.constant 0 : i32
    %c0_i32_0 = arith.constant 0 : i32
    %c0_i32_1 = arith.constant 0 : i32
    %c0_i32_2 = arith.constant 0 : i32
    return %c0_i32, %c0_i32_0, %c0_i32_1 : i32, i32, i32
  }
  func.func @transform_3(%arg0: i32) -> (i32, i32, i32) {
    %c0_i32 = arith.constant 0 : i32
    %c0_i32_0 = arith.constant 0 : i32
    %c0_i32_1 = arith.constant 0 : i32
    return %c0_i32, %arg0, %c0_i32_0 : i32, i32, i32
  }
}

module attributes {stable_mosaic.version = 11 : i64} {
  func.func @kernel(%arg0: i32, %arg1: i32, %arg2: memref<1x8x8x192xf32, #tpu.memory_space<vmem>>, %arg3: memref<8x1xi32, #tpu.memory_space<vmem>>, %arg4: memref<1x8x64xf32, #tpu.memory_space<vmem>>, %arg5: memref<1x64x192xf32, #tpu.memory_space<vmem>>, %arg6: memref<1x1x192xf32, #tpu.memory_space<vmem>>, %arg7: memref<1x8x8x64xf32, #tpu.memory_space<vmem>>, %arg8: memref<8x64xf32, #tpu.memory_space<vmem>>) attributes {dimension_semantics = [#tpu.dimension_semantics<parallel>, #tpu.dimension_semantics<arbitrary>], iteration_bounds = array<i64: 2, 2>, scalar_prefetch = 0 : i64, scratch_operands = 1 : i64, tpu.core_type = #tpu.core_type<tc>, window_params = [{transform_indices = @transform_0, window_bounds = array<i64: 1, 8, 8, 192>}, {pipeline_mode = #tpu.pipeline_mode<synchronous>, transform_indices = @transform_1, window_bounds = array<i64: 8, 1>}, {transform_indices = @transform_2, window_bounds = array<i64: 1, 8, 64>}, {transform_indices = @transform_3, window_bounds = array<i64: 1, 64, 192>}, {transform_indices = @transform_4, window_bounds = array<i64: 1, 1, 192>}, {transform_indices = @transform_5, window_bounds = array<i64: 1, 8, 8, 64>}]} {
    %c0_i32 = arith.constant 0 : i32
    %0 = arith.cmpi eq, %arg1, %c0_i32 : i32
    %1 = arith.extui %0 : i1 to i32
    %c0_i32_0 = arith.constant 0 : i32
    %2 = arith.cmpi ne, %1, %c0_i32_0 : i32
    scf.if %2 {
      %c0_11 = arith.constant 0 : index
      %c0_12 = arith.constant 0 : index
      %c0_13 = arith.constant 0 : index
      %14 = vector.load %arg4[%c0_11, %c0_12, %c0_13] : memref<1x8x64xf32, #tpu.memory_space<vmem>>, vector<1x8x64xf32>
      %15 = vector.shape_cast %14 : vector<1x8x64xf32> to vector<8x64xf32>
      %c0_14 = arith.constant 0 : index
      %c0_15 = arith.constant 0 : index
      %16 = vector.load %arg8[%c0_14, %c0_15] : memref<8x64xf32, #tpu.memory_space<vmem>>, vector<8x64xf32>
      tpu.vector_store %arg8[%c0_14, %c0_15], %15 {strides = array<i32>} : memref<8x64xf32, #tpu.memory_space<vmem>>, vector<8x64xf32>,
    } else {
    }
    %c0 = arith.constant 0 : index
    %c0_1 = arith.constant 0 : index
    %3 = vector.load %arg3[%c0, %c0_1] : memref<8x1xi32, #tpu.memory_space<vmem>>, vector<8x1xi32>
    %c0_2 = arith.constant 0 : index
    %c0_3 = arith.constant 0 : index
    %c0_4 = arith.constant 0 : index
    %4 = vector.load %arg5[%c0_2, %c0_3, %c0_4] : memref<1x64x192xf32, #tpu.memory_space<vmem>>, vector<1x64x192xf32>
    %5 = vector.shape_cast %4 : vector<1x64x192xf32> to vector<64x192xf32>
    %c0_5 = arith.constant 0 : index
    %c0_6 = arith.constant 0 : index
    %c0_7 = arith.constant 0 : index
    %6 = vector.load %arg6[%c0_5, %c0_6, %c0_7] : memref<1x1x192xf32, #tpu.memory_space<vmem>>, vector<1x1x192xf32>
    %7 = vector.shape_cast %6 : vector<1x1x192xf32> to vector<1x192xf32>
    %c0_i32_8 = arith.constant 0 : i32
    %8 = arith.cmpi eq, %arg0, %c0_i32_8 : i32
    %9 = arith.extui %8 : i1 to i32
    %c0_i32_9 = arith.constant 0 : i32
    %10 = arith.cmpi ne, %9, %c0_i32_9 : i32
    scf.if %10 {
      %c8_i32 = arith.constant 8 : i32
      %14 = arith.muli %arg1, %c8_i32 : i32
      %c0_i32_11 = arith.constant 0 : i32
      %15 = arith.addi %14, %c0_i32_11 : i32
      %c0_12 = arith.constant 0 : index
      %c0_13 = arith.constant 0 : index
      %16 = vector.load %arg8[%c0_12, %c0_13] : memref<8x64xf32, #tpu.memory_space<vmem>>, vector<8x64xf32>
      %c0_14 = arith.constant 0 : index
      %c0_15 = arith.constant 0 : index
      %c0_16 = arith.constant 0 : index
      %c0_17 = arith.constant 0 : index
      %17 = vector.load %arg2[%c0_14, %c0_15, %c0_16, %c0_17] : memref<1x8x8x192xf32, #tpu.memory_space<vmem>>, vector<1x1x8x192xf32>
      %18 = vector.shape_cast %17 : vector<1x1x8x192xf32> to vector<8x192xf32>
      %cst = arith.constant dense<0.000000e+00> : vector<8x192xf32>
      %19 = tpu.matmul %16, %5, %cst {dimension_numbers = #tpu.dot_dimension_numbers<[1], [0], [0], [1], [0, 0, 1, 1], [], []>} : vector<8x64xf32>, vector<64x192xf32>, vector<8x192xf32> -> vector<8x192xf32>
      %20 = vector.broadcast %7 : vector<1x192xf32> to vector<8x192xf32>
      %21 = arith.addf %19, %20 : vector<8x192xf32>
      %22 = vector.extract_strided_slice %18 {offsets = [0, 0], sizes = [8, 64], strides = [1, 1]} : vector<8x192xf32> to vector<8x64xf32>
      %23 = vector.extract_strided_slice %21 {offsets = [0, 0], sizes = [8, 64], strides = [1, 1]} : vector<8x192xf32> to vector<8x64xf32>
      %24 = arith.addf %22, %23 : vector<8x64xf32>
      %25 = arith.negf %24 : vector<8x64xf32>
      %26 = math.exp %25 : vector<8x64xf32>
      %cst_18 = arith.constant 1.000000e+00 : f32
      %27 = vector.broadcast %cst_18 : f32 to vector<8x64xf32>
      %28 = arith.addf %27, %26 : vector<8x64xf32>
      %29 = arith.divf %27, %28 : vector<8x64xf32>
      %30 = vector.extract_strided_slice %18 {offsets = [0, 64], sizes = [8, 64], strides = [1, 1]} : vector<8x192xf32> to vector<8x64xf32>
      %31 = vector.extract_strided_slice %21 {offsets = [0, 64], sizes = [8, 64], strides = [1, 1]} : vector<8x192xf32> to vector<8x64xf32>
      %32 = arith.addf %30, %31 : vector<8x64xf32>
      %33 = arith.negf %32 : vector<8x64xf32>
      %34 = math.exp %33 : vector<8x64xf32>
      %cst_19 = arith.constant 1.000000e+00 : f32
      %35 = vector.broadcast %cst_19 : f32 to vector<8x64xf32>
      %36 = arith.addf %35, %34 : vector<8x64xf32>
      %37 = arith.divf %35, %36 : vector<8x64xf32>
      %38 = vector.extract_strided_slice %18 {offsets = [0, 128], sizes = [8, 64], strides = [1, 1]} : vector<8x192xf32> to vector<8x64xf32>
      %39 = vector.extract_strided_slice %21 {offsets = [0, 128], sizes = [8, 64], strides = [1, 1]} : vector<8x192xf32> to vector<8x64xf32>
      %40 = arith.mulf %29, %39 : vector<8x64xf32>
      %41 = arith.addf %38, %40 : vector<8x64xf32>
      %42 = math.tanh %41 : vector<8x64xf32>
      %43 = arith.subf %16, %42 : vector<8x64xf32>
      %44 = arith.mulf %37, %43 : vector<8x64xf32>
      %45 = arith.addf %42, %44 : vector<8x64xf32>
      %46 = vector.broadcast %15 : i32 to vector<8x1xi32>
      %47 = arith.cmpi slt, %46, %3 : vector<8x1xi32>
      %48 = arith.extui %47 : vector<8x1xi1> to vector<8x1xi32>
      %49 = arith.sitofp %48 : vector<8x1xi32> to vector<8x1xf32>
      %50 = arith.subf %45, %16 : vector<8x64xf32>
      %51 = vector.broadcast %49 : vector<8x1xf32> to vector<8x64xf32>
      %52 = arith.mulf %51, %50 : vector<8x64xf32>
      %53 = arith.addf %16, %52 : vector<8x64xf32>
      %c0_20 = arith.constant 0 : index
      %c0_21 = arith.constant 0 : index
      %54 = vector.load %arg8[%c0_20, %c0_21] : memref<8x64xf32, #tpu.memory_space<vmem>>, vector<8x64xf32>
      tpu.vector_store %arg8[%c0_20, %c0_21], %53 {strides = array<i32>} : memref<8x64xf32, #tpu.memory_space<vmem>>, vector<8x64xf32>,
      %55 = vector.broadcast %49 : vector<8x1xf32> to vector<8x64xf32>
      %56 = arith.mulf %53, %55 : vector<8x64xf32>
      %c0_22 = arith.constant 0 : index
      %c0_23 = arith.constant 0 : index
      %c0_24 = arith.constant 0 : index
      %c0_25 = arith.constant 0 : index
      %57 = vector.load %arg7[%c0_22, %c0_23, %c0_24, %c0_25] : memref<1x8x8x64xf32, #tpu.memory_space<vmem>>, vector<1x1x8x64xf32>
      %58 = vector.shape_cast %57 : vector<1x1x8x64xf32> to vector<8x64xf32>
      %59 = vector.shape_cast %56 : vector<8x64xf32> to vector<1x1x8x64xf32>
      tpu.vector_store %arg7[%c0_22, %c0_23, %c0_24, %c0_25], %59 {strides = array<i32>} : memref<1x8x8x64xf32, #tpu.memory_space<vmem>>, vector<1x1x8x64xf32>,
      %c1_i32_26 = arith.constant 1 : i32
      %60 = arith.addi %14, %c1_i32_26 : i32
      %c0_27 = arith.constant 0 : index
      %c0_28 = arith.constant 0 : index
      %61 = vector.load %arg8[%c0_27, %c0_28] : memref<8x64xf32, #tpu.memory_space<vmem>>, vector<8x64xf32>
      %c0_29 = arith.constant 0 : index
      %c1 = arith.constant 1 : index
      %c0_30 = arith.constant 0 : index
      %c0_31 = arith.constant 0 : index
      %62 = vector.load %arg2[%c0_29, %c1, %c0_30, %c0_31] : memref<1x8x8x192xf32, #tpu.memory_space<vmem>>, vector<1x1x8x192xf32>
      %63 = vector.shape_cast %62 : vector<1x1x8x192xf32> to vector<8x192xf32>
      %cst_32 = arith.constant dense<0.000000e+00> : vector<8x192xf32>
      %64 = tpu.matmul %61, %5, %cst_32 {dimension_numbers = #tpu.dot_dimension_numbers<[1], [0], [0], [1], [0, 0, 1, 1], [], []>} : vector<8x64xf32>, vector<64x192xf32>, vector<8x192xf32> -> vector<8x192xf32>
      %65 = vector.broadcast %7 : vector<1x192xf32> to vector<8x192xf32>
      %66 = arith.addf %64, %65 : vector<8x192xf32>
      %67 = vector.extract_strided_slice %63 {offsets = [0, 0], sizes = [8, 64], strides = [1, 1]} : vector<8x192xf32> to vector<8x64xf32>
      %68 = vector.extract_strided_slice %66 {offsets = [0, 0], sizes = [8, 64], strides = [1, 1]} : vector<8x192xf32> to vector<8x64xf32>
      %69 = arith.addf %67, %68 : vector<8x64xf32>
      %70 = arith.negf %69 : vector<8x64xf32>
      %71 = math.exp %70 : vector<8x64xf32>
      %cst_33 = arith.constant 1.000000e+00 : f32
      %72 = vector.broadcast %cst_33 : f32 to vector<8x64xf32>
      %73 = arith.addf %72, %71 : vector<8x64xf32>
      %74 = arith.divf %72, %73 : vector<8x64xf32>
      %75 = vector.extract_strided_slice %63 {offsets = [0, 64], sizes = [8, 64], strides = [1, 1]} : vector<8x192xf32> to vector<8x64xf32>
      %76 = vector.extract_strided_slice %66 {offsets = [0, 64], sizes = [8, 64], strides = [1, 1]} : vector<8x192xf32> to vector<8x64xf32>
      %77 = arith.addf %75, %76 : vector<8x64xf32>
      %78 = arith.negf %77 : vector<8x64xf32>
      %79 = math.exp %78 : vector<8x64xf32>
      %cst_34 = arith.constant 1.000000e+00 : f32
      %80 = vector.broadcast %cst_34 : f32 to vector<8x64xf32>
      %81 = arith.addf %80, %79 : vector<8x64xf32>
      %82 = arith.divf %80, %81 : vector<8x64xf32>
      %83 = vector.extract_strided_slice %63 {offsets = [0, 128], sizes = [8, 64], strides = [1, 1]} : vector<8x192xf32> to vector<8x64xf32>
      %84 = vector.extract_strided_slice %66 {offsets = [0, 128], sizes = [8, 64], strides = [1, 1]} : vector<8x192xf32> to vector<8x64xf32>
      %85 = arith.mulf %74, %84 : vector<8x64xf32>
      %86 = arith.addf %83, %85 : vector<8x64xf32>
      %87 = math.tanh %86 : vector<8x64xf32>
      %88 = arith.subf %61, %87 : vector<8x64xf32>
      %89 = arith.mulf %82, %88 : vector<8x64xf32>
      %90 = arith.addf %87, %89 : vector<8x64xf32>
      %91 = vector.broadcast %60 : i32 to vector<8x1xi32>
      %92 = arith.cmpi slt, %91, %3 : vector<8x1xi32>
      %93 = arith.extui %92 : vector<8x1xi1> to vector<8x1xi32>
      %94 = arith.sitofp %93 : vector<8x1xi32> to vector<8x1xf32>
      %95 = arith.subf %90, %61 : vector<8x64xf32>
      %96 = vector.broadcast %94 : vector<8x1xf32> to vector<8x64xf32>
      %97 = arith.mulf %96, %95 : vector<8x64xf32>
      %98 = arith.addf %61, %97 : vector<8x64xf32>
      %c0_35 = arith.constant 0 : index
      %c0_36 = arith.constant 0 : index
      %99 = vector.load %arg8[%c0_35, %c0_36] : memref<8x64xf32, #tpu.memory_space<vmem>>, vector<8x64xf32>
      tpu.vector_store %arg8[%c0_35, %c0_36], %98 {strides = array<i32>} : memref<8x64xf32, #tpu.memory_space<vmem>>, vector<8x64xf32>,
      %100 = vector.broadcast %94 : vector<8x1xf32> to vector<8x64xf32>
      %101 = arith.mulf %98, %100 : vector<8x64xf32>
      %c0_37 = arith.constant 0 : index
      %c1_38 = arith.constant 1 : index
      %c0_39 = arith.constant 0 : index
      %c0_40 = arith.constant 0 : index
      %102 = vector.load %arg7[%c0_37, %c1_38, %c0_39, %c0_40] : memref<1x8x8x64xf32, #tpu.memory_space<vmem>>, vector<1x1x8x64xf32>
      %103 = vector.shape_cast %102 : vector<1x1x8x64xf32> to vector<8x64xf32>
      %104 = vector.shape_cast %101 : vector<8x64xf32> to vector<1x1x8x64xf32>
      tpu.vector_store %arg7[%c0_37, %c1_38, %c0_39, %c0_40], %104 {strides = array<i32>} : memref<1x8x8x64xf32, #tpu.memory_space<vmem>>, vector<1x1x8x64xf32>,
      %c2_i32 = arith.constant 2 : i32
      %105 = arith.addi %14, %c2_i32 : i32
      %c0_41 = arith.constant 0 : index
      %c0_42 = arith.constant 0 : index
      %106 = vector.load %arg8[%c0_41, %c0_42] : memref<8x64xf32, #tpu.memory_space<vmem>>, vector<8x64xf32>
      %c0_43 = arith.constant 0 : index
      %c2 = arith.constant 2 : index
      %c0_44 = arith.constant 0 : index
      %c0_45 = arith.constant 0 : index
      %107 = vector.load %arg2[%c0_43, %c2, %c0_44, %c0_45] : memref<1x8x8x192xf32, #tpu.memory_space<vmem>>, vector<1x1x8x192xf32>
      %108 = vector.shape_cast %107 : vector<1x1x8x192xf32> to vector<8x192xf32>
      %cst_46 = arith.constant dense<0.000000e+00> : vector<8x192xf32>
      %109 = tpu.matmul %106, %5, %cst_46 {dimension_numbers = #tpu.dot_dimension_numbers<[1], [0], [0], [1], [0, 0, 1, 1], [], []>} : vector<8x64xf32>, vector<64x192xf32>, vector<8x192xf32> -> vector<8x192xf32>
      %110 = vector.broadcast %7 : vector<1x192xf32> to vector<8x192xf32>
      %111 = arith.addf %109, %110 : vector<8x192xf32>
      %112 = vector.extract_strided_slice %108 {offsets = [0, 0], sizes = [8, 64], strides = [1, 1]} : vector<8x192xf32> to vector<8x64xf32>
      %113 = vector.extract_strided_slice %111 {offsets = [0, 0], sizes = [8, 64], strides = [1, 1]} : vector<8x192xf32> to vector<8x64xf32>
      %114 = arith.addf %112, %113 : vector<8x64xf32>
      %115 = arith.negf %114 : vector<8x64xf32>
      %116 = math.exp %115 : vector<8x64xf32>
      %cst_47 = arith.constant 1.000000e+00 : f32
      %117 = vector.broadcast %cst_47 : f32 to vector<8x64xf32>
      %118 = arith.addf %117, %116 : vector<8x64xf32>
      %119 = arith.divf %117, %118 : vector<8x64xf32>
      %120 = vector.extract_strided_slice %108 {offsets = [0, 64], sizes = [8, 64], strides = [1, 1]} : vector<8x192xf32> to vector<8x64xf32>
      %121 = vector.extract_strided_slice %111 {offsets = [0, 64], sizes = [8, 64], strides = [1, 1]} : vector<8x192xf32> to vector<8x64xf32>
      %122 = arith.addf %120, %121 : vector<8x64xf32>
      %123 = arith.negf %122 : vector<8x64xf32>
      %124 = math.exp %123 : vector<8x64xf32>
      %cst_48 = arith.constant 1.000000e+00 : f32
      %125 = vector.broadcast %cst_48 : f32 to vector<8x64xf32>
      %126 = arith.addf %125, %124 : vector<8x64xf32>
      %127 = arith.divf %125, %126 : vector<8x64xf32>
      %128 = vector.extract_strided_slice %108 {offsets = [0, 128], sizes = [8, 64], strides = [1, 1]} : vector<8x192xf32> to vector<8x64xf32>
      %129 = vector.extract_strided_slice %111 {offsets = [0, 128], sizes = [8, 64], strides = [1, 1]} : vector<8x192xf32> to vector<8x64xf32>
      %130 = arith.mulf %119, %129 : vector<8x64xf32>
      %131 = arith.addf %128, %130 : vector<8x64xf32>
      %132 = math.tanh %131 : vector<8x64xf32>
      %133 = arith.subf %106, %132 : vector<8x64xf32>
      %134 = arith.mulf %127, %133 : vector<8x64xf32>
      %135 = arith.addf %132, %134 : vector<8x64xf32>
      %136 = vector.broadcast %105 : i32 to vector<8x1xi32>
      %137 = arith.cmpi slt, %136, %3 : vector<8x1xi32>
      %138 = arith.extui %137 : vector<8x1xi1> to vector<8x1xi32>
      %139 = arith.sitofp %138 : vector<8x1xi32> to vector<8x1xf32>
      %140 = arith.subf %135, %106 : vector<8x64xf32>
      %141 = vector.broadcast %139 : vector<8x1xf32> to vector<8x64xf32>
      %142 = arith.mulf %141, %140 : vector<8x64xf32>
      %143 = arith.addf %106, %142 : vector<8x64xf32>
      %c0_49 = arith.constant 0 : index
      %c0_50 = arith.constant 0 : index
      %144 = vector.load %arg8[%c0_49, %c0_50] : memref<8x64xf32, #tpu.memory_space<vmem>>, vector<8x64xf32>
      tpu.vector_store %arg8[%c0_49, %c0_50], %143 {strides = array<i32>} : memref<8x64xf32, #tpu.memory_space<vmem>>, vector<8x64xf32>,
      %145 = vector.broadcast %139 : vector<8x1xf32> to vector<8x64xf32>
      %146 = arith.mulf %143, %145 : vector<8x64xf32>
      %c0_51 = arith.constant 0 : index
      %c2_52 = arith.constant 2 : index
      %c0_53 = arith.constant 0 : index
      %c0_54 = arith.constant 0 : index
      %147 = vector.load %arg7[%c0_51, %c2_52, %c0_53, %c0_54] : memref<1x8x8x64xf32, #tpu.memory_space<vmem>>, vector<1x1x8x64xf32>
      %148 = vector.shape_cast %147 : vector<1x1x8x64xf32> to vector<8x64xf32>
      %149 = vector.shape_cast %146 : vector<8x64xf32> to vector<1x1x8x64xf32>
      tpu.vector_store %arg7[%c0_51, %c2_52, %c0_53, %c0_54], %149 {strides = array<i32>} : memref<1x8x8x64xf32, #tpu.memory_space<vmem>>, vector<1x1x8x64xf32>,
      %c3_i32 = arith.constant 3 : i32
      %150 = arith.addi %14, %c3_i32 : i32
      %c0_55 = arith.constant 0 : index
      %c0_56 = arith.constant 0 : index
      %151 = vector.load %arg8[%c0_55, %c0_56] : memref<8x64xf32, #tpu.memory_space<vmem>>, vector<8x64xf32>
      %c0_57 = arith.constant 0 : index
      %c3 = arith.constant 3 : index
      %c0_58 = arith.constant 0 : index
      %c0_59 = arith.constant 0 : index
      %152 = vector.load %arg2[%c0_57, %c3, %c0_58, %c0_59] : memref<1x8x8x192xf32, #tpu.memory_space<vmem>>, vector<1x1x8x192xf32>
      %153 = vector.shape_cast %152 : vector<1x1x8x192xf32> to vector<8x192xf32>
      %cst_60 = arith.constant dense<0.000000e+00> : vector<8x192xf32>
      %154 = tpu.matmul %151, %5, %cst_60 {dimension_numbers = #tpu.dot_dimension_numbers<[1], [0], [0], [1], [0, 0, 1, 1], [], []>} : vector<8x64xf32>, vector<64x192xf32>, vector<8x192xf32> -> vector<8x192xf32>
      %155 = vector.broadcast %7 : vector<1x192xf32> to vector<8x192xf32>
      %156 = arith.addf %154, %155 : vector<8x192xf32>
      %157 = vector.extract_strided_slice %153 {offsets = [0, 0], sizes = [8, 64], strides = [1, 1]} : vector<8x192xf32> to vector<8x64xf32>
      %158 = vector.extract_strided_slice %156 {offsets = [0, 0], sizes = [8, 64], strides = [1, 1]} : vector<8x192xf32> to vector<8x64xf32>
      %159 = arith.addf %157, %158 : vector<8x64xf32>
      %160 = arith.negf %159 : vector<8x64xf32>
      %161 = math.exp %160 : vector<8x64xf32>
      %cst_61 = arith.constant 1.000000e+00 : f32
      %162 = vector.broadcast %cst_61 : f32 to vector<8x64xf32>
      %163 = arith.addf %162, %161 : vector<8x64xf32>
      %164 = arith.divf %162, %163 : vector<8x64xf32>
      %165 = vector.extract_strided_slice %153 {offsets = [0, 64], sizes = [8, 64], strides = [1, 1]} : vector<8x192xf32> to vector<8x64xf32>
      %166 = vector.extract_strided_slice %156 {offsets = [0, 64], sizes = [8, 64], strides = [1, 1]} : vector<8x192xf32> to vector<8x64xf32>
      %167 = arith.addf %165, %166 : vector<8x64xf32>
      %168 = arith.negf %167 : vector<8x64xf32>
      %169 = math.exp %168 : vector<8x64xf32>
      %cst_62 = arith.constant 1.000000e+00 : f32
      %170 = vector.broadcast %cst_62 : f32 to vector<8x64xf32>
      %171 = arith.addf %170, %169 : vector<8x64xf32>
      %172 = arith.divf %170, %171 : vector<8x64xf32>
      %173 = vector.extract_strided_slice %153 {offsets = [0, 128], sizes = [8, 64], strides = [1, 1]} : vector<8x192xf32> to vector<8x64xf32>
      %174 = vector.extract_strided_slice %156 {offsets = [0, 128], sizes = [8, 64], strides = [1, 1]} : vector<8x192xf32> to vector<8x64xf32>
      %175 = arith.mulf %164, %174 : vector<8x64xf32>
      %176 = arith.addf %173, %175 : vector<8x64xf32>
      %177 = math.tanh %176 : vector<8x64xf32>
      %178 = arith.subf %151, %177 : vector<8x64xf32>
      %179 = arith.mulf %172, %178 : vector<8x64xf32>
      %180 = arith.addf %177, %179 : vector<8x64xf32>
      %181 = vector.broadcast %150 : i32 to vector<8x1xi32>
      %182 = arith.cmpi slt, %181, %3 : vector<8x1xi32>
      %183 = arith.extui %182 : vector<8x1xi1> to vector<8x1xi32>
      %184 = arith.sitofp %183 : vector<8x1xi32> to vector<8x1xf32>
      %185 = arith.subf %180, %151 : vector<8x64xf32>
      %186 = vector.broadcast %184 : vector<8x1xf32> to vector<8x64xf32>
      %187 = arith.mulf %186, %185 : vector<8x64xf32>
      %188 = arith.addf %151, %187 : vector<8x64xf32>
      %c0_63 = arith.constant 0 : index
      %c0_64 = arith.constant 0 : index
      %189 = vector.load %arg8[%c0_63, %c0_64] : memref<8x64xf32, #tpu.memory_space<vmem>>, vector<8x64xf32>
      tpu.vector_store %arg8[%c0_63, %c0_64], %188 {strides = array<i32>} : memref<8x64xf32, #tpu.memory_space<vmem>>, vector<8x64xf32>,
      %190 = vector.broadcast %184 : vector<8x1xf32> to vector<8x64xf32>
      %191 = arith.mulf %188, %190 : vector<8x64xf32>
      %c0_65 = arith.constant 0 : index
      %c3_66 = arith.constant 3 : index
      %c0_67 = arith.constant 0 : index
      %c0_68 = arith.constant 0 : index
      %192 = vector.load %arg7[%c0_65, %c3_66, %c0_67, %c0_68] : memref<1x8x8x64xf32, #tpu.memory_space<vmem>>, vector<1x1x8x64xf32>
      %193 = vector.shape_cast %192 : vector<1x1x8x64xf32> to vector<8x64xf32>
      %194 = vector.shape_cast %191 : vector<8x64xf32> to vector<1x1x8x64xf32>
      tpu.vector_store %arg7[%c0_65, %c3_66, %c0_67, %c0_68], %194 {strides = array<i32>} : memref<1x8x8x64xf32, #tpu.memory_space<vmem>>, vector<1x1x8x64xf32>,
      %c4_i32 = arith.constant 4 : i32
      %195 = arith.addi %14, %c4_i32 : i32
      %c0_69 = arith.constant 0 : index
      %c0_70 = arith.constant 0 : index
      %196 = vector.load %arg8[%c0_69, %c0_70] : memref<8x64xf32, #tpu.memory_space<vmem>>, vector<8x64xf32>
      %c0_71 = arith.constant 0 : index
      %c4 = arith.constant 4 : index
      %c0_72 = arith.constant 0 : index
      %c0_73 = arith.constant 0 : index
      %197 = vector.load %arg2[%c0_71, %c4, %c0_72, %c0_73] : memref<1x8x8x192xf32, #tpu.memory_space<vmem>>, vector<1x1x8x192xf32>
      %198 = vector.shape_cast %197 : vector<1x1x8x192xf32> to vector<8x192xf32>
      %cst_74 = arith.constant dense<0.000000e+00> : vector<8x192xf32>
      %199 = tpu.matmul %196, %5, %cst_74 {dimension_numbers = #tpu.dot_dimension_numbers<[1], [0], [0], [1], [0, 0, 1, 1], [], []>} : vector<8x64xf32>, vector<64x192xf32>, vector<8x192xf32> -> vector<8x192xf32>
      %200 = vector.broadcast %7 : vector<1x192xf32> to vector<8x192xf32>
      %201 = arith.addf %199, %200 : vector<8x192xf32>
      %202 = vector.extract_strided_slice %198 {offsets = [0, 0], sizes = [8, 64], strides = [1, 1]} : vector<8x192xf32> to vector<8x64xf32>
      %203 = vector.extract_strided_slice %201 {offsets = [0, 0], sizes = [8, 64], strides = [1, 1]} : vector<8x192xf32> to vector<8x64xf32>
      %204 = arith.addf %202, %203 : vector<8x64xf32>
      %205 = arith.negf %204 : vector<8x64xf32>
      %206 = math.exp %205 : vector<8x64xf32>
      %cst_75 = arith.constant 1.000000e+00 : f32
      %207 = vector.broadcast %cst_75 : f32 to vector<8x64xf32>
      %208 = arith.addf %207, %206 : vector<8x64xf32>
      %209 = arith.divf %207, %208 : vector<8x64xf32>
      %210 = vector.extract_strided_slice %198 {offsets = [0, 64], sizes = [8, 64], strides = [1, 1]} : vector<8x192xf32> to vector<8x64xf32>
      %211 = vector.extract_strided_slice %201 {offsets = [0, 64], sizes = [8, 64], strides = [1, 1]} : vector<8x192xf32> to vector<8x64xf32>
      %212 = arith.addf %210, %211 : vector<8x64xf32>
      %213 = arith.negf %212 : vector<8x64xf32>
      %214 = math.exp %213 : vector<8x64xf32>
      %cst_76 = arith.constant 1.000000e+00 : f32
      %215 = vector.broadcast %cst_76 : f32 to vector<8x64xf32>
      %216 = arith.addf %215, %214 : vector<8x64xf32>
      %217 = arith.divf %215, %216 : vector<8x64xf32>
      %218 = vector.extract_strided_slice %198 {offsets = [0, 128], sizes = [8, 64], strides = [1, 1]} : vector<8x192xf32> to vector<8x64xf32>
      %219 = vector.extract_strided_slice %201 {offsets = [0, 128], sizes = [8, 64], strides = [1, 1]} : vector<8x192xf32> to vector<8x64xf32>
      %220 = arith.mulf %209, %219 : vector<8x64xf32>
      %221 = arith.addf %218, %220 : vector<8x64xf32>
      %222 = math.tanh %221 : vector<8x64xf32>
      %223 = arith.subf %196, %222 : vector<8x64xf32>
      %224 = arith.mulf %217, %223 : vector<8x64xf32>
      %225 = arith.addf %222, %224 : vector<8x64xf32>
      %226 = vector.broadcast %195 : i32 to vector<8x1xi32>
      %227 = arith.cmpi slt, %226, %3 : vector<8x1xi32>
      %228 = arith.extui %227 : vector<8x1xi1> to vector<8x1xi32>
      %229 = arith.sitofp %228 : vector<8x1xi32> to vector<8x1xf32>
      %230 = arith.subf %225, %196 : vector<8x64xf32>
      %231 = vector.broadcast %229 : vector<8x1xf32> to vector<8x64xf32>
      %232 = arith.mulf %231, %230 : vector<8x64xf32>
      %233 = arith.addf %196, %232 : vector<8x64xf32>
      %c0_77 = arith.constant 0 : index
      %c0_78 = arith.constant 0 : index
      %234 = vector.load %arg8[%c0_77, %c0_78] : memref<8x64xf32, #tpu.memory_space<vmem>>, vector<8x64xf32>
      tpu.vector_store %arg8[%c0_77, %c0_78], %233 {strides = array<i32>} : memref<8x64xf32, #tpu.memory_space<vmem>>, vector<8x64xf32>,
      %235 = vector.broadcast %229 : vector<8x1xf32> to vector<8x64xf32>
      %236 = arith.mulf %233, %235 : vector<8x64xf32>
      %c0_79 = arith.constant 0 : index
      %c4_80 = arith.constant 4 : index
      %c0_81 = arith.constant 0 : index
      %c0_82 = arith.constant 0 : index
      %237 = vector.load %arg7[%c0_79, %c4_80, %c0_81, %c0_82] : memref<1x8x8x64xf32, #tpu.memory_space<vmem>>, vector<1x1x8x64xf32>
      %238 = vector.shape_cast %237 : vector<1x1x8x64xf32> to vector<8x64xf32>
      %239 = vector.shape_cast %236 : vector<8x64xf32> to vector<1x1x8x64xf32>
      tpu.vector_store %arg7[%c0_79, %c4_80, %c0_81, %c0_82], %239 {strides = array<i32>} : memref<1x8x8x64xf32, #tpu.memory_space<vmem>>, vector<1x1x8x64xf32>,
      %c5_i32 = arith.constant 5 : i32
      %240 = arith.addi %14, %c5_i32 : i32
      %c0_83 = arith.constant 0 : index
      %c0_84 = arith.constant 0 : index
      %241 = vector.load %arg8[%c0_83, %c0_84] : memref<8x64xf32, #tpu.memory_space<vmem>>, vector<8x64xf32>
      %c0_85 = arith.constant 0 : index
      %c5 = arith.constant 5 : index
      %c0_86 = arith.constant 0 : index
      %c0_87 = arith.constant 0 : index
      %242 = vector.load %arg2[%c0_85, %c5, %c0_86, %c0_87] : memref<1x8x8x192xf32, #tpu.memory_space<vmem>>, vector<1x1x8x192xf32>
      %243 = vector.shape_cast %242 : vector<1x1x8x192xf32> to vector<8x192xf32>
      %cst_88 = arith.constant dense<0.000000e+00> : vector<8x192xf32>
      %244 = tpu.matmul %241, %5, %cst_88 {dimension_numbers = #tpu.dot_dimension_numbers<[1], [0], [0], [1], [0, 0, 1, 1], [], []>} : vector<8x64xf32>, vector<64x192xf32>, vector<8x192xf32> -> vector<8x192xf32>
      %245 = vector.broadcast %7 : vector<1x192xf32> to vector<8x192xf32>
      %246 = arith.addf %244, %245 : vector<8x192xf32>
      %247 = vector.extract_strided_slice %243 {offsets = [0, 0], sizes = [8, 64], strides = [1, 1]} : vector<8x192xf32> to vector<8x64xf32>
      %248 = vector.extract_strided_slice %246 {offsets = [0, 0], sizes = [8, 64], strides = [1, 1]} : vector<8x192xf32> to vector<8x64xf32>
      %249 = arith.addf %247, %248 : vector<8x64xf32>
      %250 = arith.negf %249 : vector<8x64xf32>
      %251 = math.exp %250 : vector<8x64xf32>
      %cst_89 = arith.constant 1.000000e+00 : f32
      %252 = vector.broadcast %cst_89 : f32 to vector<8x64xf32>
      %253 = arith.addf %252, %251 : vector<8x64xf32>
      %254 = arith.divf %252, %253 : vector<8x64xf32>
      %255 = vector.extract_strided_slice %243 {offsets = [0, 64], sizes = [8, 64], strides = [1, 1]} : vector<8x192xf32> to vector<8x64xf32>
      %256 = vector.extract_strided_slice %246 {offsets = [0, 64], sizes = [8, 64], strides = [1, 1]} : vector<8x192xf32> to vector<8x64xf32>
      %257 = arith.addf %255, %256 : vector<8x64xf32>
      %258 = arith.negf %257 : vector<8x64xf32>
      %259 = math.exp %258 : vector<8x64xf32>
      %cst_90 = arith.constant 1.000000e+00 : f32
      %260 = vector.broadcast %cst_90 : f32 to vector<8x64xf32>
      %261 = arith.addf %260, %259 : vector<8x64xf32>
      %262 = arith.divf %260, %261 : vector<8x64xf32>
      %263 = vector.extract_strided_slice %243 {offsets = [0, 128], sizes = [8, 64], strides = [1, 1]} : vector<8x192xf32> to vector<8x64xf32>
      %264 = vector.extract_strided_slice %246 {offsets = [0, 128], sizes = [8, 64], strides = [1, 1]} : vector<8x192xf32> to vector<8x64xf32>
      %265 = arith.mulf %254, %264 : vector<8x64xf32>
      %266 = arith.addf %263, %265 : vector<8x64xf32>
      %267 = math.tanh %266 : vector<8x64xf32>
      %268 = arith.subf %241, %267 : vector<8x64xf32>
      %269 = arith.mulf %262, %268 : vector<8x64xf32>
      %270 = arith.addf %267, %269 : vector<8x64xf32>
      %271 = vector.broadcast %240 : i32 to vector<8x1xi32>
      %272 = arith.cmpi slt, %271, %3 : vector<8x1xi32>
      %273 = arith.extui %272 : vector<8x1xi1> to vector<8x1xi32>
      %274 = arith.sitofp %273 : vector<8x1xi32> to vector<8x1xf32>
      %275 = arith.subf %270, %241 : vector<8x64xf32>
      %276 = vector.broadcast %274 : vector<8x1xf32> to vector<8x64xf32>
      %277 = arith.mulf %276, %275 : vector<8x64xf32>
      %278 = arith.addf %241, %277 : vector<8x64xf32>
      %c0_91 = arith.constant 0 : index
      %c0_92 = arith.constant 0 : index
      %279 = vector.load %arg8[%c0_91, %c0_92] : memref<8x64xf32, #tpu.memory_space<vmem>>, vector<8x64xf32>
      tpu.vector_store %arg8[%c0_91, %c0_92], %278 {strides = array<i32>} : memref<8x64xf32, #tpu.memory_space<vmem>>, vector<8x64xf32>,
      %280 = vector.broadcast %274 : vector<8x1xf32> to vector<8x64xf32>
      %281 = arith.mulf %278, %280 : vector<8x64xf32>
      %c0_93 = arith.constant 0 : index
      %c5_94 = arith.constant 5 : index
      %c0_95 = arith.constant 0 : index
      %c0_96 = arith.constant 0 : index
      %282 = vector.load %arg7[%c0_93, %c5_94, %c0_95, %c0_96] : memref<1x8x8x64xf32, #tpu.memory_space<vmem>>, vector<1x1x8x64xf32>
      %283 = vector.shape_cast %282 : vector<1x1x8x64xf32> to vector<8x64xf32>
      %284 = vector.shape_cast %281 : vector<8x64xf32> to vector<1x1x8x64xf32>
      tpu.vector_store %arg7[%c0_93, %c5_94, %c0_95, %c0_96], %284 {strides = array<i32>} : memref<1x8x8x64xf32, #tpu.memory_space<vmem>>, vector<1x1x8x64xf32>,
      %c6_i32 = arith.constant 6 : i32
      %285 = arith.addi %14, %c6_i32 : i32
      %c0_97 = arith.constant 0 : index
      %c0_98 = arith.constant 0 : index
      %286 = vector.load %arg8[%c0_97, %c0_98] : memref<8x64xf32, #tpu.memory_space<vmem>>, vector<8x64xf32>
      %c0_99 = arith.constant 0 : index
      %c6 = arith.constant 6 : index
      %c0_100 = arith.constant 0 : index
      %c0_101 = arith.constant 0 : index
      %287 = vector.load %arg2[%c0_99, %c6, %c0_100, %c0_101] : memref<1x8x8x192xf32, #tpu.memory_space<vmem>>, vector<1x1x8x192xf32>
      %288 = vector.shape_cast %287 : vector<1x1x8x192xf32> to vector<8x192xf32>
      %cst_102 = arith.constant dense<0.000000e+00> : vector<8x192xf32>
      %289 = tpu.matmul %286, %5, %cst_102 {dimension_numbers = #tpu.dot_dimension_numbers<[1], [0], [0], [1], [0, 0, 1, 1], [], []>} : vector<8x64xf32>, vector<64x192xf32>, vector<8x192xf32> -> vector<8x192xf32>
      %290 = vector.broadcast %7 : vector<1x192xf32> to vector<8x192xf32>
      %291 = arith.addf %289, %290 : vector<8x192xf32>
      %292 = vector.extract_strided_slice %288 {offsets = [0, 0], sizes = [8, 64], strides = [1, 1]} : vector<8x192xf32> to vector<8x64xf32>
      %293 = vector.extract_strided_slice %291 {offsets = [0, 0], sizes = [8, 64], strides = [1, 1]} : vector<8x192xf32> to vector<8x64xf32>
      %294 = arith.addf %292, %293 : vector<8x64xf32>
      %295 = arith.negf %294 : vector<8x64xf32>
      %296 = math.exp %295 : vector<8x64xf32>
      %cst_103 = arith.constant 1.000000e+00 : f32
      %297 = vector.broadcast %cst_103 : f32 to vector<8x64xf32>
      %298 = arith.addf %297, %296 : vector<8x64xf32>
      %299 = arith.divf %297, %298 : vector<8x64xf32>
      %300 = vector.extract_strided_slice %288 {offsets = [0, 64], sizes = [8, 64], strides = [1, 1]} : vector<8x192xf32> to vector<8x64xf32>
      %301 = vector.extract_strided_slice %291 {offsets = [0, 64], sizes = [8, 64], strides = [1, 1]} : vector<8x192xf32> to vector<8x64xf32>
      %302 = arith.addf %300, %301 : vector<8x64xf32>
      %303 = arith.negf %302 : vector<8x64xf32>
      %304 = math.exp %303 : vector<8x64xf32>
      %cst_104 = arith.constant 1.000000e+00 : f32
      %305 = vector.broadcast %cst_104 : f32 to vector<8x64xf32>
      %306 = arith.addf %305, %304 : vector<8x64xf32>
      %307 = arith.divf %305, %306 : vector<8x64xf32>
      %308 = vector.extract_strided_slice %288 {offsets = [0, 128], sizes = [8, 64], strides = [1, 1]} : vector<8x192xf32> to vector<8x64xf32>
      %309 = vector.extract_strided_slice %291 {offsets = [0, 128], sizes = [8, 64], strides = [1, 1]} : vector<8x192xf32> to vector<8x64xf32>
      %310 = arith.mulf %299, %309 : vector<8x64xf32>
      %311 = arith.addf %308, %310 : vector<8x64xf32>
      %312 = math.tanh %311 : vector<8x64xf32>
      %313 = arith.subf %286, %312 : vector<8x64xf32>
      %314 = arith.mulf %307, %313 : vector<8x64xf32>
      %315 = arith.addf %312, %314 : vector<8x64xf32>
      %316 = vector.broadcast %285 : i32 to vector<8x1xi32>
      %317 = arith.cmpi slt, %316, %3 : vector<8x1xi32>
      %318 = arith.extui %317 : vector<8x1xi1> to vector<8x1xi32>
      %319 = arith.sitofp %318 : vector<8x1xi32> to vector<8x1xf32>
      %320 = arith.subf %315, %286 : vector<8x64xf32>
      %321 = vector.broadcast %319 : vector<8x1xf32> to vector<8x64xf32>
      %322 = arith.mulf %321, %320 : vector<8x64xf32>
      %323 = arith.addf %286, %322 : vector<8x64xf32>
      %c0_105 = arith.constant 0 : index
      %c0_106 = arith.constant 0 : index
      %324 = vector.load %arg8[%c0_105, %c0_106] : memref<8x64xf32, #tpu.memory_space<vmem>>, vector<8x64xf32>
      tpu.vector_store %arg8[%c0_105, %c0_106], %323 {strides = array<i32>} : memref<8x64xf32, #tpu.memory_space<vmem>>, vector<8x64xf32>,
      %325 = vector.broadcast %319 : vector<8x1xf32> to vector<8x64xf32>
      %326 = arith.mulf %323, %325 : vector<8x64xf32>
      %c0_107 = arith.constant 0 : index
      %c6_108 = arith.constant 6 : index
      %c0_109 = arith.constant 0 : index
      %c0_110 = arith.constant 0 : index
      %327 = vector.load %arg7[%c0_107, %c6_108, %c0_109, %c0_110] : memref<1x8x8x64xf32, #tpu.memory_space<vmem>>, vector<1x1x8x64xf32>
      %328 = vector.shape_cast %327 : vector<1x1x8x64xf32> to vector<8x64xf32>
      %329 = vector.shape_cast %326 : vector<8x64xf32> to vector<1x1x8x64xf32>
      tpu.vector_store %arg7[%c0_107, %c6_108, %c0_109, %c0_110], %329 {strides = array<i32>} : memref<1x8x8x64xf32, #tpu.memory_space<vmem>>, vector<1x1x8x64xf32>,
      %c7_i32 = arith.constant 7 : i32
      %330 = arith.addi %14, %c7_i32 : i32
      %c0_111 = arith.constant 0 : index
      %c0_112 = arith.constant 0 : index
      %331 = vector.load %arg8[%c0_111, %c0_112] : memref<8x64xf32, #tpu.memory_space<vmem>>, vector<8x64xf32>
      %c0_113 = arith.constant 0 : index
      %c7 = arith.constant 7 : index
      %c0_114 = arith.constant 0 : index
      %c0_115 = arith.constant 0 : index
      %332 = vector.load %arg2[%c0_113, %c7, %c0_114, %c0_115] : memref<1x8x8x192xf32, #tpu.memory_space<vmem>>, vector<1x1x8x192xf32>
      %333 = vector.shape_cast %332 : vector<1x1x8x192xf32> to vector<8x192xf32>
      %cst_116 = arith.constant dense<0.000000e+00> : vector<8x192xf32>
      %334 = tpu.matmul %331, %5, %cst_116 {dimension_numbers = #tpu.dot_dimension_numbers<[1], [0], [0], [1], [0, 0, 1, 1], [], []>} : vector<8x64xf32>, vector<64x192xf32>, vector<8x192xf32> -> vector<8x192xf32>
      %335 = vector.broadcast %7 : vector<1x192xf32> to vector<8x192xf32>
      %336 = arith.addf %334, %335 : vector<8x192xf32>
      %337 = vector.extract_strided_slice %333 {offsets = [0, 0], sizes = [8, 64], strides = [1, 1]} : vector<8x192xf32> to vector<8x64xf32>
      %338 = vector.extract_strided_slice %336 {offsets = [0, 0], sizes = [8, 64], strides = [1, 1]} : vector<8x192xf32> to vector<8x64xf32>
      %339 = arith.addf %337, %338 : vector<8x64xf32>
      %340 = arith.negf %339 : vector<8x64xf32>
      %341 = math.exp %340 : vector<8x64xf32>
      %cst_117 = arith.constant 1.000000e+00 : f32
      %342 = vector.broadcast %cst_117 : f32 to vector<8x64xf32>
      %343 = arith.addf %342, %341 : vector<8x64xf32>
      %344 = arith.divf %342, %343 : vector<8x64xf32>
      %345 = vector.extract_strided_slice %333 {offsets = [0, 64], sizes = [8, 64], strides = [1, 1]} : vector<8x192xf32> to vector<8x64xf32>
      %346 = vector.extract_strided_slice %336 {offsets = [0, 64], sizes = [8, 64], strides = [1, 1]} : vector<8x192xf32> to vector<8x64xf32>
      %347 = arith.addf %345, %346 : vector<8x64xf32>
      %348 = arith.negf %347 : vector<8x64xf32>
      %349 = math.exp %348 : vector<8x64xf32>
      %cst_118 = arith.constant 1.000000e+00 : f32
      %350 = vector.broadcast %cst_118 : f32 to vector<8x64xf32>
      %351 = arith.addf %350, %349 : vector<8x64xf32>
      %352 = arith.divf %350, %351 : vector<8x64xf32>
      %353 = vector.extract_strided_slice %333 {offsets = [0, 128], sizes = [8, 64], strides = [1, 1]} : vector<8x192xf32> to vector<8x64xf32>
      %354 = vector.extract_strided_slice %336 {offsets = [0, 128], sizes = [8, 64], strides = [1, 1]} : vector<8x192xf32> to vector<8x64xf32>
      %355 = arith.mulf %344, %354 : vector<8x64xf32>
      %356 = arith.addf %353, %355 : vector<8x64xf32>
      %357 = math.tanh %356 : vector<8x64xf32>
      %358 = arith.subf %331, %357 : vector<8x64xf32>
      %359 = arith.mulf %352, %358 : vector<8x64xf32>
      %360 = arith.addf %357, %359 : vector<8x64xf32>
      %361 = vector.broadcast %330 : i32 to vector<8x1xi32>
      %362 = arith.cmpi slt, %361, %3 : vector<8x1xi32>
      %363 = arith.extui %362 : vector<8x1xi1> to vector<8x1xi32>
      %364 = arith.sitofp %363 : vector<8x1xi32> to vector<8x1xf32>
      %365 = arith.subf %360, %331 : vector<8x64xf32>
      %366 = vector.broadcast %364 : vector<8x1xf32> to vector<8x64xf32>
      %367 = arith.mulf %366, %365 : vector<8x64xf32>
      %368 = arith.addf %331, %367 : vector<8x64xf32>
      %c0_119 = arith.constant 0 : index
      %c0_120 = arith.constant 0 : index
      %369 = vector.load %arg8[%c0_119, %c0_120] : memref<8x64xf32, #tpu.memory_space<vmem>>, vector<8x64xf32>
      tpu.vector_store %arg8[%c0_119, %c0_120], %368 {strides = array<i32>} : memref<8x64xf32, #tpu.memory_space<vmem>>, vector<8x64xf32>,
      %370 = vector.broadcast %364 : vector<8x1xf32> to vector<8x64xf32>
      %371 = arith.mulf %368, %370 : vector<8x64xf32>
      %c0_121 = arith.constant 0 : index
      %c7_122 = arith.constant 7 : index
      %c0_123 = arith.constant 0 : index
      %c0_124 = arith.constant 0 : index
      %372 = vector.load %arg7[%c0_121, %c7_122, %c0_123, %c0_124] : memref<1x8x8x64xf32, #tpu.memory_space<vmem>>, vector<1x1x8x64xf32>
      %373 = vector.shape_cast %372 : vector<1x1x8x64xf32> to vector<8x64xf32>
      %374 = vector.shape_cast %371 : vector<8x64xf32> to vector<1x1x8x64xf32>
      tpu.vector_store %arg7[%c0_121, %c7_122, %c0_123, %c0_124], %374 {strides = array<i32>} : memref<1x8x8x64xf32, #tpu.memory_space<vmem>>, vector<1x1x8x64xf32>,
    } else {
    }
    %c1_i32 = arith.constant 1 : i32
    %11 = arith.cmpi eq, %arg0, %c1_i32 : i32
    %12 = arith.extui %11 : i1 to i32
    %c0_i32_10 = arith.constant 0 : i32
    %13 = arith.cmpi ne, %12, %c0_i32_10 : i32
    scf.if %13 {
      %c1_i32_11 = arith.constant 1 : i32
      %14 = arith.subi %c1_i32_11, %arg1 : i32
      %c8_i32 = arith.constant 8 : i32
      %15 = arith.muli %14, %c8_i32 : i32
      %c7_i32 = arith.constant 7 : i32
      %16 = arith.addi %15, %c7_i32 : i32
      %c0_12 = arith.constant 0 : index
      %c0_13 = arith.constant 0 : index
      %17 = vector.load %arg8[%c0_12, %c0_13] : memref<8x64xf32, #tpu.memory_space<vmem>>, vector<8x64xf32>
      %c0_14 = arith.constant 0 : index
      %c7 = arith.constant 7 : index
      %c0_15 = arith.constant 0 : index
      %c0_16 = arith.constant 0 : index
      %18 = vector.load %arg2[%c0_14, %c7, %c0_15, %c0_16] : memref<1x8x8x192xf32, #tpu.memory_space<vmem>>, vector<1x1x8x192xf32>
      %19 = vector.shape_cast %18 : vector<1x1x8x192xf32> to vector<8x192xf32>
      %cst = arith.constant dense<0.000000e+00> : vector<8x192xf32>
      %20 = tpu.matmul %17, %5, %cst {dimension_numbers = #tpu.dot_dimension_numbers<[1], [0], [0], [1], [0, 0, 1, 1], [], []>} : vector<8x64xf32>, vector<64x192xf32>, vector<8x192xf32> -> vector<8x192xf32>
      %21 = vector.broadcast %7 : vector<1x192xf32> to vector<8x192xf32>
      %22 = arith.addf %20, %21 : vector<8x192xf32>
      %23 = vector.extract_strided_slice %19 {offsets = [0, 0], sizes = [8, 64], strides = [1, 1]} : vector<8x192xf32> to vector<8x64xf32>
      %24 = vector.extract_strided_slice %22 {offsets = [0, 0], sizes = [8, 64], strides = [1, 1]} : vector<8x192xf32> to vector<8x64xf32>
      %25 = arith.addf %23, %24 : vector<8x64xf32>
      %26 = arith.negf %25 : vector<8x64xf32>
      %27 = math.exp %26 : vector<8x64xf32>
      %cst_17 = arith.constant 1.000000e+00 : f32
      %28 = vector.broadcast %cst_17 : f32 to vector<8x64xf32>
      %29 = arith.addf %28, %27 : vector<8x64xf32>
      %30 = arith.divf %28, %29 : vector<8x64xf32>
      %31 = vector.extract_strided_slice %19 {offsets = [0, 64], sizes = [8, 64], strides = [1, 1]} : vector<8x192xf32> to vector<8x64xf32>
      %32 = vector.extract_strided_slice %22 {offsets = [0, 64], sizes = [8, 64], strides = [1, 1]} : vector<8x192xf32> to vector<8x64xf32>
      %33 = arith.addf %31, %32 : vector<8x64xf32>
      %34 = arith.negf %33 : vector<8x64xf32>
      %35 = math.exp %34 : vector<8x64xf32>
      %cst_18 = arith.constant 1.000000e+00 : f32
      %36 = vector.broadcast %cst_18 : f32 to vector<8x64xf32>
      %37 = arith.addf %36, %35 : vector<8x64xf32>
      %38 = arith.divf %36, %37 : vector<8x64xf32>
      %39 = vector.extract_strided_slice %19 {offsets = [0, 128], sizes = [8, 64], strides = [1, 1]} : vector<8x192xf32> to vector<8x64xf32>
      %40 = vector.extract_strided_slice %22 {offsets = [0, 128], sizes = [8, 64], strides = [1, 1]} : vector<8x192xf32> to vector<8x64xf32>
      %41 = arith.mulf %30, %40 : vector<8x64xf32>
      %42 = arith.addf %39, %41 : vector<8x64xf32>
      %43 = math.tanh %42 : vector<8x64xf32>
      %44 = arith.subf %17, %43 : vector<8x64xf32>
      %45 = arith.mulf %38, %44 : vector<8x64xf32>
      %46 = arith.addf %43, %45 : vector<8x64xf32>
      %47 = vector.broadcast %16 : i32 to vector<8x1xi32>
      %48 = arith.cmpi slt, %47, %3 : vector<8x1xi32>
      %49 = arith.extui %48 : vector<8x1xi1> to vector<8x1xi32>
      %50 = arith.sitofp %49 : vector<8x1xi32> to vector<8x1xf32>
      %51 = arith.subf %46, %17 : vector<8x64xf32>
      %52 = vector.broadcast %50 : vector<8x1xf32> to vector<8x64xf32>
      %53 = arith.mulf %52, %51 : vector<8x64xf32>
      %54 = arith.addf %17, %53 : vector<8x64xf32>
      %c0_19 = arith.constant 0 : index
      %c0_20 = arith.constant 0 : index
      %55 = vector.load %arg8[%c0_19, %c0_20] : memref<8x64xf32, #tpu.memory_space<vmem>>, vector<8x64xf32>
      tpu.vector_store %arg8[%c0_19, %c0_20], %54 {strides = array<i32>} : memref<8x64xf32, #tpu.memory_space<vmem>>, vector<8x64xf32>,
      %56 = vector.broadcast %50 : vector<8x1xf32> to vector<8x64xf32>
      %57 = arith.mulf %54, %56 : vector<8x64xf32>
      %c0_21 = arith.constant 0 : index
      %c7_22 = arith.constant 7 : index
      %c0_23 = arith.constant 0 : index
      %c0_24 = arith.constant 0 : index
      %58 = vector.load %arg7[%c0_21, %c7_22, %c0_23, %c0_24] : memref<1x8x8x64xf32, #tpu.memory_space<vmem>>, vector<1x1x8x64xf32>
      %59 = vector.shape_cast %58 : vector<1x1x8x64xf32> to vector<8x64xf32>
      %60 = vector.shape_cast %57 : vector<8x64xf32> to vector<1x1x8x64xf32>
      tpu.vector_store %arg7[%c0_21, %c7_22, %c0_23, %c0_24], %60 {strides = array<i32>} : memref<1x8x8x64xf32, #tpu.memory_space<vmem>>, vector<1x1x8x64xf32>,
      %c6_i32 = arith.constant 6 : i32
      %61 = arith.addi %15, %c6_i32 : i32
      %c0_25 = arith.constant 0 : index
      %c0_26 = arith.constant 0 : index
      %62 = vector.load %arg8[%c0_25, %c0_26] : memref<8x64xf32, #tpu.memory_space<vmem>>, vector<8x64xf32>
      %c0_27 = arith.constant 0 : index
      %c6 = arith.constant 6 : index
      %c0_28 = arith.constant 0 : index
      %c0_29 = arith.constant 0 : index
      %63 = vector.load %arg2[%c0_27, %c6, %c0_28, %c0_29] : memref<1x8x8x192xf32, #tpu.memory_space<vmem>>, vector<1x1x8x192xf32>
      %64 = vector.shape_cast %63 : vector<1x1x8x192xf32> to vector<8x192xf32>
      %cst_30 = arith.constant dense<0.000000e+00> : vector<8x192xf32>
      %65 = tpu.matmul %62, %5, %cst_30 {dimension_numbers = #tpu.dot_dimension_numbers<[1], [0], [0], [1], [0, 0, 1, 1], [], []>} : vector<8x64xf32>, vector<64x192xf32>, vector<8x192xf32> -> vector<8x192xf32>
      %66 = vector.broadcast %7 : vector<1x192xf32> to vector<8x192xf32>
      %67 = arith.addf %65, %66 : vector<8x192xf32>
      %68 = vector.extract_strided_slice %64 {offsets = [0, 0], sizes = [8, 64], strides = [1, 1]} : vector<8x192xf32> to vector<8x64xf32>
      %69 = vector.extract_strided_slice %67 {offsets = [0, 0], sizes = [8, 64], strides = [1, 1]} : vector<8x192xf32> to vector<8x64xf32>
      %70 = arith.addf %68, %69 : vector<8x64xf32>
      %71 = arith.negf %70 : vector<8x64xf32>
      %72 = math.exp %71 : vector<8x64xf32>
      %cst_31 = arith.constant 1.000000e+00 : f32
      %73 = vector.broadcast %cst_31 : f32 to vector<8x64xf32>
      %74 = arith.addf %73, %72 : vector<8x64xf32>
      %75 = arith.divf %73, %74 : vector<8x64xf32>
      %76 = vector.extract_strided_slice %64 {offsets = [0, 64], sizes = [8, 64], strides = [1, 1]} : vector<8x192xf32> to vector<8x64xf32>
      %77 = vector.extract_strided_slice %67 {offsets = [0, 64], sizes = [8, 64], strides = [1, 1]} : vector<8x192xf32> to vector<8x64xf32>
      %78 = arith.addf %76, %77 : vector<8x64xf32>
      %79 = arith.negf %78 : vector<8x64xf32>
      %80 = math.exp %79 : vector<8x64xf32>
      %cst_32 = arith.constant 1.000000e+00 : f32
      %81 = vector.broadcast %cst_32 : f32 to vector<8x64xf32>
      %82 = arith.addf %81, %80 : vector<8x64xf32>
      %83 = arith.divf %81, %82 : vector<8x64xf32>
      %84 = vector.extract_strided_slice %64 {offsets = [0, 128], sizes = [8, 64], strides = [1, 1]} : vector<8x192xf32> to vector<8x64xf32>
      %85 = vector.extract_strided_slice %67 {offsets = [0, 128], sizes = [8, 64], strides = [1, 1]} : vector<8x192xf32> to vector<8x64xf32>
      %86 = arith.mulf %75, %85 : vector<8x64xf32>
      %87 = arith.addf %84, %86 : vector<8x64xf32>
      %88 = math.tanh %87 : vector<8x64xf32>
      %89 = arith.subf %62, %88 : vector<8x64xf32>
      %90 = arith.mulf %83, %89 : vector<8x64xf32>
      %91 = arith.addf %88, %90 : vector<8x64xf32>
      %92 = vector.broadcast %61 : i32 to vector<8x1xi32>
      %93 = arith.cmpi slt, %92, %3 : vector<8x1xi32>
      %94 = arith.extui %93 : vector<8x1xi1> to vector<8x1xi32>
      %95 = arith.sitofp %94 : vector<8x1xi32> to vector<8x1xf32>
      %96 = arith.subf %91, %62 : vector<8x64xf32>
      %97 = vector.broadcast %95 : vector<8x1xf32> to vector<8x64xf32>
      %98 = arith.mulf %97, %96 : vector<8x64xf32>
      %99 = arith.addf %62, %98 : vector<8x64xf32>
      %c0_33 = arith.constant 0 : index
      %c0_34 = arith.constant 0 : index
      %100 = vector.load %arg8[%c0_33, %c0_34] : memref<8x64xf32, #tpu.memory_space<vmem>>, vector<8x64xf32>
      tpu.vector_store %arg8[%c0_33, %c0_34], %99 {strides = array<i32>} : memref<8x64xf32, #tpu.memory_space<vmem>>, vector<8x64xf32>,
      %101 = vector.broadcast %95 : vector<8x1xf32> to vector<8x64xf32>
      %102 = arith.mulf %99, %101 : vector<8x64xf32>
      %c0_35 = arith.constant 0 : index
      %c6_36 = arith.constant 6 : index
      %c0_37 = arith.constant 0 : index
      %c0_38 = arith.constant 0 : index
      %103 = vector.load %arg7[%c0_35, %c6_36, %c0_37, %c0_38] : memref<1x8x8x64xf32, #tpu.memory_space<vmem>>, vector<1x1x8x64xf32>
      %104 = vector.shape_cast %103 : vector<1x1x8x64xf32> to vector<8x64xf32>
      %105 = vector.shape_cast %102 : vector<8x64xf32> to vector<1x1x8x64xf32>
      tpu.vector_store %arg7[%c0_35, %c6_36, %c0_37, %c0_38], %105 {strides = array<i32>} : memref<1x8x8x64xf32, #tpu.memory_space<vmem>>, vector<1x1x8x64xf32>,
      %c5_i32 = arith.constant 5 : i32
      %106 = arith.addi %15, %c5_i32 : i32
      %c0_39 = arith.constant 0 : index
      %c0_40 = arith.constant 0 : index
      %107 = vector.load %arg8[%c0_39, %c0_40] : memref<8x64xf32, #tpu.memory_space<vmem>>, vector<8x64xf32>
      %c0_41 = arith.constant 0 : index
      %c5 = arith.constant 5 : index
      %c0_42 = arith.constant 0 : index
      %c0_43 = arith.constant 0 : index
      %108 = vector.load %arg2[%c0_41, %c5, %c0_42, %c0_43] : memref<1x8x8x192xf32, #tpu.memory_space<vmem>>, vector<1x1x8x192xf32>
      %109 = vector.shape_cast %108 : vector<1x1x8x192xf32> to vector<8x192xf32>
      %cst_44 = arith.constant dense<0.000000e+00> : vector<8x192xf32>
      %110 = tpu.matmul %107, %5, %cst_44 {dimension_numbers = #tpu.dot_dimension_numbers<[1], [0], [0], [1], [0, 0, 1, 1], [], []>} : vector<8x64xf32>, vector<64x192xf32>, vector<8x192xf32> -> vector<8x192xf32>
      %111 = vector.broadcast %7 : vector<1x192xf32> to vector<8x192xf32>
      %112 = arith.addf %110, %111 : vector<8x192xf32>
      %113 = vector.extract_strided_slice %109 {offsets = [0, 0], sizes = [8, 64], strides = [1, 1]} : vector<8x192xf32> to vector<8x64xf32>
      %114 = vector.extract_strided_slice %112 {offsets = [0, 0], sizes = [8, 64], strides = [1, 1]} : vector<8x192xf32> to vector<8x64xf32>
      %115 = arith.addf %113, %114 : vector<8x64xf32>
      %116 = arith.negf %115 : vector<8x64xf32>
      %117 = math.exp %116 : vector<8x64xf32>
      %cst_45 = arith.constant 1.000000e+00 : f32
      %118 = vector.broadcast %cst_45 : f32 to vector<8x64xf32>
      %119 = arith.addf %118, %117 : vector<8x64xf32>
      %120 = arith.divf %118, %119 : vector<8x64xf32>
      %121 = vector.extract_strided_slice %109 {offsets = [0, 64], sizes = [8, 64], strides = [1, 1]} : vector<8x192xf32> to vector<8x64xf32>
      %122 = vector.extract_strided_slice %112 {offsets = [0, 64], sizes = [8, 64], strides = [1, 1]} : vector<8x192xf32> to vector<8x64xf32>
      %123 = arith.addf %121, %122 : vector<8x64xf32>
      %124 = arith.negf %123 : vector<8x64xf32>
      %125 = math.exp %124 : vector<8x64xf32>
      %cst_46 = arith.constant 1.000000e+00 : f32
      %126 = vector.broadcast %cst_46 : f32 to vector<8x64xf32>
      %127 = arith.addf %126, %125 : vector<8x64xf32>
      %128 = arith.divf %126, %127 : vector<8x64xf32>
      %129 = vector.extract_strided_slice %109 {offsets = [0, 128], sizes = [8, 64], strides = [1, 1]} : vector<8x192xf32> to vector<8x64xf32>
      %130 = vector.extract_strided_slice %112 {offsets = [0, 128], sizes = [8, 64], strides = [1, 1]} : vector<8x192xf32> to vector<8x64xf32>
      %131 = arith.mulf %120, %130 : vector<8x64xf32>
      %132 = arith.addf %129, %131 : vector<8x64xf32>
      %133 = math.tanh %132 : vector<8x64xf32>
      %134 = arith.subf %107, %133 : vector<8x64xf32>
      %135 = arith.mulf %128, %134 : vector<8x64xf32>
      %136 = arith.addf %133, %135 : vector<8x64xf32>
      %137 = vector.broadcast %106 : i32 to vector<8x1xi32>
      %138 = arith.cmpi slt, %137, %3 : vector<8x1xi32>
      %139 = arith.extui %138 : vector<8x1xi1> to vector<8x1xi32>
      %140 = arith.sitofp %139 : vector<8x1xi32> to vector<8x1xf32>
      %141 = arith.subf %136, %107 : vector<8x64xf32>
      %142 = vector.broadcast %140 : vector<8x1xf32> to vector<8x64xf32>
      %143 = arith.mulf %142, %141 : vector<8x64xf32>
      %144 = arith.addf %107, %143 : vector<8x64xf32>
      %c0_47 = arith.constant 0 : index
      %c0_48 = arith.constant 0 : index
      %145 = vector.load %arg8[%c0_47, %c0_48] : memref<8x64xf32, #tpu.memory_space<vmem>>, vector<8x64xf32>
      tpu.vector_store %arg8[%c0_47, %c0_48], %144 {strides = array<i32>} : memref<8x64xf32, #tpu.memory_space<vmem>>, vector<8x64xf32>,
      %146 = vector.broadcast %140 : vector<8x1xf32> to vector<8x64xf32>
      %147 = arith.mulf %144, %146 : vector<8x64xf32>
      %c0_49 = arith.constant 0 : index
      %c5_50 = arith.constant 5 : index
      %c0_51 = arith.constant 0 : index
      %c0_52 = arith.constant 0 : index
      %148 = vector.load %arg7[%c0_49, %c5_50, %c0_51, %c0_52] : memref<1x8x8x64xf32, #tpu.memory_space<vmem>>, vector<1x1x8x64xf32>
      %149 = vector.shape_cast %148 : vector<1x1x8x64xf32> to vector<8x64xf32>
      %150 = vector.shape_cast %147 : vector<8x64xf32> to vector<1x1x8x64xf32>
      tpu.vector_store %arg7[%c0_49, %c5_50, %c0_51, %c0_52], %150 {strides = array<i32>} : memref<1x8x8x64xf32, #tpu.memory_space<vmem>>, vector<1x1x8x64xf32>,
      %c4_i32 = arith.constant 4 : i32
      %151 = arith.addi %15, %c4_i32 : i32
      %c0_53 = arith.constant 0 : index
      %c0_54 = arith.constant 0 : index
      %152 = vector.load %arg8[%c0_53, %c0_54] : memref<8x64xf32, #tpu.memory_space<vmem>>, vector<8x64xf32>
      %c0_55 = arith.constant 0 : index
      %c4 = arith.constant 4 : index
      %c0_56 = arith.constant 0 : index
      %c0_57 = arith.constant 0 : index
      %153 = vector.load %arg2[%c0_55, %c4, %c0_56, %c0_57] : memref<1x8x8x192xf32, #tpu.memory_space<vmem>>, vector<1x1x8x192xf32>
      %154 = vector.shape_cast %153 : vector<1x1x8x192xf32> to vector<8x192xf32>
      %cst_58 = arith.constant dense<0.000000e+00> : vector<8x192xf32>
      %155 = tpu.matmul %152, %5, %cst_58 {dimension_numbers = #tpu.dot_dimension_numbers<[1], [0], [0], [1], [0, 0, 1, 1], [], []>} : vector<8x64xf32>, vector<64x192xf32>, vector<8x192xf32> -> vector<8x192xf32>
      %156 = vector.broadcast %7 : vector<1x192xf32> to vector<8x192xf32>
      %157 = arith.addf %155, %156 : vector<8x192xf32>
      %158 = vector.extract_strided_slice %154 {offsets = [0, 0], sizes = [8, 64], strides = [1, 1]} : vector<8x192xf32> to vector<8x64xf32>
      %159 = vector.extract_strided_slice %157 {offsets = [0, 0], sizes = [8, 64], strides = [1, 1]} : vector<8x192xf32> to vector<8x64xf32>
      %160 = arith.addf %158, %159 : vector<8x64xf32>
      %161 = arith.negf %160 : vector<8x64xf32>
      %162 = math.exp %161 : vector<8x64xf32>
      %cst_59 = arith.constant 1.000000e+00 : f32
      %163 = vector.broadcast %cst_59 : f32 to vector<8x64xf32>
      %164 = arith.addf %163, %162 : vector<8x64xf32>
      %165 = arith.divf %163, %164 : vector<8x64xf32>
      %166 = vector.extract_strided_slice %154 {offsets = [0, 64], sizes = [8, 64], strides = [1, 1]} : vector<8x192xf32> to vector<8x64xf32>
      %167 = vector.extract_strided_slice %157 {offsets = [0, 64], sizes = [8, 64], strides = [1, 1]} : vector<8x192xf32> to vector<8x64xf32>
      %168 = arith.addf %166, %167 : vector<8x64xf32>
      %169 = arith.negf %168 : vector<8x64xf32>
      %170 = math.exp %169 : vector<8x64xf32>
      %cst_60 = arith.constant 1.000000e+00 : f32
      %171 = vector.broadcast %cst_60 : f32 to vector<8x64xf32>
      %172 = arith.addf %171, %170 : vector<8x64xf32>
      %173 = arith.divf %171, %172 : vector<8x64xf32>
      %174 = vector.extract_strided_slice %154 {offsets = [0, 128], sizes = [8, 64], strides = [1, 1]} : vector<8x192xf32> to vector<8x64xf32>
      %175 = vector.extract_strided_slice %157 {offsets = [0, 128], sizes = [8, 64], strides = [1, 1]} : vector<8x192xf32> to vector<8x64xf32>
      %176 = arith.mulf %165, %175 : vector<8x64xf32>
      %177 = arith.addf %174, %176 : vector<8x64xf32>
      %178 = math.tanh %177 : vector<8x64xf32>
      %179 = arith.subf %152, %178 : vector<8x64xf32>
      %180 = arith.mulf %173, %179 : vector<8x64xf32>
      %181 = arith.addf %178, %180 : vector<8x64xf32>
      %182 = vector.broadcast %151 : i32 to vector<8x1xi32>
      %183 = arith.cmpi slt, %182, %3 : vector<8x1xi32>
      %184 = arith.extui %183 : vector<8x1xi1> to vector<8x1xi32>
      %185 = arith.sitofp %184 : vector<8x1xi32> to vector<8x1xf32>
      %186 = arith.subf %181, %152 : vector<8x64xf32>
      %187 = vector.broadcast %185 : vector<8x1xf32> to vector<8x64xf32>
      %188 = arith.mulf %187, %186 : vector<8x64xf32>
      %189 = arith.addf %152, %188 : vector<8x64xf32>
      %c0_61 = arith.constant 0 : index
      %c0_62 = arith.constant 0 : index
      %190 = vector.load %arg8[%c0_61, %c0_62] : memref<8x64xf32, #tpu.memory_space<vmem>>, vector<8x64xf32>
      tpu.vector_store %arg8[%c0_61, %c0_62], %189 {strides = array<i32>} : memref<8x64xf32, #tpu.memory_space<vmem>>, vector<8x64xf32>,
      %191 = vector.broadcast %185 : vector<8x1xf32> to vector<8x64xf32>
      %192 = arith.mulf %189, %191 : vector<8x64xf32>
      %c0_63 = arith.constant 0 : index
      %c4_64 = arith.constant 4 : index
      %c0_65 = arith.constant 0 : index
      %c0_66 = arith.constant 0 : index
      %193 = vector.load %arg7[%c0_63, %c4_64, %c0_65, %c0_66] : memref<1x8x8x64xf32, #tpu.memory_space<vmem>>, vector<1x1x8x64xf32>
      %194 = vector.shape_cast %193 : vector<1x1x8x64xf32> to vector<8x64xf32>
      %195 = vector.shape_cast %192 : vector<8x64xf32> to vector<1x1x8x64xf32>
      tpu.vector_store %arg7[%c0_63, %c4_64, %c0_65, %c0_66], %195 {strides = array<i32>} : memref<1x8x8x64xf32, #tpu.memory_space<vmem>>, vector<1x1x8x64xf32>,
      %c3_i32 = arith.constant 3 : i32
      %196 = arith.addi %15, %c3_i32 : i32
      %c0_67 = arith.constant 0 : index
      %c0_68 = arith.constant 0 : index
      %197 = vector.load %arg8[%c0_67, %c0_68] : memref<8x64xf32, #tpu.memory_space<vmem>>, vector<8x64xf32>
      %c0_69 = arith.constant 0 : index
      %c3 = arith.constant 3 : index
      %c0_70 = arith.constant 0 : index
      %c0_71 = arith.constant 0 : index
      %198 = vector.load %arg2[%c0_69, %c3, %c0_70, %c0_71] : memref<1x8x8x192xf32, #tpu.memory_space<vmem>>, vector<1x1x8x192xf32>
      %199 = vector.shape_cast %198 : vector<1x1x8x192xf32> to vector<8x192xf32>
      %cst_72 = arith.constant dense<0.000000e+00> : vector<8x192xf32>
      %200 = tpu.matmul %197, %5, %cst_72 {dimension_numbers = #tpu.dot_dimension_numbers<[1], [0], [0], [1], [0, 0, 1, 1], [], []>} : vector<8x64xf32>, vector<64x192xf32>, vector<8x192xf32> -> vector<8x192xf32>
      %201 = vector.broadcast %7 : vector<1x192xf32> to vector<8x192xf32>
      %202 = arith.addf %200, %201 : vector<8x192xf32>
      %203 = vector.extract_strided_slice %199 {offsets = [0, 0], sizes = [8, 64], strides = [1, 1]} : vector<8x192xf32> to vector<8x64xf32>
      %204 = vector.extract_strided_slice %202 {offsets = [0, 0], sizes = [8, 64], strides = [1, 1]} : vector<8x192xf32> to vector<8x64xf32>
      %205 = arith.addf %203, %204 : vector<8x64xf32>
      %206 = arith.negf %205 : vector<8x64xf32>
      %207 = math.exp %206 : vector<8x64xf32>
      %cst_73 = arith.constant 1.000000e+00 : f32
      %208 = vector.broadcast %cst_73 : f32 to vector<8x64xf32>
      %209 = arith.addf %208, %207 : vector<8x64xf32>
      %210 = arith.divf %208, %209 : vector<8x64xf32>
      %211 = vector.extract_strided_slice %199 {offsets = [0, 64], sizes = [8, 64], strides = [1, 1]} : vector<8x192xf32> to vector<8x64xf32>
      %212 = vector.extract_strided_slice %202 {offsets = [0, 64], sizes = [8, 64], strides = [1, 1]} : vector<8x192xf32> to vector<8x64xf32>
      %213 = arith.addf %211, %212 : vector<8x64xf32>
      %214 = arith.negf %213 : vector<8x64xf32>
      %215 = math.exp %214 : vector<8x64xf32>
      %cst_74 = arith.constant 1.000000e+00 : f32
      %216 = vector.broadcast %cst_74 : f32 to vector<8x64xf32>
      %217 = arith.addf %216, %215 : vector<8x64xf32>
      %218 = arith.divf %216, %217 : vector<8x64xf32>
      %219 = vector.extract_strided_slice %199 {offsets = [0, 128], sizes = [8, 64], strides = [1, 1]} : vector<8x192xf32> to vector<8x64xf32>
      %220 = vector.extract_strided_slice %202 {offsets = [0, 128], sizes = [8, 64], strides = [1, 1]} : vector<8x192xf32> to vector<8x64xf32>
      %221 = arith.mulf %210, %220 : vector<8x64xf32>
      %222 = arith.addf %219, %221 : vector<8x64xf32>
      %223 = math.tanh %222 : vector<8x64xf32>
      %224 = arith.subf %197, %223 : vector<8x64xf32>
      %225 = arith.mulf %218, %224 : vector<8x64xf32>
      %226 = arith.addf %223, %225 : vector<8x64xf32>
      %227 = vector.broadcast %196 : i32 to vector<8x1xi32>
      %228 = arith.cmpi slt, %227, %3 : vector<8x1xi32>
      %229 = arith.extui %228 : vector<8x1xi1> to vector<8x1xi32>
      %230 = arith.sitofp %229 : vector<8x1xi32> to vector<8x1xf32>
      %231 = arith.subf %226, %197 : vector<8x64xf32>
      %232 = vector.broadcast %230 : vector<8x1xf32> to vector<8x64xf32>
      %233 = arith.mulf %232, %231 : vector<8x64xf32>
      %234 = arith.addf %197, %233 : vector<8x64xf32>
      %c0_75 = arith.constant 0 : index
      %c0_76 = arith.constant 0 : index
      %235 = vector.load %arg8[%c0_75, %c0_76] : memref<8x64xf32, #tpu.memory_space<vmem>>, vector<8x64xf32>
      tpu.vector_store %arg8[%c0_75, %c0_76], %234 {strides = array<i32>} : memref<8x64xf32, #tpu.memory_space<vmem>>, vector<8x64xf32>,
      %236 = vector.broadcast %230 : vector<8x1xf32> to vector<8x64xf32>
      %237 = arith.mulf %234, %236 : vector<8x64xf32>
      %c0_77 = arith.constant 0 : index
      %c3_78 = arith.constant 3 : index
      %c0_79 = arith.constant 0 : index
      %c0_80 = arith.constant 0 : index
      %238 = vector.load %arg7[%c0_77, %c3_78, %c0_79, %c0_80] : memref<1x8x8x64xf32, #tpu.memory_space<vmem>>, vector<1x1x8x64xf32>
      %239 = vector.shape_cast %238 : vector<1x1x8x64xf32> to vector<8x64xf32>
      %240 = vector.shape_cast %237 : vector<8x64xf32> to vector<1x1x8x64xf32>
      tpu.vector_store %arg7[%c0_77, %c3_78, %c0_79, %c0_80], %240 {strides = array<i32>} : memref<1x8x8x64xf32, #tpu.memory_space<vmem>>, vector<1x1x8x64xf32>,
      %c2_i32 = arith.constant 2 : i32
      %241 = arith.addi %15, %c2_i32 : i32
      %c0_81 = arith.constant 0 : index
      %c0_82 = arith.constant 0 : index
      %242 = vector.load %arg8[%c0_81, %c0_82] : memref<8x64xf32, #tpu.memory_space<vmem>>, vector<8x64xf32>
      %c0_83 = arith.constant 0 : index
      %c2 = arith.constant 2 : index
      %c0_84 = arith.constant 0 : index
      %c0_85 = arith.constant 0 : index
      %243 = vector.load %arg2[%c0_83, %c2, %c0_84, %c0_85] : memref<1x8x8x192xf32, #tpu.memory_space<vmem>>, vector<1x1x8x192xf32>
      %244 = vector.shape_cast %243 : vector<1x1x8x192xf32> to vector<8x192xf32>
      %cst_86 = arith.constant dense<0.000000e+00> : vector<8x192xf32>
      %245 = tpu.matmul %242, %5, %cst_86 {dimension_numbers = #tpu.dot_dimension_numbers<[1], [0], [0], [1], [0, 0, 1, 1], [], []>} : vector<8x64xf32>, vector<64x192xf32>, vector<8x192xf32> -> vector<8x192xf32>
      %246 = vector.broadcast %7 : vector<1x192xf32> to vector<8x192xf32>
      %247 = arith.addf %245, %246 : vector<8x192xf32>
      %248 = vector.extract_strided_slice %244 {offsets = [0, 0], sizes = [8, 64], strides = [1, 1]} : vector<8x192xf32> to vector<8x64xf32>
      %249 = vector.extract_strided_slice %247 {offsets = [0, 0], sizes = [8, 64], strides = [1, 1]} : vector<8x192xf32> to vector<8x64xf32>
      %250 = arith.addf %248, %249 : vector<8x64xf32>
      %251 = arith.negf %250 : vector<8x64xf32>
      %252 = math.exp %251 : vector<8x64xf32>
      %cst_87 = arith.constant 1.000000e+00 : f32
      %253 = vector.broadcast %cst_87 : f32 to vector<8x64xf32>
      %254 = arith.addf %253, %252 : vector<8x64xf32>
      %255 = arith.divf %253, %254 : vector<8x64xf32>
      %256 = vector.extract_strided_slice %244 {offsets = [0, 64], sizes = [8, 64], strides = [1, 1]} : vector<8x192xf32> to vector<8x64xf32>
      %257 = vector.extract_strided_slice %247 {offsets = [0, 64], sizes = [8, 64], strides = [1, 1]} : vector<8x192xf32> to vector<8x64xf32>
      %258 = arith.addf %256, %257 : vector<8x64xf32>
      %259 = arith.negf %258 : vector<8x64xf32>
      %260 = math.exp %259 : vector<8x64xf32>
      %cst_88 = arith.constant 1.000000e+00 : f32
      %261 = vector.broadcast %cst_88 : f32 to vector<8x64xf32>
      %262 = arith.addf %261, %260 : vector<8x64xf32>
      %263 = arith.divf %261, %262 : vector<8x64xf32>
      %264 = vector.extract_strided_slice %244 {offsets = [0, 128], sizes = [8, 64], strides = [1, 1]} : vector<8x192xf32> to vector<8x64xf32>
      %265 = vector.extract_strided_slice %247 {offsets = [0, 128], sizes = [8, 64], strides = [1, 1]} : vector<8x192xf32> to vector<8x64xf32>
      %266 = arith.mulf %255, %265 : vector<8x64xf32>
      %267 = arith.addf %264, %266 : vector<8x64xf32>
      %268 = math.tanh %267 : vector<8x64xf32>
      %269 = arith.subf %242, %268 : vector<8x64xf32>
      %270 = arith.mulf %263, %269 : vector<8x64xf32>
      %271 = arith.addf %268, %270 : vector<8x64xf32>
      %272 = vector.broadcast %241 : i32 to vector<8x1xi32>
      %273 = arith.cmpi slt, %272, %3 : vector<8x1xi32>
      %274 = arith.extui %273 : vector<8x1xi1> to vector<8x1xi32>
      %275 = arith.sitofp %274 : vector<8x1xi32> to vector<8x1xf32>
      %276 = arith.subf %271, %242 : vector<8x64xf32>
      %277 = vector.broadcast %275 : vector<8x1xf32> to vector<8x64xf32>
      %278 = arith.mulf %277, %276 : vector<8x64xf32>
      %279 = arith.addf %242, %278 : vector<8x64xf32>
      %c0_89 = arith.constant 0 : index
      %c0_90 = arith.constant 0 : index
      %280 = vector.load %arg8[%c0_89, %c0_90] : memref<8x64xf32, #tpu.memory_space<vmem>>, vector<8x64xf32>
      tpu.vector_store %arg8[%c0_89, %c0_90], %279 {strides = array<i32>} : memref<8x64xf32, #tpu.memory_space<vmem>>, vector<8x64xf32>,
      %281 = vector.broadcast %275 : vector<8x1xf32> to vector<8x64xf32>
      %282 = arith.mulf %279, %281 : vector<8x64xf32>
      %c0_91 = arith.constant 0 : index
      %c2_92 = arith.constant 2 : index
      %c0_93 = arith.constant 0 : index
      %c0_94 = arith.constant 0 : index
      %283 = vector.load %arg7[%c0_91, %c2_92, %c0_93, %c0_94] : memref<1x8x8x64xf32, #tpu.memory_space<vmem>>, vector<1x1x8x64xf32>
      %284 = vector.shape_cast %283 : vector<1x1x8x64xf32> to vector<8x64xf32>
      %285 = vector.shape_cast %282 : vector<8x64xf32> to vector<1x1x8x64xf32>
      tpu.vector_store %arg7[%c0_91, %c2_92, %c0_93, %c0_94], %285 {strides = array<i32>} : memref<1x8x8x64xf32, #tpu.memory_space<vmem>>, vector<1x1x8x64xf32>,
      %c1_i32_95 = arith.constant 1 : i32
      %286 = arith.addi %15, %c1_i32_95 : i32
      %c0_96 = arith.constant 0 : index
      %c0_97 = arith.constant 0 : index
      %287 = vector.load %arg8[%c0_96, %c0_97] : memref<8x64xf32, #tpu.memory_space<vmem>>, vector<8x64xf32>
      %c0_98 = arith.constant 0 : index
      %c1 = arith.constant 1 : index
      %c0_99 = arith.constant 0 : index
      %c0_100 = arith.constant 0 : index
      %288 = vector.load %arg2[%c0_98, %c1, %c0_99, %c0_100] : memref<1x8x8x192xf32, #tpu.memory_space<vmem>>, vector<1x1x8x192xf32>
      %289 = vector.shape_cast %288 : vector<1x1x8x192xf32> to vector<8x192xf32>
      %cst_101 = arith.constant dense<0.000000e+00> : vector<8x192xf32>
      %290 = tpu.matmul %287, %5, %cst_101 {dimension_numbers = #tpu.dot_dimension_numbers<[1], [0], [0], [1], [0, 0, 1, 1], [], []>} : vector<8x64xf32>, vector<64x192xf32>, vector<8x192xf32> -> vector<8x192xf32>
      %291 = vector.broadcast %7 : vector<1x192xf32> to vector<8x192xf32>
      %292 = arith.addf %290, %291 : vector<8x192xf32>
      %293 = vector.extract_strided_slice %289 {offsets = [0, 0], sizes = [8, 64], strides = [1, 1]} : vector<8x192xf32> to vector<8x64xf32>
      %294 = vector.extract_strided_slice %292 {offsets = [0, 0], sizes = [8, 64], strides = [1, 1]} : vector<8x192xf32> to vector<8x64xf32>
      %295 = arith.addf %293, %294 : vector<8x64xf32>
      %296 = arith.negf %295 : vector<8x64xf32>
      %297 = math.exp %296 : vector<8x64xf32>
      %cst_102 = arith.constant 1.000000e+00 : f32
      %298 = vector.broadcast %cst_102 : f32 to vector<8x64xf32>
      %299 = arith.addf %298, %297 : vector<8x64xf32>
      %300 = arith.divf %298, %299 : vector<8x64xf32>
      %301 = vector.extract_strided_slice %289 {offsets = [0, 64], sizes = [8, 64], strides = [1, 1]} : vector<8x192xf32> to vector<8x64xf32>
      %302 = vector.extract_strided_slice %292 {offsets = [0, 64], sizes = [8, 64], strides = [1, 1]} : vector<8x192xf32> to vector<8x64xf32>
      %303 = arith.addf %301, %302 : vector<8x64xf32>
      %304 = arith.negf %303 : vector<8x64xf32>
      %305 = math.exp %304 : vector<8x64xf32>
      %cst_103 = arith.constant 1.000000e+00 : f32
      %306 = vector.broadcast %cst_103 : f32 to vector<8x64xf32>
      %307 = arith.addf %306, %305 : vector<8x64xf32>
      %308 = arith.divf %306, %307 : vector<8x64xf32>
      %309 = vector.extract_strided_slice %289 {offsets = [0, 128], sizes = [8, 64], strides = [1, 1]} : vector<8x192xf32> to vector<8x64xf32>
      %310 = vector.extract_strided_slice %292 {offsets = [0, 128], sizes = [8, 64], strides = [1, 1]} : vector<8x192xf32> to vector<8x64xf32>
      %311 = arith.mulf %300, %310 : vector<8x64xf32>
      %312 = arith.addf %309, %311 : vector<8x64xf32>
      %313 = math.tanh %312 : vector<8x64xf32>
      %314 = arith.subf %287, %313 : vector<8x64xf32>
      %315 = arith.mulf %308, %314 : vector<8x64xf32>
      %316 = arith.addf %313, %315 : vector<8x64xf32>
      %317 = vector.broadcast %286 : i32 to vector<8x1xi32>
      %318 = arith.cmpi slt, %317, %3 : vector<8x1xi32>
      %319 = arith.extui %318 : vector<8x1xi1> to vector<8x1xi32>
      %320 = arith.sitofp %319 : vector<8x1xi32> to vector<8x1xf32>
      %321 = arith.subf %316, %287 : vector<8x64xf32>
      %322 = vector.broadcast %320 : vector<8x1xf32> to vector<8x64xf32>
      %323 = arith.mulf %322, %321 : vector<8x64xf32>
      %324 = arith.addf %287, %323 : vector<8x64xf32>
      %c0_104 = arith.constant 0 : index
      %c0_105 = arith.constant 0 : index
      %325 = vector.load %arg8[%c0_104, %c0_105] : memref<8x64xf32, #tpu.memory_space<vmem>>, vector<8x64xf32>
      tpu.vector_store %arg8[%c0_104, %c0_105], %324 {strides = array<i32>} : memref<8x64xf32, #tpu.memory_space<vmem>>, vector<8x64xf32>,
      %326 = vector.broadcast %320 : vector<8x1xf32> to vector<8x64xf32>
      %327 = arith.mulf %324, %326 : vector<8x64xf32>
      %c0_106 = arith.constant 0 : index
      %c1_107 = arith.constant 1 : index
      %c0_108 = arith.constant 0 : index
      %c0_109 = arith.constant 0 : index
      %328 = vector.load %arg7[%c0_106, %c1_107, %c0_108, %c0_109] : memref<1x8x8x64xf32, #tpu.memory_space<vmem>>, vector<1x1x8x64xf32>
      %329 = vector.shape_cast %328 : vector<1x1x8x64xf32> to vector<8x64xf32>
      %330 = vector.shape_cast %327 : vector<8x64xf32> to vector<1x1x8x64xf32>
      tpu.vector_store %arg7[%c0_106, %c1_107, %c0_108, %c0_109], %330 {strides = array<i32>} : memref<1x8x8x64xf32, #tpu.memory_space<vmem>>, vector<1x1x8x64xf32>,
      %c0_i32_110 = arith.constant 0 : i32
      %331 = arith.addi %15, %c0_i32_110 : i32
      %c0_111 = arith.constant 0 : index
      %c0_112 = arith.constant 0 : index
      %332 = vector.load %arg8[%c0_111, %c0_112] : memref<8x64xf32, #tpu.memory_space<vmem>>, vector<8x64xf32>
      %c0_113 = arith.constant 0 : index
      %c0_114 = arith.constant 0 : index
      %c0_115 = arith.constant 0 : index
      %c0_116 = arith.constant 0 : index
      %333 = vector.load %arg2[%c0_113, %c0_114, %c0_115, %c0_116] : memref<1x8x8x192xf32, #tpu.memory_space<vmem>>, vector<1x1x8x192xf32>
      %334 = vector.shape_cast %333 : vector<1x1x8x192xf32> to vector<8x192xf32>
      %cst_117 = arith.constant dense<0.000000e+00> : vector<8x192xf32>
      %335 = tpu.matmul %332, %5, %cst_117 {dimension_numbers = #tpu.dot_dimension_numbers<[1], [0], [0], [1], [0, 0, 1, 1], [], []>} : vector<8x64xf32>, vector<64x192xf32>, vector<8x192xf32> -> vector<8x192xf32>
      %336 = vector.broadcast %7 : vector<1x192xf32> to vector<8x192xf32>
      %337 = arith.addf %335, %336 : vector<8x192xf32>
      %338 = vector.extract_strided_slice %334 {offsets = [0, 0], sizes = [8, 64], strides = [1, 1]} : vector<8x192xf32> to vector<8x64xf32>
      %339 = vector.extract_strided_slice %337 {offsets = [0, 0], sizes = [8, 64], strides = [1, 1]} : vector<8x192xf32> to vector<8x64xf32>
      %340 = arith.addf %338, %339 : vector<8x64xf32>
      %341 = arith.negf %340 : vector<8x64xf32>
      %342 = math.exp %341 : vector<8x64xf32>
      %cst_118 = arith.constant 1.000000e+00 : f32
      %343 = vector.broadcast %cst_118 : f32 to vector<8x64xf32>
      %344 = arith.addf %343, %342 : vector<8x64xf32>
      %345 = arith.divf %343, %344 : vector<8x64xf32>
      %346 = vector.extract_strided_slice %334 {offsets = [0, 64], sizes = [8, 64], strides = [1, 1]} : vector<8x192xf32> to vector<8x64xf32>
      %347 = vector.extract_strided_slice %337 {offsets = [0, 64], sizes = [8, 64], strides = [1, 1]} : vector<8x192xf32> to vector<8x64xf32>
      %348 = arith.addf %346, %347 : vector<8x64xf32>
      %349 = arith.negf %348 : vector<8x64xf32>
      %350 = math.exp %349 : vector<8x64xf32>
      %cst_119 = arith.constant 1.000000e+00 : f32
      %351 = vector.broadcast %cst_119 : f32 to vector<8x64xf32>
      %352 = arith.addf %351, %350 : vector<8x64xf32>
      %353 = arith.divf %351, %352 : vector<8x64xf32>
      %354 = vector.extract_strided_slice %334 {offsets = [0, 128], sizes = [8, 64], strides = [1, 1]} : vector<8x192xf32> to vector<8x64xf32>
      %355 = vector.extract_strided_slice %337 {offsets = [0, 128], sizes = [8, 64], strides = [1, 1]} : vector<8x192xf32> to vector<8x64xf32>
      %356 = arith.mulf %345, %355 : vector<8x64xf32>
      %357 = arith.addf %354, %356 : vector<8x64xf32>
      %358 = math.tanh %357 : vector<8x64xf32>
      %359 = arith.subf %332, %358 : vector<8x64xf32>
      %360 = arith.mulf %353, %359 : vector<8x64xf32>
      %361 = arith.addf %358, %360 : vector<8x64xf32>
      %362 = vector.broadcast %331 : i32 to vector<8x1xi32>
      %363 = arith.cmpi slt, %362, %3 : vector<8x1xi32>
      %364 = arith.extui %363 : vector<8x1xi1> to vector<8x1xi32>
      %365 = arith.sitofp %364 : vector<8x1xi32> to vector<8x1xf32>
      %366 = arith.subf %361, %332 : vector<8x64xf32>
      %367 = vector.broadcast %365 : vector<8x1xf32> to vector<8x64xf32>
      %368 = arith.mulf %367, %366 : vector<8x64xf32>
      %369 = arith.addf %332, %368 : vector<8x64xf32>
      %c0_120 = arith.constant 0 : index
      %c0_121 = arith.constant 0 : index
      %370 = vector.load %arg8[%c0_120, %c0_121] : memref<8x64xf32, #tpu.memory_space<vmem>>, vector<8x64xf32>
      tpu.vector_store %arg8[%c0_120, %c0_121], %369 {strides = array<i32>} : memref<8x64xf32, #tpu.memory_space<vmem>>, vector<8x64xf32>,
      %371 = vector.broadcast %365 : vector<8x1xf32> to vector<8x64xf32>
      %372 = arith.mulf %369, %371 : vector<8x64xf32>
      %c0_122 = arith.constant 0 : index
      %c0_123 = arith.constant 0 : index
      %c0_124 = arith.constant 0 : index
      %c0_125 = arith.constant 0 : index
      %373 = vector.load %arg7[%c0_122, %c0_123, %c0_124, %c0_125] : memref<1x8x8x64xf32, #tpu.memory_space<vmem>>, vector<1x1x8x64xf32>
      %374 = vector.shape_cast %373 : vector<1x1x8x64xf32> to vector<8x64xf32>
      %375 = vector.shape_cast %372 : vector<8x64xf32> to vector<1x1x8x64xf32>
      tpu.vector_store %arg7[%c0_122, %c0_123, %c0_124, %c0_125], %375 {strides = array<i32>} : memref<1x8x8x64xf32, #tpu.memory_space<vmem>>, vector<1x1x8x64xf32>,
    } else {
    }
    return
  }
  func.func @transform_0(%arg0: i32, %arg1: i32) -> (i32, i32, i32, i32) {
    %c1_i32 = arith.constant 1 : i32
    %0 = arith.muli %arg0, %c1_i32 : i32
    %c2_i32 = arith.constant 2 : i32
    %1 = arith.muli %c2_i32, %arg0 : i32
    %c1_i32_0 = arith.constant 1 : i32
    %2 = arith.subi %c1_i32_0, %1 : i32
    %3 = arith.muli %2, %arg1 : i32
    %4 = arith.addi %0, %3 : i32
    %c0_i32 = arith.constant 0 : i32
    %c0_i32_1 = arith.constant 0 : i32
    %c0_i32_2 = arith.constant 0 : i32
    return %arg0, %4, %c0_i32, %c0_i32_1 : i32, i32, i32, i32
  }
  func.func @transform_1(%arg0: i32, %arg1: i32) -> (i32, i32) {
    %c0_i32 = arith.constant 0 : i32
    %c0_i32_0 = arith.constant 0 : i32
    %c0_i32_1 = arith.constant 0 : i32
    return %c0_i32, %c0_i32_0 : i32, i32
  }
  func.func @transform_2(%arg0: i32, %arg1: i32) -> (i32, i32, i32) {
    %c0_i32 = arith.constant 0 : i32
    %c0_i32_0 = arith.constant 0 : i32
    %c0_i32_1 = arith.constant 0 : i32
    return %arg0, %c0_i32, %c0_i32_0 : i32, i32, i32
  }
  func.func @transform_3(%arg0: i32, %arg1: i32) -> (i32, i32, i32) {
    %c0_i32 = arith.constant 0 : i32
    %c0_i32_0 = arith.constant 0 : i32
    %c0_i32_1 = arith.constant 0 : i32
    return %arg0, %c0_i32, %c0_i32_0 : i32, i32, i32
  }
  func.func @transform_4(%arg0: i32, %arg1: i32) -> (i32, i32, i32) {
    %c0_i32 = arith.constant 0 : i32
    %c0_i32_0 = arith.constant 0 : i32
    %c0_i32_1 = arith.constant 0 : i32
    return %arg0, %c0_i32, %c0_i32_0 : i32, i32, i32
  }
  func.func @transform_5(%arg0: i32, %arg1: i32) -> (i32, i32, i32, i32) {
    %c1_i32 = arith.constant 1 : i32
    %0 = arith.muli %arg0, %c1_i32 : i32
    %c2_i32 = arith.constant 2 : i32
    %1 = arith.muli %c2_i32, %arg0 : i32
    %c1_i32_0 = arith.constant 1 : i32
    %2 = arith.subi %c1_i32_0, %1 : i32
    %3 = arith.muli %2, %arg1 : i32
    %4 = arith.addi %0, %3 : i32
    %c0_i32 = arith.constant 0 : i32
    %c0_i32_1 = arith.constant 0 : i32
    %c0_i32_2 = arith.constant 0 : i32
    return %arg0, %4, %c0_i32, %c0_i32_1 : i32, i32, i32, i32
  }
}

</mosaic_0001>

<bundles_post_ra>
// kernel: _lambda_.7
= control target key start
LH: loop header
LB: loop body
LE: loop exit
PB: predicated region body
PF: predicated region fallthrough
CT: control target
= control target key end

     0   :  { %s786_s12 = smov 0   ;;  %s788_s13 = smov 0   ;;  %s1088_s0 = inlined_call_operand.vmem [shape: f32[1,128,32], index: 0, kind: input, shape index: {}]   ;;  %s1089_s1 = inlined_call_operand.vmem [shape: f32[2,1,32,192], index: 1, kind: input, shape index: {}]   ;;  %s1090_s2 = inlined_call_operand.vmem [shape: f32[2,1,192], index: 2, kind: input, shape index: {}]   ;;  %s1091_s3 = inlined_call_operand.vmem [shape: f32[2,128,192], index: 3, kind: output, shape index: {}]  }
   0x1   :  { %s790_s14 = smov 0  }
   0x2 LB: > { %s799_s15 = sadd.s32 4294967295, %s763_s14   ;;  %s801_s16 = sadd.s32 1, %s763_s14   ;;  %s763_s14 = sphi %s790_s14, %s1095_s14   ;;  %s759_s13 = sphi %s788_s13, %s1094_s13   ;;  %s755_s12 = sphi %s786_s12, %s1093_s12  }
   0x3   : > { %s85_s17 = ssub.s32 %s763_s14, %s801_s16  ;;  %s88_s18 = sadd.s32 1, %s759_s13 }
   0x4   : > { %p86_p0 = scmp.eq.s32.totalorder %s85_s17, 0  ;;  %p98_p1 = scmp.ne.s32.totalorder %s759_s13, %s755_s12 }
   0x5   : > { %p99_p2 = scmp.eq.s32.totalorder %s799_s15, 1  ;;  %p647_p3 = scmp.ge.s32.totalorder %s763_s14, 1 }
   0x6   : > { %s809_s19 = scalar_select %p86_p0, %s759_s13, %s88_s18  }
   0x7   : > { %p811_p4 = por %p99_p2, %p98_p1  ;;  %p138_p5 = scmp.lt.s32.totalorder %s763_s14, 3 }
   0x9   : > { %p139_p6 = pnand %p647_p3, %p138_p5 }
   0xa   : > { %v177_v0 = vld [vmem:[%s1089_s1 + $0x8] sm:$0xff] (!%p139_p6)  ;;  %v179_v1 = vld [vmem:[%s1089_s1 + $0x18] sm:$0xff] (!%p139_p6)  ;;  %s649_s27 = sshll.u32 (!%p139_p6), %s799_s15, 3  ;;  %v176_v5 = vld [vmem:[%s1089_s1] sm:$0xff] (!%p139_p6)  ;;  %v765_v7 = vmov (!%p139_p6), 0.0   ;;  %vm196_vm0 = vcmask (!%p139_p6), 261120   ;;  %v186_v33 = vlaneseq (!%p139_p6) }
   0xb   : > { %142 = sbr.rel (%p139_p6) target bundleno = 275 (0x113), region = 32  ;;  %v660_v2 = vld [vmem:[%s1089_s1 + $0x48] sm:$0xff] (!%p139_p6)  ;;  %v700_v3 = vpack.c.bf16 (!%p139_p6), %v179_v1, %v177_v0  ;;  %v662_v4 = vld [vmem:[%s1089_s1 + $0x58] sm:$0xff] (!%p139_p6)  ;;  %v178_v6 = vld [vmem:[%s1089_s1 + $0x10] sm:$0xff] (!%p139_p6)  ;;  %285 = vmatprep.mubr.f32.mxu0 (!%p139_p6), %v765_v7  ;;  %437 = vmatprep.mubr.f32.mxu1 (!%p139_p6), %v765_v7  ;;  %p162_p7 = scmp.lt.s32.totalorder (!%p139_p6), %s649_s27, 15  ;;  %vm335_vm1 = vcmask (!%p139_p6), 523264  }
   0xc   : > { %v708_v8 = vpack.c.bf16 (!%p139_p6), %v662_v4, %v660_v2  ;;  %v702_v9 = vpack.c.bf16 (!%p139_p6), %v178_v6, %v176_v5  ;;  %v659_v10 = vld [vmem:[%s1089_s1 + $0x40] sm:$0xff] (!%p139_p6)  ;;  %v661_v11 = vld [vmem:[%s1089_s1 + $0x50] sm:$0xff] (!%p139_p6)  ;;  %v181_v12 = vld [vmem:[%s1089_s1 + $0x28] sm:$0xff] (!%p139_p6)  ;;  %v187_v34 = vshrl.u32 (!%p139_p6), %v186_v33, 7 }
   0xd   : > { %701 = vmatprep.subr.bf16.mxu0 (!%p139_p6), %v700_v3  ;;  %v710_v13 = vpack.c.bf16 (!%p139_p6), %v661_v11, %v659_v10  ;;  %v183_v14 = vld [vmem:[%s1089_s1 + $0x38] sm:$0xff] (!%p139_p6)  ;;  %v664_v15 = vld [vmem:[%s1089_s1 + $0x68] sm:$0xff] (!%p139_p6)  ;;  %v180_v19 = vld [vmem:[%s1089_s1 + $0x20] sm:$0xff] (!%p139_p6) }
   0xe   : > { %v666_v16 = vld [vmem:[%s1089_s1 + $0x78] sm:$0xff] (!%p139_p6)  ;;  %709 = vmatprep.subr.bf16.mxu1 (!%p139_p6), %v708_v8  ;;  %703 = vmatpush1.bf16.msra.mxu0 (!%p139_p6), %v702_v9  ;;  %v704_v17 = vpack.c.bf16 (!%p139_p6), %v183_v14, %v181_v12  ;;  %v182_v20 = vld [vmem:[%s1089_s1 + $0x30] sm:$0xff] (!%p139_p6)  ;;  %v663_v21 = vld [vmem:[%s1089_s1 + $0x60] sm:$0xff] (!%p139_p6)  ;;  %v188_v35 = vsub.s32 (!%p139_p6), 0, %v187_v34  ;;  %v192_v37 = vsub.s32 (!%p139_p6), 1, %v187_v34 }
   0xf   : > { %v712_v18 = vpack.c.bf16 (!%p139_p6), %v666_v16, %v664_v15  ;;  %711 = vmatpush1.bf16.msra.mxu1 (!%p139_p6), %v710_v13  ;;  %v706_v22 = vpack.c.bf16 (!%p139_p6), %v182_v20, %v180_v19  ;;  %v665_v23 = vld [vmem:[%s1089_s1 + $0x70] sm:$0xff] (!%p139_p6)  ;;  %v184_v36 = vld [vmem:[%s1090_s2] sm:$0x3] (!%p139_p6)  ;;  %v667_v38 = vld [vmem:[%s1090_s2 + $0x2] sm:$0x3] (!%p139_p6) }
  0x10   : > { %705 = vmatprep.subr.bf16.mxu0 (!%p139_p6), %v704_v17  ;;  %v714_v24 = vpack.c.bf16 (!%p139_p6), %v665_v23, %v663_v21  ;;  %v916_v39 = vrot.slane (!%p139_p6), %v184_v36, %v188_v35  ;;  %v918_v40 = vrot.slane (!%p139_p6), %v667_v38, %v188_v35  ;;  %v920_v41 = vrot.slane (!%p139_p6), %v184_v36, %v192_v37 }
  0x11   : > { %713 = vmatprep.subr.bf16.mxu1 (!%p139_p6), %v712_v18  ;;  %v922_v42 = vrot.slane (!%p139_p6), %v667_v38, %v192_v37 }
  0x12   : > { %s1097_s27 = smov (!%p162_p7, %s649_s27), 15  ;;  %707 = vmatpush1.bf16.msra.mxu0 %v706_v22  ;;  %s699_s22 = sshll.u32 (%p811_p4), %s799_s15, 7 }
  0x13   : > { %s650_s7 = sshll.u32 %s1097_s27, 3  ;;  %715 = vmatpush1.bf16.msra.mxu1 %v714_v24  ;;  %s158_s27 = sand.u32 1, %s755_s12  }
  0x14   : > { %s869_s10 = scalar_lea.vmem %s1088_s0, %s650_s7  ;;  %s648_s21 = sshll.u32 %s158_s27, 8 }
  0x15   : > { %v168_v25 = vld [vmem:[%s869_s10] sm:$0xff]  ;;  %v169_v26 = vld [vmem:[%s869_s10 + $0x8] sm:$0xff]  ;;  %v170_v27 = vld [vmem:[%s869_s10 + $0x10] sm:$0xff]  ;;  %s927_s12 = scalar_lea.vmem [#allocation2], %s648_s21  ;;  %s1015_s25 = scalar_lea.vmem (%p811_p4), %s1091_s3, %s699_s22 }
  0x16   : > { %651 = vmatmul.mubr.msk.f32.vlgmr.msra.gmra.mrb[0].mxu0 %vm196_vm0, %v168_v25  ;;  %668 = vmatmul.mubr.msk.f32.vlgmr.msra.gmra.mrb[0].mxu1 %vm196_vm0, %v168_v25  ;;  %v171_v28 = vld [vmem:[%s869_s10 + $0x18] sm:$0xff]  ;;  %v172_v29 = vld [vmem:[%s869_s10 + $0x20] sm:$0xff]  ;;  %v173_v30 = vld [vmem:[%s869_s10 + $0x28] sm:$0xff] }
  0x17   : > { %291 = vmatprep.mubr.f32.mxu0 %v765_v7  ;;  %443 = vmatprep.mubr.f32.mxu1 %v765_v7  ;;  %v174_v31 = vld [vmem:[%s869_s10 + $0x30] sm:$0xff]  ;;  %v175_v32 = vld [vmem:[%s869_s10 + $0x38] sm:$0xff] }
  0x1a   : > { %652 = vmatmul.mubr.msk.f32.gmra.mrb[2].mxu0 %vm196_vm0, %v169_v26  ;;  %669 = vmatmul.mubr.msk.f32.gmra.mrb[2].mxu1 %vm196_vm0, %v169_v26 }
  0x1b   : > { %297 = vmatprep.mubr.f32.mxu0 %v765_v7  ;;  %449 = vmatprep.mubr.f32.mxu1 %v765_v7 }
  0x1e   : > { %653 = vmatmul.mubr.msk.f32.gmra.mrb[4].mxu0 %vm196_vm0, %v170_v27  ;;  %670 = vmatmul.mubr.msk.f32.gmra.mrb[4].mxu1 %vm196_vm0, %v170_v27 }
  0x1f   : > { %303 = vmatprep.mubr.f32.mxu0 %v765_v7  ;;  %455 = vmatprep.mubr.f32.mxu1 %v765_v7 }
  0x22   : > { %654 = vmatmul.mubr.msk.f32.gmra.mrb[6].mxu0 %vm196_vm0, %v171_v28  ;;  %671 = vmatmul.mubr.msk.f32.gmra.mrb[6].mxu1 %vm196_vm0, %v171_v28 }
  0x23   : > { %309 = vmatprep.mubr.f32.mxu0 %v765_v7  ;;  %461 = vmatprep.mubr.f32.mxu1 %v765_v7 }
  0x26   : > { %655 = vmatmul.mubr.msk.f32.gmra.mrb[8].mxu0 %vm196_vm0, %v172_v29  ;;  %672 = vmatmul.mubr.msk.f32.gmra.mrb[8].mxu1 %vm196_vm0, %v172_v29 }
  0x27   : > { %315 = vmatprep.mubr.f32.mxu0 %v765_v7  ;;  %467 = vmatprep.mubr.f32.mxu1 %v765_v7 }
  0x2a   : > { %656 = vmatmul.mubr.msk.f32.gmra.mrb[10].mxu0 %vm196_vm0, %v173_v30  ;;  %673 = vmatmul.mubr.msk.f32.gmra.mrb[10].mxu1 %vm196_vm0, %v173_v30 }
  0x2b   : > { %321 = vmatprep.mubr.f32.mxu0 %v765_v7  ;;  %473 = vmatprep.mubr.f32.mxu1 %v765_v7 }
  0x2e   : > { %657 = vmatmul.mubr.msk.f32.gmra.mrb[12].mxu0 %vm196_vm0, %v174_v31  ;;  %674 = vmatmul.mubr.msk.f32.gmra.mrb[12].mxu1 %vm196_vm0, %v174_v31 }
  0x2f   : > { %327 = vmatprep.mubr.f32.mxu0 %v765_v7  ;;  %479 = vmatprep.mubr.f32.mxu1 %v765_v7 }
  0x32   : > { %658 = vmatmul.mubr.msk.f32.gmra.mrb[14].mxu0 %vm196_vm0, %v175_v32  ;;  %675 = vmatmul.mubr.msk.f32.gmra.mrb[14].mxu1 %vm196_vm0, %v175_v32 }
  0xe9   : > { %v287_v43 = vpop.f32.mrb[0].mxu0  ;;  %v439_v45 = vpop.f32.mrb[0].mxu1 }
  0xea   : > { %v288_v44 = vadd.f32 %v287_v43, %v916_v39  ;;  %v289_v46 = vpop.f32.mrb[1].mxu0  ;;  %v440_v47 = vadd.f32 %v439_v45, %v918_v40  ;;  %v441_v49 = vpop.f32.mrb[1].mxu1 }
  0xeb   : > { %v290_v48 = vadd.f32 %v289_v46, %v920_v41  ;;  %v442_v50 = vadd.f32 %v441_v49, %v922_v42 }
  0xec   : > { %334 = vst [vmem:[%s927_s12] sm:$0xff] %v288_v44  ;;  %676 = vst [vmem:[%s927_s12 + $0x80] sm:$0xff] %v440_v47 }
  0xed   : > { %336 = vst.msk [vmem:[%s927_s12 + $0x8] sm:$0xff] %vm335_vm1, %v290_v48  ;;  %v293_v51 = vpop.f32.mrb[2].mxu0  ;;  %677 = vst.msk [vmem:[%s927_s12 + $0x88] sm:$0xff] %vm335_vm1, %v442_v50  ;;  %v445_v53 = vpop.f32.mrb[2].mxu1 }
  0xee   : > { %v294_v52 = vadd.f32 %v293_v51, %v916_v39  ;;  %v295_v54 = vpop.f32.mrb[3].mxu0  ;;  %v446_v55 = vadd.f32 %v445_v53, %v918_v40  ;;  %v447_v57 = vpop.f32.mrb[3].mxu1 }
  0xef   : > { %v296_v56 = vadd.f32 %v295_v54, %v920_v41  ;;  %v448_v58 = vadd.f32 %v447_v57, %v922_v42 }
  0xf0   : > { %337 = vst [vmem:[%s927_s12 + $0x10] sm:$0xff] %v294_v52  ;;  %678 = vst [vmem:[%s927_s12 + $0x90] sm:$0xff] %v446_v55 }
  0xf1   : > { %338 = vst.msk [vmem:[%s927_s12 + $0x18] sm:$0xff] %vm335_vm1, %v296_v56  ;;  %v299_v59 = vpop.f32.mrb[4].mxu0  ;;  %679 = vst.msk [vmem:[%s927_s12 + $0x98] sm:$0xff] %vm335_vm1, %v448_v58  ;;  %v451_v61 = vpop.f32.mrb[4].mxu1 }
  0xf2   : > { %v300_v60 = vadd.f32 %v299_v59, %v916_v39  ;;  %v301_v62 = vpop.f32.mrb[5].mxu0  ;;  %v452_v63 = vadd.f32 %v451_v61, %v918_v40  ;;  %v453_v1 = vpop.f32.mrb[5].mxu1 }
  0xf3   : > { %v302_v0 = vadd.f32 %v301_v62, %v920_v41  ;;  %v454_v2 = vadd.f32 %v453_v1, %v922_v42  ;;  %v558_v59 = vld [vmem:[%s927_s12 + $0x80] sm:$0xff] (%p811_p4) }
  0xf4   : > { %339 = vst [vmem:[%s927_s12 + $0x20] sm:$0xff] %v300_v60  ;;  %680 = vst [vmem:[%s927_s12 + $0xa0] sm:$0xff] %v452_v63  ;;  %v560_v60 = vld [vmem:[%s927_s12 + $0x88] sm:$0xff] (%p811_p4) }
  0xf5   : > { %340 = vst.msk [vmem:[%s927_s12 + $0x28] sm:$0xff] %vm335_vm1, %v302_v0  ;;  %v305_v3 = vpop.f32.mrb[6].mxu0  ;;  %681 = vst.msk [vmem:[%s927_s12 + $0xa8] sm:$0xff] %vm335_vm1, %v454_v2  ;;  %v457_v5 = vpop.f32.mrb[6].mxu1 }
  0xf6   : > { %v306_v4 = vadd.f32 %v305_v3, %v916_v39  ;;  %v307_v6 = vpop.f32.mrb[7].mxu0  ;;  %v458_v7 = vadd.f32 %v457_v5, %v918_v40  ;;  %v459_v9 = vpop.f32.mrb[7].mxu1  ;;  %559 = vst [vmem:[%s1015_s25 + $0x100] sm:$0xff] (%p811_p4), %v558_v59  ;;  %561 = vst [vmem:[%s1015_s25 + $0x108] sm:$0xff] (%p811_p4), %v560_v60 }
  0xf7   : > { %v308_v8 = vadd.f32 %v307_v6, %v920_v41  ;;  %v460_v10 = vadd.f32 %v459_v9, %v922_v42  ;;  %v562_v61 = vld [vmem:[%s927_s12 + $0x90] sm:$0xff] (%p811_p4) }
  0xf8   : > { %341 = vst [vmem:[%s927_s12 + $0x30] sm:$0xff] %v306_v4  ;;  %682 = vst [vmem:[%s927_s12 + $0xb0] sm:$0xff] %v458_v7  ;;  %v564_v62 = vld [vmem:[%s927_s12 + $0x98] sm:$0xff] (%p811_p4) }
  0xf9   : > { %342 = vst.msk [vmem:[%s927_s12 + $0x38] sm:$0xff] %vm335_vm1, %v308_v8  ;;  %v311_v11 = vpop.f32.mrb[8].mxu0  ;;  %683 = vst.msk [vmem:[%s927_s12 + $0xb8] sm:$0xff] %vm335_vm1, %v460_v10  ;;  %v463_v13 = vpop.f32.mrb[8].mxu1 }
  0xfa   : > { %v312_v12 = vadd.f32 %v311_v11, %v916_v39  ;;  %v313_v14 = vpop.f32.mrb[9].mxu0  ;;  %v464_v15 = vadd.f32 %v463_v13, %v918_v40  ;;  %v465_v17 = vpop.f32.mrb[9].mxu1  ;;  %563 = vst [vmem:[%s1015_s25 + $0x110] sm:$0xff] (%p811_p4), %v562_v61  ;;  %565 = vst [vmem:[%s1015_s25 + $0x118] sm:$0xff] (%p811_p4), %v564_v62 }
  0xfb   : > { %v314_v16 = vadd.f32 %v313_v14, %v920_v41  ;;  %v466_v18 = vadd.f32 %v465_v17, %v922_v42  ;;  %v534_v47 = vld [vmem:[%s927_s12 + $0x20] sm:$0xff] (%p811_p4) }
  0xfc   : > { %343 = vst [vmem:[%s927_s12 + $0x40] sm:$0xff] %v312_v12  ;;  %684 = vst [vmem:[%s927_s12 + $0xc0] sm:$0xff] %v464_v15  ;;  %v536_v48 = vld [vmem:[%s927_s12 + $0x28] sm:$0xff] (%p811_p4)  ;;  %v566_v63 = vld [vmem:[%s927_s12 + $0xa0] sm:$0xff] (%p811_p4) }
  0xfd   : > { %344 = vst.msk [vmem:[%s927_s12 + $0x48] sm:$0xff] %vm335_vm1, %v314_v16  ;;  %v317_v19 = vpop.f32.mrb[10].mxu0  ;;  %685 = vst.msk [vmem:[%s927_s12 + $0xc8] sm:$0xff] %vm335_vm1, %v466_v18  ;;  %v469_v21 = vpop.f32.mrb[10].mxu1  ;;  %v568_v0 = vld [vmem:[%s927_s12 + $0xa8] sm:$0xff] (%p811_p4) }
  0xfe   : > { %v318_v20 = vadd.f32 %v317_v19, %v916_v39  ;;  %v319_v22 = vpop.f32.mrb[11].mxu0  ;;  %v470_v23 = vadd.f32 %v469_v21, %v918_v40  ;;  %v471_v25 = vpop.f32.mrb[11].mxu1  ;;  %535 = vst [vmem:[%s1015_s25 + $0x20] sm:$0xff] (%p811_p4), %v534_v47  ;;  %537 = vst [vmem:[%s1015_s25 + $0x28] sm:$0xff] (%p811_p4), %v536_v48 }
  0xff   : > { %v320_v24 = vadd.f32 %v319_v22, %v920_v41  ;;  %v472_v26 = vadd.f32 %v471_v25, %v922_v42  ;;  %v538_v49 = vld [vmem:[%s927_s12 + $0x30] sm:$0xff] (%p811_p4)  ;;  %567 = vst [vmem:[%s1015_s25 + $0x120] sm:$0xff] (%p811_p4), %v566_v63  ;;  %569 = vst [vmem:[%s1015_s25 + $0x128] sm:$0xff] (%p811_p4), %v568_v0 }
 0x100   : > { %345 = vst [vmem:[%s927_s12 + $0x50] sm:$0xff] %v318_v20  ;;  %686 = vst [vmem:[%s927_s12 + $0xd0] sm:$0xff] %v470_v23  ;;  %v540_v50 = vld [vmem:[%s927_s12 + $0x38] sm:$0xff] (%p811_p4)  ;;  %v570_v1 = vld [vmem:[%s927_s12 + $0xb0] sm:$0xff] (%p811_p4) }
 0x101   : > { %346 = vst.msk [vmem:[%s927_s12 + $0x58] sm:$0xff] %vm335_vm1, %v320_v24  ;;  %v323_v27 = vpop.f32.mrb[12].mxu0  ;;  %687 = vst.msk [vmem:[%s927_s12 + $0xd8] sm:$0xff] %vm335_vm1, %v472_v26  ;;  %v475_v29 = vpop.f32.mrb[12].mxu1  ;;  %v572_v2 = vld [vmem:[%s927_s12 + $0xb8] sm:$0xff] (%p811_p4) }
 0x102   : > { %v324_v28 = vadd.f32 %v323_v27, %v916_v39  ;;  %v325_v30 = vpop.f32.mrb[13].mxu0  ;;  %v476_v31 = vadd.f32 %v475_v29, %v918_v40  ;;  %v477_v33 = vpop.f32.mrb[13].mxu1  ;;  %539 = vst [vmem:[%s1015_s25 + $0x30] sm:$0xff] (%p811_p4), %v538_v49  ;;  %541 = vst [vmem:[%s1015_s25 + $0x38] sm:$0xff] (%p811_p4), %v540_v50 }
 0x103   : > { %v326_v32 = vadd.f32 %v325_v30, %v920_v41  ;;  %v478_v34 = vadd.f32 %v477_v33, %v922_v42  ;;  %509 = sbr.rel (!%p811_p4) target bundleno = 275 (0x113), region = 36  ;;  %v542_v51 = vld [vmem:[%s927_s12 + $0x40] sm:$0xff] (%p811_p4)  ;;  %571 = vst [vmem:[%s1015_s25 + $0x130] sm:$0xff] (%p811_p4), %v570_v1  ;;  %573 = vst [vmem:[%s1015_s25 + $0x138] sm:$0xff] (%p811_p4), %v572_v2 }
 0x104   : > { %347 = vst [vmem:[%s927_s12 + $0x60] sm:$0xff] %v324_v28  ;;  %688 = vst [vmem:[%s927_s12 + $0xe0] sm:$0xff] %v476_v31  ;;  %v544_v52 = vld [vmem:[%s927_s12 + $0x48] sm:$0xff] (%p811_p4)  ;;  %v574_v3 = vld [vmem:[%s927_s12 + $0xc0] sm:$0xff] (%p811_p4) }
 0x105   : > { %348 = vst.msk [vmem:[%s927_s12 + $0x68] sm:$0xff] %vm335_vm1, %v326_v32  ;;  %v329_v35 = vpop.f32.mrb[14].mxu0  ;;  %689 = vst.msk [vmem:[%s927_s12 + $0xe8] sm:$0xff] %vm335_vm1, %v478_v34  ;;  %v481_v37 = vpop.f32.mrb[14].mxu1  ;;  %v576_v4 = vld [vmem:[%s927_s12 + $0xc8] sm:$0xff] (%p811_p4) }
 0x106   : > { %v330_v36 = vadd.f32 %v329_v35, %v916_v39  ;;  %v331_v38 = vpop.f32.mrb[15].mxu0  ;;  %v482_v43 = vadd.f32 %v481_v37, %v918_v40  ;;  %v483_v45 = vpop.f32.mrb[15].mxu1  ;;  %v526_v39 = vld [vmem:[%s927_s12] sm:$0xff] (%p811_p4)  ;;  %v528_v40 = vld [vmem:[%s927_s12 + $0x8] sm:$0xff] (%p811_p4)  ;;  %543 = vst [vmem:[%s1015_s25 + $0x40] sm:$0xff] (%p811_p4), %v542_v51  ;;  %545 = vst [vmem:[%s1015_s25 + $0x48] sm:$0xff] (%p811_p4), %v544_v52 }
 0x107   : > { %v332_v44 = vadd.f32 %v331_v38, %v920_v41  ;;  %v484_v46 = vadd.f32 %v483_v45, %v922_v42  ;;  %v530_v41 = vld [vmem:[%s927_s12 + $0x10] sm:$0xff] (%p811_p4)  ;;  %v532_v42 = vld [vmem:[%s927_s12 + $0x18] sm:$0xff] (%p811_p4)  ;;  %527 = vst [vmem:[%s1015_s25] sm:$0xff] (%p811_p4), %v526_v39  ;;  %529 = vst [vmem:[%s1015_s25 + $0x8] sm:$0xff] (%p811_p4), %v528_v40 }
 0x108   : > { %349 = vst [vmem:[%s927_s12 + $0x70] sm:$0xff] %v330_v36  ;;  %690 = vst [vmem:[%s927_s12 + $0xf0] sm:$0xff] %v482_v43  ;;  %v546_v53 = vld [vmem:[%s927_s12 + $0x50] sm:$0xff] (%p811_p4)  ;;  %v548_v54 = vld [vmem:[%s927_s12 + $0x58] sm:$0xff] (%p811_p4) }
 0x109   : > { %350 = vst.msk [vmem:[%s927_s12 + $0x78] sm:$0xff] %vm335_vm1, %v332_v44  ;;  %691 = vst.msk [vmem:[%s927_s12 + $0xf8] sm:$0xff] %vm335_vm1, %v484_v46  ;;  %v578_v5 = vld [vmem:[%s927_s12 + $0xd0] sm:$0xff] (%p811_p4)  ;;  %v580_v6 = vld [vmem:[%s927_s12 + $0xd8] sm:$0xff] (%p811_p4) }
 0x10a   : > { %531 = vst [vmem:[%s1015_s25 + $0x10] sm:$0xff] %v530_v41  ;;  %533 = vst [vmem:[%s1015_s25 + $0x18] sm:$0xff] %v532_v42 }
 0x10b   : > { %547 = vst [vmem:[%s1015_s25 + $0x50] sm:$0xff] %v546_v53  ;;  %549 = vst [vmem:[%s1015_s25 + $0x58] sm:$0xff] %v548_v54  ;;  %v550_v55 = vld [vmem:[%s927_s12 + $0x60] sm:$0xff] }
 0x10c   : > { %v552_v56 = vld [vmem:[%s927_s12 + $0x68] sm:$0xff]  ;;  %551 = vst [vmem:[%s1015_s25 + $0x60] sm:$0xff] %v550_v55  ;;  %575 = vst [vmem:[%s1015_s25 + $0x140] sm:$0xff] %v574_v3  ;;  %v582_v7 = vld [vmem:[%s927_s12 + $0xe0] sm:$0xff] }
 0x10d   : > { %553 = vst [vmem:[%s1015_s25 + $0x68] sm:$0xff] %v552_v56  ;;  %577 = vst [vmem:[%s1015_s25 + $0x148] sm:$0xff] %v576_v4  ;;  %v584_v8 = vld [vmem:[%s927_s12 + $0xe8] sm:$0xff] }
 0x10e   : > { %579 = vst [vmem:[%s1015_s25 + $0x150] sm:$0xff] %v578_v5  ;;  %581 = vst [vmem:[%s1015_s25 + $0x158] sm:$0xff] %v580_v6 }
 0x10f   : > { %v554_v57 = vld [vmem:[%s927_s12 + $0x70] sm:$0xff]  ;;  %583 = vst [vmem:[%s1015_s25 + $0x160] sm:$0xff] %v582_v7  ;;  %585 = vst [vmem:[%s1015_s25 + $0x168] sm:$0xff] %v584_v8 }
 0x110   : > { %555 = vst [vmem:[%s1015_s25 + $0x70] sm:$0xff] %v554_v57  ;;  %v556_v58 = vld [vmem:[%s927_s12 + $0x78] sm:$0xff]  ;;  %v586_v9 = vld [vmem:[%s927_s12 + $0xf0] sm:$0xff] }
 0x111   : > { %557 = vst [vmem:[%s1015_s25 + $0x78] sm:$0xff] %v556_v58  ;;  %v588_v10 = vld [vmem:[%s927_s12 + $0xf8] sm:$0xff]  ;;  %587 = vst [vmem:[%s1015_s25 + $0x170] sm:$0xff] %v586_v9 }
 0x112   : > { %589 = vst [vmem:[%s1015_s25 + $0x178] sm:$0xff] %v588_v10 }
 0x113 PF: > { %p10_p8 = scmp.ge.s32.totalorder %s801_s16, 4   ;;  %s1093_s12 = smov %s759_s13 }
 0x114   : > { %s1094_s13 = smov %s809_s19  ;;  %s1095_s14 = smov %s801_s16 }
 0x115   :  { %12 = sbr.rel (!%p10_p8) target bundleno = 2 (0x2), region = 88 }

// kernel: _lambda_.13
= control target key start
LH: loop header
LB: loop body
LE: loop exit
PB: predicated region body
PF: predicated region fallthrough
CT: control target
= control target key end

     0   :  { %vm64_vm0 = vcmask 523264   ;;  %s1172_s1 = inlined_call_operand.vmem [shape: f32[2,64,128], index: 1, kind: input, shape index: {}]   ;;  %s1173_s0 = inlined_call_operand.vmem [shape: f32[2,16,8,64], index: 0, kind: input, shape index: {}]   ;;  %s1174_s2 = inlined_call_operand.vmem [shape: f32[1,128], index: 2, kind: input, shape index: {}]   ;;  %s1175_s3 = inlined_call_operand.vmem [shape: f32[16,8,128], index: 3, kind: output, shape index: {}]  }
   0x1   :  { %v606_v0 = vld [vmem:[%s1172_s1 + $0x40] sm:$0xff]  ;;  %v607_v1 = vld [vmem:[%s1172_s1 + $0x48] sm:$0xff]  ;;  %v608_v5 = vld [vmem:[%s1172_s1 + $0x50] sm:$0xff] }
   0x2   :  { %v47_v2 = vld [vmem:[%s1172_s1] sm:$0xff]  ;;  %v775_v3 = vpack.c.bf16 %v607_v1, %v606_v0  ;;  %v48_v4 = vld [vmem:[%s1172_s1 + $0x8] sm:$0xff]  ;;  %v609_v6 = vld [vmem:[%s1172_s1 + $0x58] sm:$0xff] }
   0x3   :  { %v791_v7 = vpack.c.bf16 %v48_v4, %v47_v2  ;;  %v779_v8 = vpack.c.bf16 %v609_v6, %v608_v5  ;;  %v49_v9 = vld [vmem:[%s1172_s1 + $0x10] sm:$0xff]  ;;  %v50_v10 = vld [vmem:[%s1172_s1 + $0x18] sm:$0xff]  ;;  %v610_v11 = vld [vmem:[%s1172_s1 + $0x60] sm:$0xff] }
   0x4   :  { %776 = vmatprep.subr.bf16.mxu1 %v775_v3  ;;  %v795_v12 = vpack.c.bf16 %v50_v10, %v49_v9  ;;  %v611_v13 = vld [vmem:[%s1172_s1 + $0x68] sm:$0xff]  ;;  %v51_v14 = vld [vmem:[%s1172_s1 + $0x20] sm:$0xff]  ;;  %v612_v20 = vld [vmem:[%s1172_s1 + $0x70] sm:$0xff] }
   0x5   :  { %v52_v15 = vld [vmem:[%s1172_s1 + $0x28] sm:$0xff]  ;;  %792 = vmatprep.subr.bf16.mxu0 %v791_v7  ;;  %778 = vmatpush3.bf16.msra.mxu1 %v775_v3  ;;  %v783_v16 = vpack.c.bf16 %v611_v13, %v610_v11  ;;  %v590_v17 = vld [vmem:[%s1173_s0 + $0x80] sm:$0xff]  ;;  %v613_v21 = vld [vmem:[%s1172_s1 + $0x78] sm:$0xff] }
   0x6   :  { %794 = vmatpush3.bf16.msra.mxu0 %v791_v7  ;;  %780 = vmatprep.subr.bf16.mxu1 %v779_v8  ;;  %v14_v18 = vld [vmem:[%s1173_s0] sm:$0xff]  ;;  %v799_v19 = vpack.c.bf16 %v52_v15, %v51_v14  ;;  %v53_v22 = vld [vmem:[%s1172_s1 + $0x30] sm:$0xff]  ;;  %v54_v23 = vld [vmem:[%s1172_s1 + $0x38] sm:$0xff]  ;;  %v787_v24 = vpack.c.bf16 %v613_v21, %v612_v20 }
   0x7   :  { %796 = vmatprep.subr.bf16.mxu0 %v795_v12  ;;  %711 = vmatprep.mubr.msk.f32.mxu1 %vm64_vm0, %v590_v17  ;;  %v803_v25 = vpack.c.bf16 %v54_v23, %v53_v22  ;;  %v591_v26 = vld [vmem:[%s1173_s0 + $0x88] sm:$0xff]  ;;  %v592_v28 = vld [vmem:[%s1173_s0 + $0x90] sm:$0xff]  ;;  %v593_v30 = vld [vmem:[%s1173_s0 + $0x98] sm:$0xff] }
   0x8   :  { %751 = vmatprep.mubr.msk.f32.mxu0 %vm64_vm0, %v14_v18  ;;  %v15_v27 = vld [vmem:[%s1173_s0 + $0x8] sm:$0xff]  ;;  %v16_v29 = vld [vmem:[%s1173_s0 + $0x10] sm:$0xff]  ;;  %v17_v31 = vld [vmem:[%s1173_s0 + $0x18] sm:$0xff] }
   0x9   :  { %782 = vmatpush3.bf16.msra.mxu1 %v779_v8  ;;  %v594_v32 = vld [vmem:[%s1173_s0 + $0xa0] sm:$0xff]  ;;  %v595_v34 = vld [vmem:[%s1173_s0 + $0xa8] sm:$0xff]  ;;  %v596_v36 = vld [vmem:[%s1173_s0 + $0xb0] sm:$0xff] }
   0xa   :  { %798 = vmatpush3.bf16.msra.mxu0 %v795_v12  ;;  %784 = vmatprep.subr.bf16.mxu1 %v783_v16  ;;  %v18_v33 = vld [vmem:[%s1173_s0 + $0x20] sm:$0xff]  ;;  %v19_v35 = vld [vmem:[%s1173_s0 + $0x28] sm:$0xff]  ;;  %v20_v37 = vld [vmem:[%s1173_s0 + $0x30] sm:$0xff] }
   0xb   :  { %800 = vmatprep.subr.bf16.mxu0 %v799_v19  ;;  %v597_v38 = vld [vmem:[%s1173_s0 + $0xb8] sm:$0xff]  ;;  %v598_v40 = vld [vmem:[%s1173_s0 + $0xc0] sm:$0xff]  ;;  %v599_v42 = vld [vmem:[%s1173_s0 + $0xc8] sm:$0xff] }
   0xc   :  { %v21_v39 = vld [vmem:[%s1173_s0 + $0x38] sm:$0xff]  ;;  %v22_v41 = vld [vmem:[%s1173_s0 + $0x40] sm:$0xff]  ;;  %v23_v43 = vld [vmem:[%s1173_s0 + $0x48] sm:$0xff] }
   0xd   :  { %786 = vmatpush3.bf16.msra.mxu1 %v783_v16  ;;  %v600_v44 = vld [vmem:[%s1173_s0 + $0xd0] sm:$0xff]  ;;  %v601_v46 = vld [vmem:[%s1173_s0 + $0xd8] sm:$0xff]  ;;  %v602_v48 = vld [vmem:[%s1173_s0 + $0xe0] sm:$0xff] }
   0xe   :  { %802 = vmatpush3.bf16.msra.mxu0 %v799_v19  ;;  %788 = vmatprep.subr.bf16.mxu1 %v787_v24  ;;  %v24_v45 = vld [vmem:[%s1173_s0 + $0x50] sm:$0xff]  ;;  %v25_v47 = vld [vmem:[%s1173_s0 + $0x58] sm:$0xff]  ;;  %v26_v49 = vld [vmem:[%s1173_s0 + $0x60] sm:$0xff] }
   0xf   :  { %804 = vmatprep.subr.bf16.mxu0 %v803_v25  ;;  %v603_v50 = vld [vmem:[%s1173_s0 + $0xe8] sm:$0xff]  ;;  %v604_v52 = vld [vmem:[%s1173_s0 + $0xf0] sm:$0xff]  ;;  %v605_v54 = vld [vmem:[%s1173_s0 + $0xf8] sm:$0xff] }
  0x10   :  { %v27_v51 = vld [vmem:[%s1173_s0 + $0x68] sm:$0xff]  ;;  %v28_v53 = vld [vmem:[%s1173_s0 + $0x70] sm:$0xff]  ;;  %v29_v55 = vld [vmem:[%s1173_s0 + $0x78] sm:$0xff] }
  0x11   :  { %790 = vmatpush3.bf16.msra.mxu1 %v787_v24  ;;  %v646_v5 = vld [vmem:[%s1174_s2] ss:$0 sm:$0xff] }
  0x12   :  { %806 = vmatpush3.bf16.msra.mxu0 %v803_v25 }
  0x14   :  { %712 = vmatmul.mubr.msk.f32.vlgmr.msra.gmra.mrb[0].mxu1 %vm64_vm0, %v591_v26 }
  0x15   :  { %752 = vmatmul.mubr.msk.f32.vlgmr.msra.gmra.mrb[0].mxu0 %vm64_vm0, %v15_v27  ;;  %714 = vmatprep.mubr.msk.f32.mxu1 %vm64_vm0, %v592_v28 }
  0x16   :  { %754 = vmatprep.mubr.msk.f32.mxu0 %vm64_vm0, %v16_v29 }
  0x18   :  { %715 = vmatmul.mubr.msk.f32.gmra.mrb[2].mxu1 %vm64_vm0, %v593_v30 }
  0x19   :  { %755 = vmatmul.mubr.msk.f32.gmra.mrb[2].mxu0 %vm64_vm0, %v17_v31  ;;  %717 = vmatprep.mubr.msk.f32.mxu1 %vm64_vm0, %v594_v32 }
  0x1a   :  { %757 = vmatprep.mubr.msk.f32.mxu0 %vm64_vm0, %v18_v33 }
  0x1c   :  { %718 = vmatmul.mubr.msk.f32.gmra.mrb[4].mxu1 %vm64_vm0, %v595_v34 }
  0x1d   :  { %758 = vmatmul.mubr.msk.f32.gmra.mrb[4].mxu0 %vm64_vm0, %v19_v35  ;;  %720 = vmatprep.mubr.msk.f32.mxu1 %vm64_vm0, %v596_v36 }
  0x1e   :  { %760 = vmatprep.mubr.msk.f32.mxu0 %vm64_vm0, %v20_v37 }
  0x20   :  { %721 = vmatmul.mubr.msk.f32.gmra.mrb[6].mxu1 %vm64_vm0, %v597_v38 }
  0x21   :  { %761 = vmatmul.mubr.msk.f32.gmra.mrb[6].mxu0 %vm64_vm0, %v21_v39  ;;  %723 = vmatprep.mubr.msk.f32.mxu1 %vm64_vm0, %v598_v40 }
  0x22   :  { %763 = vmatprep.mubr.msk.f32.mxu0 %vm64_vm0, %v22_v41 }
  0x24   :  { %724 = vmatmul.mubr.msk.f32.gmra.mrb[8].mxu1 %vm64_vm0, %v599_v42 }
  0x25   :  { %764 = vmatmul.mubr.msk.f32.gmra.mrb[8].mxu0 %vm64_vm0, %v23_v43  ;;  %726 = vmatprep.mubr.msk.f32.mxu1 %vm64_vm0, %v600_v44 }
  0x26   :  { %766 = vmatprep.mubr.msk.f32.mxu0 %vm64_vm0, %v24_v45 }
  0x28   :  { %727 = vmatmul.mubr.msk.f32.gmra.mrb[10].mxu1 %vm64_vm0, %v601_v46 }
  0x29   :  { %767 = vmatmul.mubr.msk.f32.gmra.mrb[10].mxu0 %vm64_vm0, %v25_v47  ;;  %729 = vmatprep.mubr.msk.f32.mxu1 %vm64_vm0, %v602_v48 }
  0x2a   :  { %769 = vmatprep.mubr.msk.f32.mxu0 %vm64_vm0, %v26_v49 }
  0x2c   :  { %730 = vmatmul.mubr.msk.f32.gmra.mrb[12].mxu1 %vm64_vm0, %v603_v50 }
  0x2d   :  { %770 = vmatmul.mubr.msk.f32.gmra.mrb[12].mxu0 %vm64_vm0, %v27_v51  ;;  %732 = vmatprep.mubr.msk.f32.mxu1 %vm64_vm0, %v604_v52 }
  0x2e   :  { %772 = vmatprep.mubr.msk.f32.mxu0 %vm64_vm0, %v28_v53 }
  0x30   :  { %733 = vmatmul.mubr.msk.f32.gmra.mrb[14].mxu1 %vm64_vm0, %v605_v54 }
  0x31   :  { %773 = vmatmul.mubr.msk.f32.gmra.mrb[14].mxu0 %vm64_vm0, %v29_v55 }
  0xe7   :  { %v713_v56 = vpop.f32.mrb[0].mxu1 }
  0xe8   :  { %v753_v57 = vpop.f32.mrb[0].mxu0  ;;  %v179_v58 = vpop.f32.mrb[1].mxu1 }
  0xe9   :  { %v378_v59 = vadd.f32 %v753_v57, %v713_v56  ;;  %v372_v60 = vpop.f32.mrb[1].mxu0 }
  0xea   :  { %v373_v61 = vadd.f32 %v372_v60, %v179_v58 }
  0xeb   :  { %v716_v62 = vpop.f32.mrb[2].mxu1  ;;  %v459_v11 = vadd.f32 %v646_v5, %v378_v59 }
  0xec   :  { %v756_v63 = vpop.f32.mrb[2].mxu0  ;;  %v189_v0 = vpop.f32.mrb[3].mxu1  ;;  %v458_v14 = vadd.f32 %v646_v5, %v373_v61 }
  0xed   :  { %v388_v1 = vadd.f32 %v756_v63, %v716_v62  ;;  %v382_v2 = vpop.f32.mrb[3].mxu0 }
  0xee   :  { %v383_v3 = vadd.f32 %v382_v2, %v189_v0 }
  0xef   :  { %v719_v4 = vpop.f32.mrb[4].mxu1  ;;  %v461_v23 = vadd.f32 %v646_v5, %v388_v1 }
  0xf0   :  { %v759_v6 = vpop.f32.mrb[4].mxu0  ;;  %v199_v7 = vpop.f32.mrb[5].mxu1  ;;  %v460_v26 = vadd.f32 %v646_v5, %v383_v3 }
  0xf1   :  { %v398_v8 = vadd.f32 %v759_v6, %v719_v4  ;;  %v392_v9 = vpop.f32.mrb[5].mxu0 }
  0xf2   :  { %v393_v10 = vadd.f32 %v392_v9, %v199_v7 }
  0xf3   :  { %v1056_v12 = vadd.f32 %v646_v5, %v398_v8  ;;  %v722_v13 = vpop.f32.mrb[6].mxu1 }
  0xf4   :  { %v462_v15 = vadd.f32 %v646_v5, %v393_v10  ;;  %v762_v16 = vpop.f32.mrb[6].mxu0  ;;  %v209_v17 = vpop.f32.mrb[7].mxu1 }
  0xf5   :  { %v475_v18 = vmax.f32 %v459_v11, %v1056_v12  ;;  %v408_v19 = vadd.f32 %v762_v16, %v722_v13  ;;  %v402_v20 = vpop.f32.mrb[7].mxu0 }
  0xf6   :  { %v474_v21 = vmax.f32 %v458_v14, %v462_v15  ;;  %v403_v22 = vadd.f32 %v402_v20, %v209_v17 }
  0xf7   :  { %v465_v24 = vadd.f32 %v646_v5, %v408_v19  ;;  %v725_v25 = vpop.f32.mrb[8].mxu1 }
  0xf8   :  { %v464_v27 = vadd.f32 %v646_v5, %v403_v22  ;;  %v765_v28 = vpop.f32.mrb[8].mxu0  ;;  %v219_v29 = vpop.f32.mrb[9].mxu1 }
  0xf9   :  { %v477_v30 = vmax.f32 %v461_v23, %v465_v24  ;;  %v418_v31 = vadd.f32 %v765_v28, %v725_v25  ;;  %v412_v32 = vpop.f32.mrb[9].mxu0 }
  0xfa   :  { %v476_v33 = vmax.f32 %v460_v26, %v464_v27  ;;  %v413_v34 = vadd.f32 %v412_v32, %v219_v29 }
  0xfb   :  { %v467_v35 = vadd.f32 %v646_v5, %v418_v31  ;;  %v728_v36 = vpop.f32.mrb[10].mxu1 }
  0xfc   :  { %v466_v37 = vadd.f32 %v646_v5, %v413_v34  ;;  %v768_v38 = vpop.f32.mrb[10].mxu0  ;;  %v229_v39 = vpop.f32.mrb[11].mxu1 }
  0xfd   :  { %v479_v40 = vmax.f32 %v475_v18, %v467_v35  ;;  %v428_v41 = vadd.f32 %v768_v38, %v728_v36  ;;  %v422_v42 = vpop.f32.mrb[11].mxu0 }
  0xfe   :  { %v478_v43 = vmax.f32 %v474_v21, %v466_v37  ;;  %v423_v44 = vadd.f32 %v422_v42, %v229_v39 }
  0xff   :  { %v469_v45 = vadd.f32 %v646_v5, %v428_v41  ;;  %v731_v46 = vpop.f32.mrb[12].mxu1 }
 0x100   :  { %v468_v47 = vadd.f32 %v646_v5, %v423_v44  ;;  %v771_v48 = vpop.f32.mrb[12].mxu0  ;;  %v239_v49 = vpop.f32.mrb[13].mxu1 }
 0x101   :  { %v481_v50 = vmax.f32 %v477_v30, %v469_v45  ;;  %v438_v51 = vadd.f32 %v771_v48, %v731_v46  ;;  %v432_v52 = vpop.f32.mrb[13].mxu0 }
 0x102   :  { %v480_v53 = vmax.f32 %v476_v33, %v468_v47  ;;  %v433_v54 = vadd.f32 %v432_v52, %v239_v49 }
 0x103   :  { %v471_v55 = vadd.f32 %v646_v5, %v438_v51  ;;  %v734_v56 = vpop.f32.mrb[14].mxu1 }
 0x104   :  { %v470_v57 = vadd.f32 %v646_v5, %v433_v54  ;;  %v774_v58 = vpop.f32.mrb[14].mxu0  ;;  %v249_v59 = vpop.f32.mrb[15].mxu1 }
 0x105   :  { %v483_v60 = vmax.f32 %v479_v40, %v471_v55  ;;  %v448_v61 = vadd.f32 %v774_v58, %v734_v56  ;;  %v442_v62 = vpop.f32.mrb[15].mxu0 }
 0x106   :  { %v482_v63 = vmax.f32 %v478_v43, %v470_v57  ;;  %v443_v0 = vadd.f32 %v442_v62, %v249_v59 }
 0x107   :  { %v473_v1 = vadd.f32 %v646_v5, %v448_v61 }
 0x108   :  { %v486_v2 = vmax.f32 %v482_v63, %v483_v60  ;;  %v472_v3 = vadd.f32 %v646_v5, %v443_v0 }
 0x109   :  { %v485_v4 = vmax.f32 %v481_v50, %v473_v1 }
 0x10a   :  { %v484_v6 = vmax.f32 %v480_v53, %v472_v3 }
 0x10c   :  { %v487_v7 = vmax.f32 %v484_v6, %v485_v4 }
 0x10e   :  { %v488_v8 = vmax.f32 %v486_v2, %v487_v7 }
 0x110   :  { %v1059_v9 = vsub.f32 %v458_v14, %v488_v8  ;;  %v1061_v10 = vsub.f32 %v459_v11, %v488_v8  ;;  %v1063_v13 = vsub.f32 %v460_v26, %v488_v8  ;;  %v1065_v16 = vsub.f32 %v461_v23, %v488_v8 }
 0x111   :  { %v1067_v17 = vsub.f32 %v462_v15, %v488_v8  ;;  %v1070_v18 = vsub.f32 %v1056_v12, %v488_v8  ;;  %v1072_v19 = vsub.f32 %v464_v27, %v488_v8  ;;  %v1074_v5 = vsub.f32 %v465_v24, %v488_v8 }
 0x112   :  { %v1076_v20 = vsub.f32 %v466_v37, %v488_v8  ;;  %v1078_v21 = vsub.f32 %v467_v35, %v488_v8  ;;  %v1080_v14 = vsub.f32 %v468_v47, %v488_v8  ;;  %v1082_v11 = vsub.f32 %v469_v45, %v488_v8 }
 0x113   :  { %v1084_v22 = vsub.f32 %v470_v57, %v488_v8  ;;  %v1086_v23 = vsub.f32 %v471_v55, %v488_v8  ;;  %v1088_v15 = vsub.f32 %v472_v3, %v488_v8  ;;  %v1090_v12 = vsub.f32 %v473_v1, %v488_v8 }
 0x114   :  { %v505_v25 = vmul.f32 1.442695, %v1059_v9  ;;  %v507_v24 = vmul.f32 1.442695, %v1061_v10  ;;  %v509_v26 = vmul.f32 1.442695, %v1063_v13 }
 0x115   :  { %v511_v27 = vmul.f32 1.442695, %v1065_v16  ;;  %v513_v28 = vmul.f32 1.442695, %v1067_v17  ;;  %v515_v29 = vmul.f32 1.442695, %v1070_v18 }
 0x116   :  { %823 = vpow2.f32 %v505_v25  ;;  %v517_v30 = vmul.f32 1.442695, %v1072_v19  ;;  %v519_v31 = vmul.f32 1.442695, %v1074_v5  ;;  %v521_v34 = vmul.f32 1.442695, %v1076_v20 }
 0x117   :  { %825 = vpow2.f32 %v507_v24  ;;  %v523_v37 = vmul.f32 1.442695, %v1078_v21  ;;  %v525_v40 = vmul.f32 1.442695, %v1080_v14  ;;  %v527_v43 = vmul.f32 1.442695, %v1082_v11 }
 0x118   :  { %827 = vpow2.f32 %v509_v26  ;;  %v529_v46 = vmul.f32 1.442695, %v1084_v22  ;;  %v531_v49 = vmul.f32 1.442695, %v1086_v23  ;;  %v533_v52 = vmul.f32 1.442695, %v1088_v15 }
 0x119   :  { %829 = vpow2.f32 %v511_v27  ;;  %v535_v55 = vmul.f32 1.442695, %v1090_v12 }
 0x11a   :  { %831 = vpow2.f32 %v513_v28 }
 0x11b   :  { %833 = vpow2.f32 %v515_v29 }
 0x11c   :  { %835 = vpow2.f32 %v517_v30 }
 0x11d   :  { %837 = vpow2.f32 %v519_v31 }
 0x11e   :  { %839 = vpow2.f32 %v521_v34 }
 0x11f   :  { %841 = vpow2.f32 %v523_v37 }
 0x120   :  { %v824_v32 = vpop.eup %823  ;;  %843 = vpow2.f32 %v525_v40 }
 0x121   :  { %v826_v33 = vpop.eup %825  ;;  %845 = vpow2.f32 %v527_v43 }
 0x122   :  { %v537_v35 = vadd.f32 %v826_v33, %v824_v32  ;;  %v828_v36 = vpop.eup %827  ;;  %847 = vpow2.f32 %v529_v46 }
 0x123   :  { %v830_v39 = vpop.eup %829  ;;  %849 = vpow2.f32 %v531_v49 }
 0x124   :  { %v538_v38 = vadd.f32 %v828_v36, %v537_v35  ;;  %v832_v42 = vpop.eup %831  ;;  %851 = vpow2.f32 %v533_v52 }
 0x125   :  { %v834_v45 = vpop.eup %833  ;;  %853 = vpow2.f32 %v535_v55 }
 0x126   :  { %v539_v41 = vadd.f32 %v830_v39, %v538_v38  ;;  %v836_v48 = vpop.eup %835 }
 0x127   :  { %v838_v51 = vpop.eup %837 }
 0x128   :  { %v540_v44 = vadd.f32 %v832_v42, %v539_v41  ;;  %v840_v54 = vpop.eup %839 }
 0x129   :  { %v842_v57 = vpop.eup %841 }
 0x12a   :  { %v541_v47 = vadd.f32 %v834_v45, %v540_v44  ;;  %v844_v59 = vpop.eup %843 }
 0x12b   :  { %v846_v61 = vpop.eup %845 }
 0x12c   :  { %v542_v50 = vadd.f32 %v836_v48, %v541_v47  ;;  %v848_v63 = vpop.eup %847 }
 0x12d   :  { %v850_v1 = vpop.eup %849 }
 0x12e   :  { %v543_v53 = vadd.f32 %v838_v51, %v542_v50  ;;  %v852_v3 = vpop.eup %851 }
 0x12f   :  { %v854_v6 = vpop.eup %853 }
 0x130   :  { %v544_v56 = vadd.f32 %v840_v54, %v543_v53 }
 0x132   :  { %v545_v58 = vadd.f32 %v842_v57, %v544_v56 }
 0x134   :  { %v546_v60 = vadd.f32 %v844_v59, %v545_v58 }
 0x136   :  { %v547_v62 = vadd.f32 %v846_v61, %v546_v60 }
 0x138   :  { %v548_v0 = vadd.f32 %v848_v63, %v547_v62 }
 0x13a   :  { %v549_v2 = vadd.f32 %v850_v1, %v548_v0 }
 0x13c   :  { %v550_v4 = vadd.f32 %v852_v3, %v549_v2 }
 0x13e   :  { %v551_v7 = vadd.f32 %v854_v6, %v550_v4 }
 0x140   :  { %855 = vlog2.f32 %v551_v7 }
 0x14a   :  { %v856_v8 = vpop.eup %855 }
 0x14b   :  { %v553_v25 = vmul.f32 0.6931472, %v856_v8 }
 0x14d   :  { %v554_v24 = vsub.f32 %v1059_v9, %v553_v25  ;;  %v555_v26 = vsub.f32 %v1061_v10, %v553_v25  ;;  %v556_v27 = vsub.f32 %v1063_v13, %v553_v25  ;;  %v557_v28 = vsub.f32 %v1065_v16, %v553_v25 }
 0x14e   :  { %v558_v29 = vsub.f32 %v1067_v17, %v553_v25  ;;  %v559_v30 = vsub.f32 %v1070_v18, %v553_v25  ;;  %v560_v31 = vsub.f32 %v1072_v19, %v553_v25  ;;  %v561_v32 = vsub.f32 %v1074_v5, %v553_v25 }
 0x14f   :  { %v562_v33 = vsub.f32 %v1076_v20, %v553_v25  ;;  %v563_v34 = vsub.f32 %v1078_v21, %v553_v25  ;;  %v564_v9 = vsub.f32 %v1080_v14, %v553_v25  ;;  %v565_v10 = vsub.f32 %v1082_v11, %v553_v25  ;;  %570 = vst [vmem:[%s1175_s3] sm:$0xff] %v554_v24 }
 0x150   :  { %571 = vst [vmem:[%s1175_s3 + $0x8] sm:$0xff] %v555_v26  ;;  %572 = vst [vmem:[%s1175_s3 + $0x10] sm:$0xff] %v556_v27  ;;  %v566_v13 = vsub.f32 %v1084_v22, %v553_v25  ;;  %v567_v16 = vsub.f32 %v1086_v23, %v553_v25  ;;  %v568_v17 = vsub.f32 %v1088_v15, %v553_v25 }
 0x151   :  { %573 = vst [vmem:[%s1175_s3 + $0x18] sm:$0xff] %v557_v28  ;;  %v569_v18 = vsub.f32 %v1090_v12, %v553_v25  ;;  %574 = vst [vmem:[%s1175_s3 + $0x20] sm:$0xff] %v558_v29 }
 0x152   :  { %575 = vst [vmem:[%s1175_s3 + $0x28] sm:$0xff] %v559_v30  ;;  %576 = vst [vmem:[%s1175_s3 + $0x30] sm:$0xff] %v560_v31 }
 0x153   :  { %577 = vst [vmem:[%s1175_s3 + $0x38] sm:$0xff] %v561_v32  ;;  %578 = vst [vmem:[%s1175_s3 + $0x40] sm:$0xff] %v562_v33 }
 0x154   :  { %579 = vst [vmem:[%s1175_s3 + $0x48] sm:$0xff] %v563_v34  ;;  %580 = vst [vmem:[%s1175_s3 + $0x50] sm:$0xff] %v564_v9 }
 0x155   :  { %581 = vst [vmem:[%s1175_s3 + $0x58] sm:$0xff] %v565_v10  ;;  %582 = vst [vmem:[%s1175_s3 + $0x60] sm:$0xff] %v566_v13 }
 0x156   :  { %583 = vst [vmem:[%s1175_s3 + $0x68] sm:$0xff] %v567_v16  ;;  %584 = vst [vmem:[%s1175_s3 + $0x70] sm:$0xff] %v568_v17 }
 0x157   :  { %585 = vst [vmem:[%s1175_s3 + $0x78] sm:$0xff] %v569_v18 }

// kernel: _lambda_.9
= control target key start
LH: loop header
LB: loop body
LE: loop exit
PB: predicated region body
PF: predicated region fallthrough
CT: control target
= control target key end

     0   :  { %s1373_s12 = smov 0   ;;  %s1375_s13 = smov 0   ;;  %s1891_s0 = inlined_call_operand.vmem [shape: f32[2,128,64], index: 0, kind: input, shape index: {}]   ;;  %s1892_s1 = inlined_call_operand.vmem [shape: f32[2,2,64,192], index: 1, kind: input, shape index: {}]   ;;  %s1893_s2 = inlined_call_operand.vmem [shape: f32[2,1,192], index: 2, kind: input, shape index: {}]   ;;  %s1894_s3 = inlined_call_operand.vmem [shape: f32[2,128,192], index: 3, kind: output, shape index: {}]  }
   0x1   :  { %s1377_s14 = smov 0  }
   0x2 LB: > { %s1083_s15 = sadd.s32 4294967295, %s1350_s14   ;;  %s1390_s16 = sadd.s32 1, %s1350_s14   ;;  %s1350_s14 = sphi %s1377_s14, %s1898_s14   ;;  %s1346_s13 = sphi %s1375_s13, %s1897_s13   ;;  %s1342_s12 = sphi %s1373_s12, %s1896_s12  }
   0x3   : > { %s17_s17 = ssub.s32 %s1350_s14, %s1390_s16  ;;  %s20_s18 = sadd.s32 1, %s1346_s13 }
   0x4   : > { %p18_p0 = scmp.eq.s32.totalorder %s17_s17, 0  ;;  %p27_p1 = scmp.ne.s32.totalorder %s1346_s13, %s1342_s12 }
   0x5   : > { %p28_p2 = scmp.eq.s32.totalorder %s1350_s14, 0  ;;  %p99_p3 = scmp.eq.s32.totalorder %s1083_s15, 1 }
   0x6   : > { %s1401_s19 = scalar_select %p18_p0, %s1346_s13, %s20_s18  }
   0x7   : > { %p29_p4 = por %p28_p2, %p27_p1  ;;  %p1403_p5 = por %p99_p3, %p27_p1 }
   0x8   : > { %p1086_p6 = scmp.ge.s32.totalorder %s1350_s14, 2 }
   0xa   : > { %127 = sbr.rel (%p1086_p6) target bundleno = 29 (0x1d), region = 24 }
  0x11   : > { %130 = sbr.rel (!%p29_p4) target bundleno = 29 (0x1d), region = 28  ;;  %s132_s21 = sand.u32 (%p29_p4), 1, %s1346_s13  }
  0x12   : > { %s1204_s22 = sshll.u32 (%p29_p4), %s1350_s14, 6  ;;  %s1087_s23 = sshll.u32 (%p29_p4), %s132_s21, 7 }
  0x13   : > { %s1413_s26 = scalar_lea.vmem (%p29_p4), %s1891_s0, %s1204_s22  ;;  %s134_s27 = scalar_lea.vmem (%p29_p4), [#allocation2], %s1087_s23 }
  0x14   : > { %v195_v0 = vld [vmem:[%s1413_s26] sm:$0xff] (%p29_p4)  ;;  %v197_v1 = vld [vmem:[%s1413_s26 + $0x8] sm:$0xff] (%p29_p4)  ;;  %v199_v2 = vld [vmem:[%s1413_s26 + $0x10] sm:$0xff] (%p29_p4) }
  0x15   : > { %196 = vst [vmem:[%s134_s27] sm:$0xff] (%p29_p4), %v195_v0  ;;  %198 = vst [vmem:[%s134_s27 + $0x8] sm:$0xff] (%p29_p4), %v197_v1  ;;  %v201_v3 = vld [vmem:[%s1413_s26 + $0x18] sm:$0xff] (%p29_p4)  ;;  %v203_v4 = vld [vmem:[%s1413_s26 + $0x20] sm:$0xff] (%p29_p4) }
  0x16   : > { %200 = vst [vmem:[%s134_s27 + $0x10] sm:$0xff] (%p29_p4), %v199_v2  ;;  %v205_v5 = vld [vmem:[%s1413_s26 + $0x28] sm:$0xff] (%p29_p4)  ;;  %202 = vst [vmem:[%s134_s27 + $0x18] sm:$0xff] (%p29_p4), %v201_v3  ;;  %v207_v6 = vld [vmem:[%s1413_s26 + $0x30] sm:$0xff] (%p29_p4) }
  0x17   : > { %204 = vst [vmem:[%s134_s27 + $0x20] sm:$0xff] (%p29_p4), %v203_v4  ;;  %206 = vst [vmem:[%s134_s27 + $0x28] sm:$0xff] (%p29_p4), %v205_v5  ;;  %v209_v7 = vld [vmem:[%s1413_s26 + $0x38] sm:$0xff] (%p29_p4)  ;;  %v211_v8 = vld [vmem:[%s1413_s26 + $0x80] sm:$0xff] (%p29_p4) }
  0x18   : > { %208 = vst [vmem:[%s134_s27 + $0x30] sm:$0xff] %v207_v6  ;;  %210 = vst [vmem:[%s134_s27 + $0x38] sm:$0xff] %v209_v7  ;;  %v213_v9 = vld [vmem:[%s1413_s26 + $0x88] sm:$0xff]  ;;  %v215_v10 = vld [vmem:[%s1413_s26 + $0x90] sm:$0xff] }
  0x19   : > { %212 = vst [vmem:[%s134_s27 + $0x40] sm:$0xff] %v211_v8  ;;  %v217_v11 = vld [vmem:[%s1413_s26 + $0x98] sm:$0xff]  ;;  %214 = vst [vmem:[%s134_s27 + $0x48] sm:$0xff] %v213_v9  ;;  %v219_v12 = vld [vmem:[%s1413_s26 + $0xa0] sm:$0xff] }
  0x1a   : > { %216 = vst [vmem:[%s134_s27 + $0x50] sm:$0xff] %v215_v10  ;;  %218 = vst [vmem:[%s134_s27 + $0x58] sm:$0xff] %v217_v11  ;;  %v221_v13 = vld [vmem:[%s1413_s26 + $0xa8] sm:$0xff]  ;;  %v223_v14 = vld [vmem:[%s1413_s26 + $0xb0] sm:$0xff] }
  0x1b   : > { %220 = vst [vmem:[%s134_s27 + $0x60] sm:$0xff] %v219_v12  ;;  %222 = vst [vmem:[%s134_s27 + $0x68] sm:$0xff] %v221_v13  ;;  %v225_v15 = vld [vmem:[%s1413_s26 + $0xb8] sm:$0xff] }
  0x1c   : > { %224 = vst [vmem:[%s134_s27 + $0x70] sm:$0xff] %v223_v14  ;;  %226 = vst [vmem:[%s134_s27 + $0x78] sm:$0xff] %v225_v15 }
  0x1d PF: > { %p1090_p7 = scmp.ge.s32.totalorder %s1350_s14, 1  ;;  %p231_p8 = scmp.lt.s32.totalorder %s1350_s14, 3 }
  0x1f   : > { %p232_p9 = pnand %p1090_p7, %p231_p8 }
  0x20   : > { %v1102_v16 = vld [vmem:[%s1892_s1 + $0x88] sm:$0xff] (!%p232_p9)  ;;  %v1104_v17 = vld [vmem:[%s1892_s1 + $0x98] sm:$0xff] (!%p232_p9)  ;;  %v1101_v21 = vld [vmem:[%s1892_s1 + $0x80] sm:$0xff] (!%p232_p9)  ;;  %v1352_v23 = vmov (!%p232_p9), 0.0   ;;  %s238_s9 = sand.u32 (!%p232_p9), 1, %s1342_s12   ;;  %vm312_vm0 = vcmask (!%p232_p9), 523264  }
  0x21   : > { %235 = sbr.rel (%p232_p9) target bundleno = 336 (0x150), region = 66  ;;  %v1150_v18 = vld [vmem:[%s1892_s1 + $0x188] sm:$0xff] (!%p232_p9)  ;;  %v1207_v19 = vpack.c.bf16 (!%p232_p9), %v1104_v17, %v1102_v16  ;;  %v1152_v20 = vld [vmem:[%s1892_s1 + $0x198] sm:$0xff] (!%p232_p9)  ;;  %v1103_v22 = vld [vmem:[%s1892_s1 + $0x90] sm:$0xff] (!%p232_p9)  ;;  %401 = vmatprep.mubr.f32.mxu0 (!%p232_p9), %v1352_v23  ;;  %729 = vmatprep.mubr.f32.mxu1 (!%p232_p9), %v1352_v23  ;;  %s1091_s6 = sshll.u32 (!%p232_p9), %s238_s9, 7 }
  0x22   : > { %v1239_v24 = vpack.c.bf16 (!%p232_p9), %v1152_v20, %v1150_v18  ;;  %v1209_v25 = vpack.c.bf16 (!%p232_p9), %v1103_v22, %v1101_v21  ;;  %v1149_v26 = vld [vmem:[%s1892_s1 + $0x180] sm:$0xff] (!%p232_p9)  ;;  %v1151_v27 = vld [vmem:[%s1892_s1 + $0x190] sm:$0xff] (!%p232_p9)  ;;  %v1106_v28 = vld [vmem:[%s1892_s1 + $0xa8] sm:$0xff] (!%p232_p9)  ;;  %s1564_s10 = scalar_lea.vmem (!%p232_p9), [#allocation2], %s1091_s6 }
  0x23   : > { %1208 = vmatprep.subr.bf16.mxu0 (!%p232_p9), %v1207_v19  ;;  %v1241_v29 = vpack.c.bf16 (!%p232_p9), %v1151_v27, %v1149_v26  ;;  %v1108_v30 = vld [vmem:[%s1892_s1 + $0xb8] sm:$0xff] (!%p232_p9)  ;;  %v1154_v31 = vld [vmem:[%s1892_s1 + $0x1a8] sm:$0xff] (!%p232_p9)  ;;  %v1105_v35 = vld [vmem:[%s1892_s1 + $0xa0] sm:$0xff] (!%p232_p9) }
  0x24   : > { %v1156_v32 = vld [vmem:[%s1892_s1 + $0x1b8] sm:$0xff] (!%p232_p9)  ;;  %1240 = vmatprep.subr.bf16.mxu1 (!%p232_p9), %v1239_v24  ;;  %1210 = vmatpush1.bf16.msra.mxu0 (!%p232_p9), %v1209_v25  ;;  %v1211_v33 = vpack.c.bf16 (!%p232_p9), %v1108_v30, %v1106_v28  ;;  %v1107_v36 = vld [vmem:[%s1892_s1 + $0xb0] sm:$0xff] (!%p232_p9)  ;;  %v1153_v37 = vld [vmem:[%s1892_s1 + $0x1a0] sm:$0xff] (!%p232_p9) }
  0x25   : > { %v1243_v34 = vpack.c.bf16 (!%p232_p9), %v1156_v32, %v1154_v31  ;;  %1242 = vmatpush1.bf16.msra.mxu1 (!%p232_p9), %v1241_v29  ;;  %v1213_v38 = vpack.c.bf16 (!%p232_p9), %v1107_v36, %v1105_v35  ;;  %v1155_v39 = vld [vmem:[%s1892_s1 + $0x1b0] sm:$0xff] (!%p232_p9)  ;;  %v1110_v40 = vld [vmem:[%s1892_s1 + $0xc8] sm:$0xff] (!%p232_p9)  ;;  %v1112_v41 = vld [vmem:[%s1892_s1 + $0xd8] sm:$0xff] (!%p232_p9) }
  0x26   : > { %1212 = vmatprep.subr.bf16.mxu0 (!%p232_p9), %v1211_v33  ;;  %v1245_v42 = vpack.c.bf16 (!%p232_p9), %v1155_v39, %v1153_v37  ;;  %v1215_v43 = vpack.c.bf16 (!%p232_p9), %v1112_v41, %v1110_v40  ;;  %v1158_v44 = vld [vmem:[%s1892_s1 + $0x1c8] sm:$0xff] (!%p232_p9)  ;;  %v1160_v45 = vld [vmem:[%s1892_s1 + $0x1d8] sm:$0xff] (!%p232_p9)  ;;  %v1109_v46 = vld [vmem:[%s1892_s1 + $0xc0] sm:$0xff] (!%p232_p9) }
  0x27   : > { %1244 = vmatprep.subr.bf16.mxu1 (!%p232_p9), %v1243_v34  ;;  %v1247_v47 = vpack.c.bf16 (!%p232_p9), %v1160_v45, %v1158_v44  ;;  %v1111_v48 = vld [vmem:[%s1892_s1 + $0xd0] sm:$0xff] (!%p232_p9)  ;;  %v1157_v49 = vld [vmem:[%s1892_s1 + $0x1c0] sm:$0xff] (!%p232_p9)  ;;  %v1114_v52 = vld [vmem:[%s1892_s1 + $0xe8] sm:$0xff] (!%p232_p9) }
  0x28   : > { %v1159_v50 = vld [vmem:[%s1892_s1 + $0x1d0] sm:$0xff]  ;;  %1214 = vmatpush1.bf16.msra.mxu0 %v1213_v38  ;;  %v1217_v51 = vpack.c.bf16 %v1111_v48, %v1109_v46  ;;  %v1116_v53 = vld [vmem:[%s1892_s1 + $0xf8] sm:$0xff]  ;;  %v1162_v54 = vld [vmem:[%s1892_s1 + $0x1e8] sm:$0xff] }
  0x29   : > { %1246 = vmatpush1.bf16.msra.mxu1 %v1245_v42  ;;  %1216 = vmatprep.subr.bf16.mxu0 %v1215_v43  ;;  %v1249_v55 = vpack.c.bf16 %v1159_v50, %v1157_v49  ;;  %v1219_v56 = vpack.c.bf16 %v1116_v53, %v1114_v52  ;;  %v1164_v57 = vld [vmem:[%s1892_s1 + $0x1f8] sm:$0xff]  ;;  %v1113_v58 = vld [vmem:[%s1892_s1 + $0xe0] sm:$0xff]  ;;  %v1115_v59 = vld [vmem:[%s1892_s1 + $0xf0] sm:$0xff] }
  0x2a   : > { %1248 = vmatprep.subr.bf16.mxu1 %v1247_v47  ;;  %v1251_v60 = vpack.c.bf16 %v1164_v57, %v1162_v54  ;;  %v1161_v61 = vld [vmem:[%s1892_s1 + $0x1e0] sm:$0xff]  ;;  %v1163_v62 = vld [vmem:[%s1892_s1 + $0x1f0] sm:$0xff]  ;;  %v280_v63 = vld [vmem:[%s1892_s1 + $0x8] sm:$0xff]  ;;  %v1221_v2 = vpack.c.bf16 %v1115_v59, %v1113_v58 }
  0x2b   : > { %v282_v0 = vld [vmem:[%s1892_s1 + $0x18] sm:$0xff]  ;;  %v1134_v1 = vld [vmem:[%s1892_s1 + $0x108] sm:$0xff]  ;;  %v1253_v4 = vpack.c.bf16 %v1163_v62, %v1161_v61  ;;  %v279_v6 = vld [vmem:[%s1892_s1] sm:$0xff] }
  0x2c   : > { %1218 = vmatpush1.bf16.msra.mxu0 %v1217_v51  ;;  %v1136_v3 = vld [vmem:[%s1892_s1 + $0x118] sm:$0xff]  ;;  %v1223_v5 = vpack.c.bf16 %v282_v0, %v280_v63  ;;  %v281_v7 = vld [vmem:[%s1892_s1 + $0x10] sm:$0xff]  ;;  %v1133_v9 = vld [vmem:[%s1892_s1 + $0x100] sm:$0xff] }
  0x2d   : > { %1250 = vmatpush1.bf16.msra.mxu1 %v1249_v55  ;;  %1220 = vmatprep.subr.bf16.mxu0 %v1219_v56  ;;  %v1255_v8 = vpack.c.bf16 %v1136_v3, %v1134_v1  ;;  %v1135_v10 = vld [vmem:[%s1892_s1 + $0x110] sm:$0xff]  ;;  %v284_v11 = vld [vmem:[%s1892_s1 + $0x28] sm:$0xff]  ;;  %v286_v12 = vld [vmem:[%s1892_s1 + $0x38] sm:$0xff]  ;;  %v1225_v14 = vpack.c.bf16 %v281_v7, %v279_v6 }
  0x2e   : > { %1252 = vmatprep.subr.bf16.mxu1 %v1251_v60  ;;  %v1093_v13 = vld [vmem:[%s1564_s10 + $0x40] sm:$0xff]  ;;  %v1138_v15 = vld [vmem:[%s1892_s1 + $0x128] sm:$0xff]  ;;  %v1140_v16 = vld [vmem:[%s1892_s1 + $0x138] sm:$0xff]  ;;  %v1257_v17 = vpack.c.bf16 %v1135_v10, %v1133_v9  ;;  %v1227_v18 = vpack.c.bf16 %v286_v12, %v284_v11 }
  0x2f   : > { %v283_v19 = vld [vmem:[%s1892_s1 + $0x20] sm:$0xff]  ;;  %v285_v20 = vld [vmem:[%s1892_s1 + $0x30] sm:$0xff]  ;;  %v1259_v22 = vpack.c.bf16 %v1140_v16, %v1138_v15  ;;  %v288_v25 = vld [vmem:[%s1892_s1 + $0x48] sm:$0xff] }
  0x30   : > { %1222 = vmatpush1.bf16.msra.mxu0 %v1221_v2  ;;  %v1137_v21 = vld [vmem:[%s1892_s1 + $0x120] sm:$0xff]  ;;  %v1139_v24 = vld [vmem:[%s1892_s1 + $0x130] sm:$0xff]  ;;  %v290_v26 = vld [vmem:[%s1892_s1 + $0x58] sm:$0xff]  ;;  %v1229_v30 = vpack.c.bf16 %v285_v20, %v283_v19  ;;  %v589_v2 = vlaneseq }
  0x31   : > { %1254 = vmatpush1.bf16.msra.mxu1 %v1253_v4  ;;  %1224 = vmatprep.subr.bf16.mxu0 %v1223_v5  ;;  %v1094_v27 = vld [vmem:[%s1564_s10 + $0x48] sm:$0xff]  ;;  %v1144_v29 = vld [vmem:[%s1892_s1 + $0x158] sm:$0xff]  ;;  %v1261_v31 = vpack.c.bf16 %v1139_v24, %v1137_v21  ;;  %v1231_v32 = vpack.c.bf16 %v290_v26, %v288_v25  ;;  %v287_v33 = vld [vmem:[%s1892_s1 + $0x40] sm:$0xff] }
  0x32   : > { %1256 = vmatprep.subr.bf16.mxu1 %v1255_v8  ;;  %v1142_v28 = vld [vmem:[%s1892_s1 + $0x148] sm:$0xff]  ;;  %v289_v34 = vld [vmem:[%s1892_s1 + $0x50] sm:$0xff]  ;;  %v1141_v35 = vld [vmem:[%s1892_s1 + $0x140] sm:$0xff]  ;;  %v590_v3 = vshrl.u32 %v589_v2, 7 }
  0x33   : > { %1117 = vmatmul.mubr.msk.f32.vlgmr.msra.gmra.mrb[0].mxu0 %vm312_vm0, %v1093_v13  ;;  %v1263_v36 = vpack.c.bf16 %v1144_v29, %v1142_v28  ;;  %v1143_v37 = vld [vmem:[%s1892_s1 + $0x150] sm:$0xff]  ;;  %v292_v38 = vld [vmem:[%s1892_s1 + $0x68] sm:$0xff]  ;;  %v294_v39 = vld [vmem:[%s1892_s1 + $0x78] sm:$0xff]  ;;  %v1233_v43 = vpack.c.bf16 %v289_v34, %v287_v33 }
  0x34   : > { %1165 = vmatmul.mubr.msk.f32.vlgmr.msra.gmra.mrb[0].mxu1 %vm312_vm0, %v1093_v13  ;;  %1226 = vmatpush1.bf16.msra.mxu0 %v1225_v14  ;;  %v1095_v40 = vld [vmem:[%s1564_s10 + $0x50] sm:$0xff]  ;;  %v1146_v41 = vld [vmem:[%s1892_s1 + $0x168] sm:$0xff]  ;;  %v1148_v42 = vld [vmem:[%s1892_s1 + $0x178] sm:$0xff]  ;;  %v1265_v44 = vpack.c.bf16 %v1143_v37, %v1141_v35  ;;  %v1235_v45 = vpack.c.bf16 %v294_v39, %v292_v38  ;;  %v591_v4 = vsub.s32 0, %v590_v3  ;;  %v595_v6 = vsub.s32 1, %v590_v3 }
  0x35   : > { %1258 = vmatpush1.bf16.msra.mxu1 %v1257_v17  ;;  %407 = vmatprep.mubr.f32.mxu0 %v1352_v23  ;;  %v291_v46 = vld [vmem:[%s1892_s1 + $0x60] sm:$0xff]  ;;  %v293_v47 = vld [vmem:[%s1892_s1 + $0x70] sm:$0xff]  ;;  %v1267_v48 = vpack.c.bf16 %v1148_v42, %v1146_v41  ;;  %v1096_v51 = vld [vmem:[%s1564_s10 + $0x58] sm:$0xff] }
  0x36   : > { %735 = vmatprep.mubr.f32.mxu1 %v1352_v23  ;;  %1228 = vmatprep.subr.bf16.mxu0 %v1227_v18  ;;  %v1145_v49 = vld [vmem:[%s1892_s1 + $0x160] sm:$0xff]  ;;  %v1147_v50 = vld [vmem:[%s1892_s1 + $0x170] sm:$0xff]  ;;  %v1237_v52 = vpack.c.bf16 %v293_v47, %v291_v46  ;;  %v1098_v55 = vld [vmem:[%s1564_s10 + $0x68] sm:$0xff] }
  0x37   : > { %1118 = vmatmul.mubr.msk.f32.gmra.mrb[2].mxu0 %vm312_vm0, %v1094_v27  ;;  %1260 = vmatprep.subr.bf16.mxu1 %v1259_v22  ;;  %v1269_v53 = vpack.c.bf16 %v1147_v50, %v1145_v49  ;;  %v1097_v54 = vld [vmem:[%s1564_s10 + $0x60] sm:$0xff]  ;;  %v1099_v56 = vld [vmem:[%s1564_s10 + $0x70] sm:$0xff]  ;;  %v1100_v57 = vld [vmem:[%s1564_s10 + $0x78] sm:$0xff] }
  0x38   : > { %1166 = vmatmul.mubr.msk.f32.gmra.mrb[2].mxu1 %vm312_vm0, %v1094_v27  ;;  %413 = vmatprep.mubr.f32.mxu0 %v1352_v23  ;;  %v262_v58 = vld [vmem:[%s1564_s10] sm:$0xff]  ;;  %v263_v59 = vld [vmem:[%s1564_s10 + $0x8] sm:$0xff]  ;;  %v264_v60 = vld [vmem:[%s1564_s10 + $0x10] sm:$0xff] }
  0x39   : > { %741 = vmatprep.mubr.f32.mxu1 %v1352_v23  ;;  %1230 = vmatpush1.bf16.msra.mxu0 %v1229_v30  ;;  %v265_v61 = vld [vmem:[%s1564_s10 + $0x18] sm:$0xff]  ;;  %v266_v62 = vld [vmem:[%s1564_s10 + $0x20] sm:$0xff]  ;;  %v267_v63 = vld [vmem:[%s1564_s10 + $0x28] sm:$0xff] }
  0x3a   : > { %1262 = vmatpush1.bf16.msra.mxu1 %v1261_v31  ;;  %1232 = vmatprep.subr.bf16.mxu0 %v1231_v32  ;;  %v268_v0 = vld [vmem:[%s1564_s10 + $0x30] sm:$0xff]  ;;  %v269_v1 = vld [vmem:[%s1564_s10 + $0x38] sm:$0xff]  ;;  %v587_v5 = vld [vmem:[%s1893_s2] sm:$0x3]  ;;  %s1092_s10 = sshll.u32 %s238_s9, 8  ;;  %s1206_s9 = sshll.u32 (%p1403_p5), %s1083_s15, 7 }
  0x3b   : > { %1119 = vmatmul.mubr.msk.f32.gmra.mrb[4].mxu0 %vm312_vm0, %v1095_v40  ;;  %1264 = vmatprep.subr.bf16.mxu1 %v1263_v36  ;;  %v1181_v7 = vld [vmem:[%s1893_s2 + $0x2] sm:$0x3]  ;;  %v1718_v8 = vrot.slane %v587_v5, %v591_v4  ;;  %v1722_v9 = vrot.slane %v587_v5, %v595_v6  ;;  %s1729_s12 = scalar_lea.vmem [#allocation3], %s1092_s10  ;;  %s1818_s20 = scalar_lea.vmem (%p1403_p5), %s1894_s3, %s1206_s9 }
  0x3c   : > { %1167 = vmatmul.mubr.msk.f32.gmra.mrb[4].mxu1 %vm312_vm0, %v1095_v40  ;;  %419 = vmatprep.mubr.f32.mxu0 %v1352_v23  ;;  %v1724_v10 = vrot.slane %v1181_v7, %v595_v6 }
  0x3d   : > { %747 = vmatprep.mubr.f32.mxu1 %v1352_v23  ;;  %1234 = vmatpush1.bf16.msra.mxu0 %v1233_v43 }
  0x3e   : > { %1266 = vmatpush1.bf16.msra.mxu1 %v1265_v44  ;;  %1236 = vmatprep.subr.bf16.mxu0 %v1235_v45 }
  0x3f   : > { %1120 = vmatmul.mubr.msk.f32.gmra.mrb[6].mxu0 %vm312_vm0, %v1096_v51  ;;  %1268 = vmatprep.subr.bf16.mxu1 %v1267_v48 }
  0x40   : > { %1168 = vmatmul.mubr.msk.f32.gmra.mrb[6].mxu1 %vm312_vm0, %v1096_v51  ;;  %425 = vmatprep.mubr.f32.mxu0 %v1352_v23 }
  0x41   : > { %753 = vmatprep.mubr.f32.mxu1 %v1352_v23  ;;  %1238 = vmatpush1.bf16.msra.mxu0 %v1237_v52 }
  0x42   : > { %1270 = vmatpush1.bf16.msra.mxu1 %v1269_v53 }
  0x43   : > { %1121 = vmatmul.mubr.msk.f32.gmra.mrb[8].mxu0 %vm312_vm0, %v1097_v54 }
  0x44   : > { %1169 = vmatmul.mubr.msk.f32.gmra.mrb[8].mxu1 %vm312_vm0, %v1097_v54  ;;  %431 = vmatprep.mubr.f32.mxu0 %v1352_v23 }
  0x45   : > { %759 = vmatprep.mubr.f32.mxu1 %v1352_v23 }
  0x47   : > { %1122 = vmatmul.mubr.msk.f32.gmra.mrb[10].mxu0 %vm312_vm0, %v1098_v55 }
  0x48   : > { %1170 = vmatmul.mubr.msk.f32.gmra.mrb[10].mxu1 %vm312_vm0, %v1098_v55  ;;  %437 = vmatprep.mubr.f32.mxu0 %v1352_v23 }
  0x49   : > { %765 = vmatprep.mubr.f32.mxu1 %v1352_v23 }
  0x4b   : > { %1123 = vmatmul.mubr.msk.f32.gmra.mrb[12].mxu0 %vm312_vm0, %v1099_v56 }
  0x4c   : > { %1171 = vmatmul.mubr.msk.f32.gmra.mrb[12].mxu1 %vm312_vm0, %v1099_v56  ;;  %443 = vmatprep.mubr.f32.mxu0 %v1352_v23 }
  0x4d   : > { %771 = vmatprep.mubr.f32.mxu1 %v1352_v23 }
  0x4f   : > { %1124 = vmatmul.mubr.msk.f32.gmra.mrb[14].mxu0 %vm312_vm0, %v1100_v57 }
  0x50   : > { %1172 = vmatmul.mubr.msk.f32.gmra.mrb[14].mxu1 %vm312_vm0, %v1100_v57  ;;  %538 = vmatprep.mubr.f32.mxu0 %v1352_v23 }
  0x51   : > { %842 = vmatprep.mubr.f32.mxu1 %v1352_v23 }
  0x53   : > { %1125 = vmatmul.mubr.msk.f32.vlgmr.msra.gmra.mrb[0].mxu0 %vm312_vm0, %v262_v58 }
  0x54   : > { %1173 = vmatmul.mubr.msk.f32.vlgmr.msra.gmra.mrb[0].mxu1 %vm312_vm0, %v262_v58  ;;  %544 = vmatprep.mubr.f32.mxu0 %v1352_v23 }
  0x55   : > { %848 = vmatprep.mubr.f32.mxu1 %v1352_v23 }
  0x57   : > { %1126 = vmatmul.mubr.msk.f32.gmra.mrb[2].mxu0 %vm312_vm0, %v263_v59 }
  0x58   : > { %1174 = vmatmul.mubr.msk.f32.gmra.mrb[2].mxu1 %vm312_vm0, %v263_v59  ;;  %550 = vmatprep.mubr.f32.mxu0 %v1352_v23 }
  0x59   : > { %854 = vmatprep.mubr.f32.mxu1 %v1352_v23 }
  0x5b   : > { %1127 = vmatmul.mubr.msk.f32.gmra.mrb[4].mxu0 %vm312_vm0, %v264_v60 }
  0x5c   : > { %1175 = vmatmul.mubr.msk.f32.gmra.mrb[4].mxu1 %vm312_vm0, %v264_v60  ;;  %556 = vmatprep.mubr.f32.mxu0 %v1352_v23 }
  0x5d   : > { %860 = vmatprep.mubr.f32.mxu1 %v1352_v23 }
  0x5f   : > { %1128 = vmatmul.mubr.msk.f32.gmra.mrb[6].mxu0 %vm312_vm0, %v265_v61 }
  0x60   : > { %1176 = vmatmul.mubr.msk.f32.gmra.mrb[6].mxu1 %vm312_vm0, %v265_v61  ;;  %562 = vmatprep.mubr.f32.mxu0 %v1352_v23 }
  0x61   : > { %866 = vmatprep.mubr.f32.mxu1 %v1352_v23 }
  0x63   : > { %1129 = vmatmul.mubr.msk.f32.gmra.mrb[8].mxu0 %vm312_vm0, %v266_v62 }
  0x64   : > { %1177 = vmatmul.mubr.msk.f32.gmra.mrb[8].mxu1 %vm312_vm0, %v266_v62  ;;  %568 = vmatprep.mubr.f32.mxu0 %v1352_v23 }
  0x65   : > { %872 = vmatprep.mubr.f32.mxu1 %v1352_v23 }
  0x67   : > { %1130 = vmatmul.mubr.msk.f32.gmra.mrb[10].mxu0 %vm312_vm0, %v267_v63 }
  0x68   : > { %1178 = vmatmul.mubr.msk.f32.gmra.mrb[10].mxu1 %vm312_vm0, %v267_v63  ;;  %574 = vmatprep.mubr.f32.mxu0 %v1352_v23 }
  0x69   : > { %878 = vmatprep.mubr.f32.mxu1 %v1352_v23 }
  0x6b   : > { %1131 = vmatmul.mubr.msk.f32.gmra.mrb[12].mxu0 %vm312_vm0, %v268_v0 }
  0x6c   : > { %1179 = vmatmul.mubr.msk.f32.gmra.mrb[12].mxu1 %vm312_vm0, %v268_v0  ;;  %580 = vmatprep.mubr.f32.mxu0 %v1352_v23 }
  0x6d   : > { %884 = vmatprep.mubr.f32.mxu1 %v1352_v23  ;;  %v1720_v23 = vrot.slane %v1181_v7, %v591_v4 }
  0x6f   : > { %1132 = vmatmul.mubr.msk.f32.gmra.mrb[14].mxu0 %vm312_vm0, %v269_v1 }
  0x70   : > { %1180 = vmatmul.mubr.msk.f32.gmra.mrb[14].mxu1 %vm312_vm0, %v269_v1 }
 0x126   : > { %v540_v11 = vpop.f32.mrb[0].mxu0 }
 0x127   : > { %v599_v12 = vadd.f32 %v1718_v8, %v540_v11  ;;  %v844_v13 = vpop.f32.mrb[0].mxu1  ;;  %v542_v14 = vpop.f32.mrb[1].mxu0 }
 0x128   : > { %v904_v15 = vadd.f32 %v1720_v23, %v844_v13  ;;  %v600_v16 = vadd.f32 %v1722_v9, %v542_v14  ;;  %v846_v17 = vpop.f32.mrb[1].mxu1 }
 0x129   : > { %615 = vst [vmem:[%s1729_s12] sm:$0xff] %v599_v12  ;;  %v905_v18 = vadd.f32 %v1724_v10, %v846_v17 }
 0x12a   : > { %1182 = vst [vmem:[%s1729_s12 + $0x80] sm:$0xff] %v904_v15  ;;  %616 = vst.msk [vmem:[%s1729_s12 + $0x8] sm:$0xff] %vm312_vm0, %v600_v16  ;;  %v546_v19 = vpop.f32.mrb[2].mxu0 }
 0x12b   : > { %1183 = vst.msk [vmem:[%s1729_s12 + $0x88] sm:$0xff] %vm312_vm0, %v905_v18  ;;  %v601_v20 = vadd.f32 %v1718_v8, %v546_v19  ;;  %v850_v21 = vpop.f32.mrb[2].mxu1  ;;  %v548_v22 = vpop.f32.mrb[3].mxu0 }
 0x12c   : > { %v906_v24 = vadd.f32 %v1720_v23, %v850_v21  ;;  %v602_v25 = vadd.f32 %v1722_v9, %v548_v22  ;;  %v852_v26 = vpop.f32.mrb[3].mxu1 }
 0x12d   : > { %617 = vst [vmem:[%s1729_s12 + $0x10] sm:$0xff] %v601_v20  ;;  %v907_v27 = vadd.f32 %v1724_v10, %v852_v26 }
 0x12e   : > { %1184 = vst [vmem:[%s1729_s12 + $0x90] sm:$0xff] %v906_v24  ;;  %618 = vst.msk [vmem:[%s1729_s12 + $0x18] sm:$0xff] %vm312_vm0, %v602_v25  ;;  %v552_v28 = vpop.f32.mrb[4].mxu0 }
 0x12f   : > { %1185 = vst.msk [vmem:[%s1729_s12 + $0x98] sm:$0xff] %vm312_vm0, %v907_v27  ;;  %v603_v29 = vadd.f32 %v1718_v8, %v552_v28  ;;  %v856_v30 = vpop.f32.mrb[4].mxu1  ;;  %v554_v31 = vpop.f32.mrb[5].mxu0 }
 0x130   : > { %v908_v32 = vadd.f32 %v1720_v23, %v856_v30  ;;  %v604_v33 = vadd.f32 %v1722_v9, %v554_v31  ;;  %v858_v34 = vpop.f32.mrb[5].mxu1 }
 0x131   : > { %619 = vst [vmem:[%s1729_s12 + $0x20] sm:$0xff] %v603_v29  ;;  %v909_v35 = vadd.f32 %v1724_v10, %v858_v34  ;;  %v992_v28 = vld [vmem:[%s1729_s12 + $0x80] sm:$0xff] (%p1403_p5) }
 0x132   : > { %1186 = vst [vmem:[%s1729_s12 + $0xa0] sm:$0xff] %v908_v32  ;;  %620 = vst.msk [vmem:[%s1729_s12 + $0x28] sm:$0xff] %vm312_vm0, %v604_v33  ;;  %v558_v36 = vpop.f32.mrb[6].mxu0  ;;  %v994_v29 = vld [vmem:[%s1729_s12 + $0x88] sm:$0xff] (%p1403_p5) }
 0x133   : > { %1187 = vst.msk [vmem:[%s1729_s12 + $0xa8] sm:$0xff] %vm312_vm0, %v909_v35  ;;  %v605_v37 = vadd.f32 %v1718_v8, %v558_v36  ;;  %v862_v38 = vpop.f32.mrb[6].mxu1  ;;  %v560_v39 = vpop.f32.mrb[7].mxu0  ;;  %993 = vst [vmem:[%s1818_s20 + $0x100] sm:$0xff] (%p1403_p5), %v992_v28 }
 0x134   : > { %v910_v40 = vadd.f32 %v1720_v23, %v862_v38  ;;  %v606_v41 = vadd.f32 %v1722_v9, %v560_v39  ;;  %v864_v42 = vpop.f32.mrb[7].mxu1  ;;  %995 = vst [vmem:[%s1818_s20 + $0x108] sm:$0xff] (%p1403_p5), %v994_v29 }
 0x135   : > { %621 = vst [vmem:[%s1729_s12 + $0x30] sm:$0xff] %v605_v37  ;;  %v911_v43 = vadd.f32 %v1724_v10, %v864_v42  ;;  %v996_v30 = vld [vmem:[%s1729_s12 + $0x90] sm:$0xff] (%p1403_p5) }
 0x136   : > { %1188 = vst [vmem:[%s1729_s12 + $0xb0] sm:$0xff] %v910_v40  ;;  %622 = vst.msk [vmem:[%s1729_s12 + $0x38] sm:$0xff] %vm312_vm0, %v606_v41  ;;  %v564_v44 = vpop.f32.mrb[8].mxu0  ;;  %v998_v31 = vld [vmem:[%s1729_s12 + $0x98] sm:$0xff] (%p1403_p5) }
 0x137   : > { %1189 = vst.msk [vmem:[%s1729_s12 + $0xb8] sm:$0xff] %vm312_vm0, %v911_v43  ;;  %v607_v45 = vadd.f32 %v1718_v8, %v564_v44  ;;  %v868_v46 = vpop.f32.mrb[8].mxu1  ;;  %v566_v47 = vpop.f32.mrb[9].mxu0  ;;  %997 = vst [vmem:[%s1818_s20 + $0x110] sm:$0xff] (%p1403_p5), %v996_v30 }
 0x138   : > { %v912_v48 = vadd.f32 %v1720_v23, %v868_v46  ;;  %v608_v49 = vadd.f32 %v1722_v9, %v566_v47  ;;  %v870_v50 = vpop.f32.mrb[9].mxu1  ;;  %v968_v15 = vld [vmem:[%s1729_s12 + $0x20] sm:$0xff] (%p1403_p5)  ;;  %999 = vst [vmem:[%s1818_s20 + $0x118] sm:$0xff] (%p1403_p5), %v998_v31 }
 0x139   : > { %623 = vst [vmem:[%s1729_s12 + $0x40] sm:$0xff] %v607_v45  ;;  %v913_v51 = vadd.f32 %v1724_v10, %v870_v50  ;;  %v970_v16 = vld [vmem:[%s1729_s12 + $0x28] sm:$0xff] (%p1403_p5)  ;;  %969 = vst [vmem:[%s1818_s20 + $0x20] sm:$0xff] (%p1403_p5), %v968_v15  ;;  %v1000_v32 = vld [vmem:[%s1729_s12 + $0xa0] sm:$0xff] (%p1403_p5) }
 0x13a   : > { %1190 = vst [vmem:[%s1729_s12 + $0xc0] sm:$0xff] %v912_v48  ;;  %624 = vst.msk [vmem:[%s1729_s12 + $0x48] sm:$0xff] %vm312_vm0, %v608_v49  ;;  %v570_v52 = vpop.f32.mrb[10].mxu0  ;;  %v1002_v33 = vld [vmem:[%s1729_s12 + $0xa8] sm:$0xff] (%p1403_p5) }
 0x13b   : > { %1191 = vst.msk [vmem:[%s1729_s12 + $0xc8] sm:$0xff] %vm312_vm0, %v913_v51  ;;  %v609_v53 = vadd.f32 %v1718_v8, %v570_v52  ;;  %v874_v54 = vpop.f32.mrb[10].mxu1  ;;  %v572_v55 = vpop.f32.mrb[11].mxu0  ;;  %971 = vst [vmem:[%s1818_s20 + $0x28] sm:$0xff] (%p1403_p5), %v970_v16 }
 0x13c   : > { %v914_v56 = vadd.f32 %v1720_v23, %v874_v54  ;;  %v610_v57 = vadd.f32 %v1722_v9, %v572_v55  ;;  %v876_v58 = vpop.f32.mrb[11].mxu1  ;;  %v972_v17 = vld [vmem:[%s1729_s12 + $0x30] sm:$0xff] (%p1403_p5)  ;;  %1001 = vst [vmem:[%s1818_s20 + $0x120] sm:$0xff] (%p1403_p5), %v1000_v32  ;;  %1003 = vst [vmem:[%s1818_s20 + $0x128] sm:$0xff] (%p1403_p5), %v1002_v33 }
 0x13d   : > { %625 = vst [vmem:[%s1729_s12 + $0x50] sm:$0xff] %v609_v53  ;;  %v915_v59 = vadd.f32 %v1724_v10, %v876_v58  ;;  %v974_v18 = vld [vmem:[%s1729_s12 + $0x38] sm:$0xff] (%p1403_p5)  ;;  %973 = vst [vmem:[%s1818_s20 + $0x30] sm:$0xff] (%p1403_p5), %v972_v17  ;;  %v1004_v34 = vld [vmem:[%s1729_s12 + $0xb0] sm:$0xff] (%p1403_p5) }
 0x13e   : > { %1192 = vst [vmem:[%s1729_s12 + $0xd0] sm:$0xff] %v914_v56  ;;  %626 = vst.msk [vmem:[%s1729_s12 + $0x58] sm:$0xff] %vm312_vm0, %v610_v57  ;;  %v576_v60 = vpop.f32.mrb[12].mxu0  ;;  %v1006_v35 = vld [vmem:[%s1729_s12 + $0xb8] sm:$0xff] (%p1403_p5) }
 0x13f   : > { %1193 = vst.msk [vmem:[%s1729_s12 + $0xd8] sm:$0xff] %vm312_vm0, %v915_v59  ;;  %v611_v61 = vadd.f32 %v1718_v8, %v576_v60  ;;  %v880_v62 = vpop.f32.mrb[12].mxu1  ;;  %v578_v63 = vpop.f32.mrb[13].mxu0  ;;  %975 = vst [vmem:[%s1818_s20 + $0x38] sm:$0xff] (%p1403_p5), %v974_v18 }
 0x140   : > { %v916_v0 = vadd.f32 %v1720_v23, %v880_v62  ;;  %v612_v1 = vadd.f32 %v1722_v9, %v578_v63  ;;  %v882_v2 = vpop.f32.mrb[13].mxu1  ;;  %v976_v19 = vld [vmem:[%s1729_s12 + $0x40] sm:$0xff] (%p1403_p5)  ;;  %1005 = vst [vmem:[%s1818_s20 + $0x130] sm:$0xff] (%p1403_p5), %v1004_v34  ;;  %1007 = vst [vmem:[%s1818_s20 + $0x138] sm:$0xff] (%p1403_p5), %v1006_v35 }
 0x141   : > { %627 = vst [vmem:[%s1729_s12 + $0x60] sm:$0xff] %v611_v61  ;;  %v917_v3 = vadd.f32 %v1724_v10, %v882_v2  ;;  %943 = sbr.rel (!%p1403_p5) target bundleno = 336 (0x150), region = 74  ;;  %977 = vst [vmem:[%s1818_s20 + $0x40] sm:$0xff] (%p1403_p5), %v976_v19  ;;  %v978_v20 = vld [vmem:[%s1729_s12 + $0x48] sm:$0xff] (%p1403_p5)  ;;  %v1008_v36 = vld [vmem:[%s1729_s12 + $0xc0] sm:$0xff] (%p1403_p5) }
 0x142   : > { %1194 = vst [vmem:[%s1729_s12 + $0xe0] sm:$0xff] %v916_v0  ;;  %628 = vst.msk [vmem:[%s1729_s12 + $0x68] sm:$0xff] %vm312_vm0, %v612_v1  ;;  %v582_v4 = vpop.f32.mrb[14].mxu0  ;;  %v1010_v37 = vld [vmem:[%s1729_s12 + $0xc8] sm:$0xff] (%p1403_p5) }
 0x143   : > { %1195 = vst.msk [vmem:[%s1729_s12 + $0xe8] sm:$0xff] %vm312_vm0, %v917_v3  ;;  %v613_v5 = vadd.f32 %v1718_v8, %v582_v4  ;;  %v886_v6 = vpop.f32.mrb[14].mxu1  ;;  %v584_v7 = vpop.f32.mrb[15].mxu0  ;;  %v960_v8 = vld [vmem:[%s1729_s12] sm:$0xff] (%p1403_p5)  ;;  %979 = vst [vmem:[%s1818_s20 + $0x48] sm:$0xff] (%p1403_p5), %v978_v20 }
 0x144   : > { %v918_v11 = vadd.f32 %v1720_v23, %v886_v6  ;;  %v614_v12 = vadd.f32 %v1722_v9, %v584_v7  ;;  %v888_v13 = vpop.f32.mrb[15].mxu1  ;;  %v962_v23 = vld [vmem:[%s1729_s12 + $0x8] sm:$0xff] (%p1403_p5)  ;;  %v964_v9 = vld [vmem:[%s1729_s12 + $0x10] sm:$0xff] (%p1403_p5)  ;;  %961 = vst [vmem:[%s1818_s20] sm:$0xff] (%p1403_p5), %v960_v8  ;;  %1009 = vst [vmem:[%s1818_s20 + $0x140] sm:$0xff] (%p1403_p5), %v1008_v36 }
 0x145   : > { %629 = vst [vmem:[%s1729_s12 + $0x70] sm:$0xff] %v613_v5  ;;  %v919_v14 = vadd.f32 %v1724_v10, %v888_v13  ;;  %v966_v10 = vld [vmem:[%s1729_s12 + $0x18] sm:$0xff] (%p1403_p5)  ;;  %963 = vst [vmem:[%s1818_s20 + $0x8] sm:$0xff] (%p1403_p5), %v962_v23  ;;  %v980_v21 = vld [vmem:[%s1729_s12 + $0x50] sm:$0xff] (%p1403_p5) }
 0x146   : > { %1196 = vst [vmem:[%s1729_s12 + $0xf0] sm:$0xff] %v918_v11  ;;  %630 = vst.msk [vmem:[%s1729_s12 + $0x78] sm:$0xff] %vm312_vm0, %v614_v12  ;;  %v982_v22 = vld [vmem:[%s1729_s12 + $0x58] sm:$0xff] (%p1403_p5)  ;;  %v1012_v38 = vld [vmem:[%s1729_s12 + $0xd0] sm:$0xff] (%p1403_p5) }
 0x147   : > { %1197 = vst.msk [vmem:[%s1729_s12 + $0xf8] sm:$0xff] %vm312_vm0, %v919_v14  ;;  %965 = vst [vmem:[%s1818_s20 + $0x10] sm:$0xff] (%p1403_p5), %v964_v9  ;;  %v1014_v39 = vld [vmem:[%s1729_s12 + $0xd8] sm:$0xff] (%p1403_p5) }
 0x148   : > { %967 = vst [vmem:[%s1818_s20 + $0x18] sm:$0xff] %v966_v10  ;;  %981 = vst [vmem:[%s1818_s20 + $0x50] sm:$0xff] %v980_v21  ;;  %v984_v24 = vld [vmem:[%s1729_s12 + $0x60] sm:$0xff] }
 0x149   : > { %983 = vst [vmem:[%s1818_s20 + $0x58] sm:$0xff] %v982_v22  ;;  %v986_v25 = vld [vmem:[%s1729_s12 + $0x68] sm:$0xff]  ;;  %985 = vst [vmem:[%s1818_s20 + $0x60] sm:$0xff] %v984_v24  ;;  %v1016_v40 = vld [vmem:[%s1729_s12 + $0xe0] sm:$0xff] }
 0x14a   : > { %987 = vst [vmem:[%s1818_s20 + $0x68] sm:$0xff] %v986_v25  ;;  %1011 = vst [vmem:[%s1818_s20 + $0x148] sm:$0xff] %v1010_v37  ;;  %v1018_v41 = vld [vmem:[%s1729_s12 + $0xe8] sm:$0xff] }
 0x14b   : > { %1013 = vst [vmem:[%s1818_s20 + $0x150] sm:$0xff] %v1012_v38  ;;  %1015 = vst [vmem:[%s1818_s20 + $0x158] sm:$0xff] %v1014_v39 }
 0x14c   : > { %v988_v26 = vld [vmem:[%s1729_s12 + $0x70] sm:$0xff]  ;;  %1017 = vst [vmem:[%s1818_s20 + $0x160] sm:$0xff] %v1016_v40  ;;  %1019 = vst [vmem:[%s1818_s20 + $0x168] sm:$0xff] %v1018_v41 }
 0x14d   : > { %989 = vst [vmem:[%s1818_s20 + $0x70] sm:$0xff] %v988_v26  ;;  %v990_v27 = vld [vmem:[%s1729_s12 + $0x78] sm:$0xff]  ;;  %v1020_v42 = vld [vmem:[%s1729_s12 + $0xf0] sm:$0xff] }
 0x14e   : > { %991 = vst [vmem:[%s1818_s20 + $0x78] sm:$0xff] %v990_v27  ;;  %v1022_v43 = vld [vmem:[%s1729_s12 + $0xf8] sm:$0xff]  ;;  %1021 = vst [vmem:[%s1818_s20 + $0x170] sm:$0xff] %v1020_v42 }
 0x14f   : > { %1023 = vst [vmem:[%s1818_s20 + $0x178] sm:$0xff] %v1022_v43 }
 0x150 PF: > { %p10_p10 = scmp.ge.s32.totalorder %s1390_s16, 4   ;;  %s1896_s12 = smov %s1346_s13 }
 0x151   : > { %s1897_s13 = smov %s1401_s19  ;;  %s1898_s14 = smov %s1390_s16 }
 0x152   :  { %12 = sbr.rel (!%p10_p10) target bundleno = 2 (0x2), region = 134 }

// kernel: _lambda_.8
= control target key start
LH: loop header
LB: loop body
LE: loop exit
PB: predicated region body
PF: predicated region fallthrough
CT: control target
= control target key end

     0   :  { %s3018_s18 = smov 0   ;;  %s3020_s19 = smov 0   ;;  %s3588_s0 = inlined_call_operand.vmem [shape: f32[2,16,8,192], index: 0, kind: input, shape index: {}]   ;;  %s3589_s1 = inlined_call_operand.vmem [shape: s32[8,1], index: 1, kind: input, shape index: {}]   ;;  %s3590_s2 = inlined_call_operand.vmem [shape: f32[2,8,64], index: 2, kind: input, shape index: {}]   ;;  %s3591_s3 = inlined_call_operand.vmem [shape: f32[2,64,192], index: 3, kind: input, shape index: {}]   ;;  %s3592_s4 = inlined_call_operand.vmem [shape: f32[2,1,192], index: 4, kind: input, shape index: {}]   ;;  %s3593_s5 = inlined_call_operand.vmem [shape: f32[2,16,8,64], index: 5, kind: output, shape index: {}]  }
   0x1   :  { %3594 = sst [smem:[#allocation5_spill]] %s3590_s2  ;;  %s3022_s20 = smov 0  }
   0x2   :  { %s3024_s21 = smov 0   ;;  %s3026_s22 = smov 0  }
   0x3 LB: > { %s24_s23 = sadd.s32 1, %s2972_s20  ;;  %s27_s24 = sadd.s32 1, %s2976_s21  ;;  %s2980_s22 = sphi %s3026_s22, %s15_s22   ;;  %s2976_s21 = sphi %s3024_s21, %s3603_s21   ;;  %s2972_s20 = sphi %s3022_s20, %s3602_s20   ;;  %s2968_s19 = sphi %s3020_s19, %s3601_s19   ;;  %s2964_s18 = sphi %s3018_s18, %s3600_s18  }
   0x4   : > { %p25_p0 = scmp.ge.s32.totalorder %s24_s23, 2  ;;  %p2428_p1 = scmp.ge.s32.totalorder %s2980_s22, 1 }
   0x5   : > { %p261_p2 = scmp.lt.s32.totalorder %s2980_s22, 5 }
   0x6   : > { %s3605_s23 = smov (%p25_p0, %s24_s23), 0  ;;  %s3607_s24 = smov (!%p25_p0, %s27_s24), %s2976_s21 }
   0x7   : > { %3595 = sst [smem:[#allocation3_spill]] %s3605_s23  ;;  %p262_p3 = pnand %p2428_p1, %p261_p2 }
   0x8   : > { %p29_p4 = scmp.ge.s32.totalorder %s3607_s24, 2  ;;  %s2429_s25 = sshll.u32 (!%p262_p3), %s2968_s19, 1 }
   0x9   : > { %265 = sbr.rel (%p262_p3) target bundleno = 8173 (0x1fed), region = 40  ;;  %p324_p5 = scmp.lt.s32.totalorder (!%p262_p3), %s2968_s19, 1 }
   0xa   : > { %s3609_s24 = smov (%p29_p4, %s3607_s24), 0  ;;  %s320_s26 = ssub.s32 (!%p262_p3), 1, %s2429_s25 }
   0xb   : > { %3596 = sst [smem:[#allocation4_spill]] %s3609_s24  ;;  %s321_s27 = smul.u32 (!%p262_p3), %s2964_s18, %s320_s26 }
   0xc   : > { %s3597_s2 = sld [smem:[#allocation5_spill]] (!%p262_p3)  ;;  %p2442_p7 = scmp.ne.s32.totalorder (!%p262_p3), %s2964_s18, 0 }
   0xd   : > { %s322_s29 = sadd.s32 (!%p262_p3), %s2968_s19, %s321_s27 }
   0xe   : > { %s2430_s30 = sshll.u32 (!%p262_p3), %s322_s29, 3 }
   0xf   : > { %p326_p6 = scmp.lt.s32.totalorder (!%p262_p3), %s2430_s30, 15 }
  0x10   : > { %s325_s28 = scalar_select %p324_p5, %s2968_s19, 1 }
  0x11   : > { %s3611_s30 = smov (!%p326_p6, %s2430_s30), 15  ;;  %vm374_vm0 = vcmask (!%p2442_p7), 523264  }
  0x12   : > { %s2432_s6 = sshll.u32 %s325_s28, 5  ;;  %s2434_s7 = sshll.u32 %s325_s28, 3 }
  0x13   : > { %s341_s10 = scalar_lea.vmem %s3597_s2, %s2434_s7  ;;  %s2539_s11 = sshll.u32 %s325_s28, 7 }
  0x14   : > { %s3063_s14 = scalar_lea.vmem %s3591_s3, %s2539_s11  ;;  %s2437_s15 = sshll.u32 %s325_s28, 1  ;;  %v373_v0 = vld [vmem:[%s341_s10] sm:$0xff] (!%p2442_p7) }
  0x15   : > { %s2431_s16 = sshll.u32 %s3611_s30, 1  ;;  %s3068_s26 = scalar_lea.vmem %s3592_s4, %s2437_s15  ;;  %375 = vst.msk [vmem:[#allocation2] sm:$0xff] (!%p2442_p7), %vm374_vm0, %v373_v0 }
  0x16   : > { %s330_s27 = sadd.s32 %s2432_s6, %s2431_s16  ;;  %s2440_s29 = sshll.u32 %s325_s28, 4 }
  0x17   : > { %s2433_s24 = sshll.u32 %s330_s27, 3  ;;  %s361_s23 = sadd.s32 %s2440_s29, %s3611_s30 }
  0x18   : > { %s3073_s9 = scalar_lea.vmem %s3588_s0, %s2433_s24  ;;  %s2441_s2 = sshll.u32 %s361_s23, 3 }
  0x19   : > { %s3078_s13 = scalar_lea.vmem %s3593_s5, %s2441_s2  ;;  %372 = sbr.rel (%p2442_p7) target bundleno = 32 (0x20), region = 44 }
  0x20 PF: > { %v3084_v1 = vld [vmem:[%s3589_s1] sm:$0xff]  ;;  %v3090_v3 = vld [vmem:[%s3063_s14 + $0x8] sm:$0xff]  ;;  %v3093_v4 = vld [vmem:[%s3063_s14 + $0x10] sm:$0xff]  ;;  %p2443_p8 = scmp.ne.s32.totalorder %s2968_s19, 0 }
  0x21   : > { %v3087_v2 = vld [vmem:[%s3063_s14] sm:$0xff]  ;;  %v3096_v5 = vld [vmem:[%s3063_s14 + $0x18] sm:$0xff]  ;;  %v3102_v7 = vld [vmem:[%s3063_s14 + $0x28] sm:$0xff]  ;;  %v2982_v23 = vmov (!%p2443_p8), 0.0   ;;  %vm413_vm1 = vcmask (!%p2443_p8), 523264   ;;  %v2983_v29 = vmov (!%p2443_p8), 0   ;;  %v403_v30 = vlaneseq (!%p2443_p8) }
  0x22   : > { %v3099_v6 = vld [vmem:[%s3063_s14 + $0x20] sm:$0xff]  ;;  %v3105_v8 = vld [vmem:[%s3063_s14 + $0x30] sm:$0xff]  ;;  %v3108_v9 = vld [vmem:[%s3063_s14 + $0x38] sm:$0xff]  ;;  %397 = sbr.rel (%p2443_p8) target bundleno = 4103 (0x1007), region = 48  ;;  %v3140_v19 = vpack.c.bf16 (!%p2443_p8), %v3096_v5, %v3090_v3  ;;  %v3144_v20 = vpack.c.bf16 (!%p2443_p8), %v3093_v4, %v3087_v2  ;;  %481 = vmatprep.mubr.f32.mxu0 (!%p2443_p8), %v2982_v23  ;;  %596 = vmatprep.mubr.f32.mxu1 (!%p2443_p8), %v2982_v23  ;;  %s3211_s2 = sshll.u32 (!%p2443_p8), %s2964_s18, 3 }
  0x23   : > { %v3111_v10 = vld [vmem:[%s3063_s14 + $0x40] sm:$0xff]  ;;  %v3114_v11 = vld [vmem:[%s3063_s14 + $0x48] sm:$0xff]  ;;  %v3117_v12 = vld [vmem:[%s3063_s14 + $0x50] sm:$0xff]  ;;  %v3148_v21 = vpack.c.bf16 (!%p2443_p8), %v3108_v9, %v3102_v7  ;;  %v3155_v22 = vpack.c.bf16 (!%p2443_p8), %v3105_v8, %v3099_v6  ;;  %2842 = vset.pattern.permute.xlu0 (!%p2443_p8), %v2983_v29  ;;  %2843 = vset.pattern.permute.xlu1 (!%p2443_p8), %v2983_v29  ;;  %v404_v31 = vshrl.u32 (!%p2443_p8), %v403_v30, 7  ;;  %v509_v49 = vstv (!%p2443_p8), %s3211_s2  ;;  %s2984_s23 = smov (!%p2443_p8), 64   ;;  %s524_s24 = sadd.s32 (!%p2443_p8), 1, %s3211_s2 }
  0x24   : > { %v3120_v13 = vld [vmem:[%s3063_s14 + $0x58] sm:$0xff]  ;;  %v3123_v14 = vld [vmem:[%s3063_s14 + $0x60] sm:$0xff]  ;;  %v3126_v15 = vld [vmem:[%s3063_s14 + $0x68] sm:$0xff]  ;;  %2541 = vmatprep.subr.bf16.mxu0 (!%p2443_p8), %v3140_v19  ;;  %2557 = vmatprep.subr.bf16.mxu1 (!%p2443_p8), %v3140_v19  ;;  %v3169_v25 = vpack.c.bf16 (!%p2443_p8), %v3117_v12, %v3111_v10  ;;  %vm510_vm2 = vcmp.lt.s32.totalorder (!%p2443_p8), %v509_v49, %v3084_v1  ;;  %s640_s6 = sadd.s32 (!%p2443_p8), 2, %s3211_s2  ;;  %s756_s10 = sadd.s32 (!%p2443_p8), 3, %s3211_s2 }
  0x25   : > { %v3129_v16 = vld [vmem:[%s3063_s14 + $0x70] sm:$0xff]  ;;  %v3132_v17 = vld [vmem:[%s3063_s14 + $0x78] sm:$0xff]  ;;  %v3135_v18 = vld [vmem:[%s3068_s26] sm:$0x3]  ;;  %2543 = vmatpush1.bf16.msra.mxu0 (!%p2443_p8), %v3144_v20  ;;  %v3161_v24 = vpack.c.bf16 (!%p2443_p8), %v3120_v13, %v3114_v11  ;;  %2559 = vmatpush1.bf16.msra.mxu1 (!%p2443_p8), %v3144_v20  ;;  %v405_v32 = vsub.s32 (!%p2443_p8), 0, %v404_v31  ;;  %v409_v42 = vsub.s32 (!%p2443_p8), 1, %v404_v31 }
  0x26   : > { %2545 = vmatprep.subr.bf16.mxu0 (!%p2443_p8), %v3148_v21  ;;  %2561 = vmatprep.subr.bf16.mxu1 (!%p2443_p8), %v3148_v21  ;;  %v3174_v26 = vpack.c.bf16 (!%p2443_p8), %v3132_v17, %v3126_v15  ;;  %v3181_v27 = vpack.c.bf16 (!%p2443_p8), %v3129_v16, %v3123_v14  ;;  %v399_v28 = vld [vmem:[#allocation2] sm:$0xff] (!%p2443_p8)  ;;  %v401_v46 = vld [vmem:[%s3073_s9 + $0x8] sm:$0xff] (!%p2443_p8)  ;;  %v2447_v52 = vsel (!%p2443_p8), %vm510_vm2, 1.0, %v2982_v23  ;;  %v2448_v63 = vld [vmem:[%s3073_s9 + $0x10] sm:$0xff] (!%p2443_p8)  ;;  %s872_s14 = sadd.s32 (!%p2443_p8), 4, %s3211_s2  ;;  %s988_s15 = sadd.s32 (!%p2443_p8), 5, %s3211_s2 }
  0x27   : > { %v3201_v33 = vrot.slane (!%p2443_p8), %v3135_v18, %v405_v32  ;;  %v400_v34 = vld [vmem:[%s3073_s9] sm:$0xff] (!%p2443_p8)  ;;  %v3206_v43 = vrot.slane (!%p2443_p8), %v3135_v18, %v409_v42  ;;  %s1104_s16 = sadd.s32 (!%p2443_p8), 6, %s3211_s2  ;;  %s1220_s17 = sadd.s32 (!%p2443_p8), 7, %s3211_s2 }
  0x29   : > { %2547 = vmatpush1.bf16.msra.mxu0 %v3155_v22  ;;  %2563 = vmatpush1.bf16.msra.mxu1 %v3155_v22 }
  0x2a   : > { %2549 = vmatprep.subr.bf16.mxu0 %v3161_v24  ;;  %2565 = vmatprep.subr.bf16.mxu1 %v3161_v24 }
  0x2d   : > { %2551 = vmatpush1.bf16.msra.mxu0 %v3169_v25  ;;  %2567 = vmatpush1.bf16.msra.mxu1 %v3169_v25 }
  0x2e   : > { %2553 = vmatprep.subr.bf16.mxu0 %v3174_v26  ;;  %2569 = vmatprep.subr.bf16.mxu1 %v3174_v26 }
  0x31   : > { %2555 = vmatpush1.bf16.msra.mxu0 %v3181_v27  ;;  %2571 = vmatpush1.bf16.msra.mxu1 %v3181_v27 }
  0x32   : > { %2573 = vmatprep.subr.bf16.mxu0 %v3140_v19  ;;  %2589 = vmatprep.subr.bf16.mxu1 %v3140_v19 }
  0x34   : > { %2445 = vmatmul.mubr.msk.f32.vlgmr.msra.gmra.mrb[0].mxu0 %vm413_vm1, %v399_v28 }
  0x35   : > { %2575 = vmatpush1.bf16.msra.mxu0 %v3144_v20  ;;  %712 = vmatprep.mubr.f32.mxu0 %v2982_v23 }
  0x36   : > { %2577 = vmatprep.subr.bf16.mxu0 %v3148_v21 }
  0x39   : > { %2579 = vmatpush1.bf16.msra.mxu0 %v3155_v22 }
  0x3a   : > { %2581 = vmatprep.subr.bf16.mxu0 %v3161_v24 }
  0x3d   : > { %2583 = vmatpush1.bf16.msra.mxu0 %v3169_v25 }
  0x3e   : > { %2585 = vmatprep.subr.bf16.mxu0 %v3174_v26 }
  0x41   : > { %2587 = vmatpush1.bf16.msra.mxu0 %v3181_v27 }
  0x42   : > { %2605 = vmatprep.subr.bf16.mxu0 %v3140_v19 }
 0x107   : > { %v483_v35 = vpop.f32.mrb[0].mxu0 }
 0x108   : > { %v484_v36 = vadd.f32 %v483_v35, %v3201_v33  ;;  %v485_v37 = vpop.f32.mrb[1].mxu0 }
 0x109   : > { %v486_v44 = vadd.f32 %v485_v37, %v3206_v43  ;;  %v2449_v37 = vld [vmem:[%s3073_s9 + $0x18] sm:$0xff] }
 0x10a   : > { %v488_v38 = vadd.f32 %v484_v36, %v400_v34 }
 0x10c   : > { %v2446_v39 = vmul.f32 -1.442695, %v488_v38 }
 0x10e   : > { %2844 = vpow2.f32 %v2446_v39 }
 0x118   : > { %v2845_v40 = vpop.eup %2844 }
 0x119   : > { %v492_v41 = vadd.f32 1.0, %v2845_v40  ;;  %v624_v40 = vstv %s524_s24 }
 0x11a   : > { %vm625_vm3 = vcmp.lt.s32.totalorder %v624_v40, %v3084_v1 }
 0x11b   : > { %2846 = vrcp.f32 %v492_v41 }
 0x125   : > { %v2847_v45 = vpop.eup %2846 }
 0x126   : > { %v495_v47 = vmul.f32 %v2847_v45, %v486_v44  ;;  %v2452_v44 = vsel %vm625_vm3, 1.0, %v2982_v23 }
 0x128   : > { %v496_v48 = vadd.f32 %v495_v47, %v401_v46 }
 0x12a   : > { %2848 = vtanh.f32 %v496_v48 }
 0x134   : > { %v2849_v50 = vpop.eup %2848 }
 0x135   : > { %v498_v51 = vsub.f32 %v399_v28, %v2849_v50 }
 0x137   : > { %500 = vrot.lane.b32.xlu0 %v498_v51, %s2984_s23 }
 0x13b   : > { %516 = vperm.xlu0 %2842, %v2447_v52  }
 0x1a9   : > { %v501_v53 = vpop.permute.xlu0 %500 }
 0x1aa   : > { %v503_v54 = vmul.f32 %v2847_v45, %v501_v53  ;;  %v740_v45 = vstv %s640_s6 }
 0x1ab   : > { %vm741_vm4 = vcmp.lt.s32.totalorder %v740_v45, %v3084_v1 }
 0x1ac   : > { %505 = vrot.lane.b32.xlu1 %v503_v54, %s2984_s23  ;;  %v2458_v48 = vsel %vm741_vm4, 1.0, %v2982_v23 }
 0x1ba   : > { %v517_v57 = vpop.permute.xlu0 %516 }
 0x21e   : > { %v506_v55 = vpop.permute.xlu1 %505 }
 0x21f   : > { %v508_v56 = vadd.f32 %v2849_v50, %v506_v55 }
 0x221   : > { %v513_v58 = vsub.f32 %v508_v56, %v399_v28 }
 0x223   : > { %v519_v59 = vmul.f32 %v517_v57, %v513_v58 }
 0x225   : > { %v520_v60 = vadd.f32 %v519_v59, %v399_v28 }
 0x227   : > { %521 = vst.msk [vmem:[#allocation2] sm:$0xff] %vm413_vm1, %v520_v60  ;;  %v522_v61 = vmul.f32 %v520_v60, %v517_v57  ;;  %v2454_v57 = vld [vmem:[%s3073_s9 + $0x20] sm:$0xff] }
 0x229   : > { %523 = vst.msk [vmem:[%s3078_s13] sm:$0xff] %vm413_vm1, %v522_v61 }
 0x22e   : > { %v525_v62 = vld [vmem:[#allocation2] sm:$0xff] }
 0x22f   : > { %2450 = vmatmul.mubr.msk.f32.vlgmr.msra.gmra.mrb[0].mxu1 %vm413_vm1, %v525_v62 }
 0x230   : > { %2591 = vmatpush1.bf16.msra.mxu1 %v3144_v20  ;;  %828 = vmatprep.mubr.f32.mxu1 %v2982_v23 }
 0x231   : > { %2593 = vmatprep.subr.bf16.mxu1 %v3148_v21 }
 0x234   : > { %2595 = vmatpush1.bf16.msra.mxu1 %v3155_v22 }
 0x235   : > { %2597 = vmatprep.subr.bf16.mxu1 %v3161_v24 }
 0x238   : > { %2599 = vmatpush1.bf16.msra.mxu1 %v3169_v25 }
 0x239   : > { %2601 = vmatprep.subr.bf16.mxu1 %v3174_v26 }
 0x23c   : > { %2603 = vmatpush1.bf16.msra.mxu1 %v3181_v27 }
 0x23d   : > { %2621 = vmatprep.subr.bf16.mxu1 %v3140_v19 }
 0x302   : > { %v598_v0 = vpop.f32.mrb[0].mxu1 }
 0x303   : > { %v599_v28 = vadd.f32 %v598_v0, %v3201_v33  ;;  %v600_v29 = vpop.f32.mrb[1].mxu1 }
 0x304   : > { %v601_v35 = vadd.f32 %v600_v29, %v3206_v43 }
 0x305   : > { %v603_v30 = vadd.f32 %v2448_v63, %v599_v28 }
 0x307   : > { %v2451_v31 = vmul.f32 -1.442695, %v603_v30  ;;  %v2455_v30 = vld [vmem:[%s3073_s9 + $0x28] sm:$0xff] }
 0x309   : > { %2850 = vpow2.f32 %v2451_v31 }
 0x313   : > { %v2851_v32 = vpop.eup %2850 }
 0x314   : > { %v607_v34 = vadd.f32 1.0, %v2851_v32 }
 0x316   : > { %2852 = vrcp.f32 %v607_v34 }
 0x320   : > { %v2853_v36 = vpop.eup %2852 }
 0x321   : > { %v610_v38 = vmul.f32 %v2853_v36, %v601_v35 }
 0x323   : > { %v611_v39 = vadd.f32 %v2449_v37, %v610_v38 }
 0x325   : > { %2854 = vtanh.f32 %v611_v39 }
 0x32f   : > { %v2855_v41 = vpop.eup %2854 }
 0x330   : > { %v613_v42 = vsub.f32 %v525_v62, %v2855_v41 }
 0x332   : > { %615 = vrot.lane.b32.xlu1 %v613_v42, %s2984_s23 }
 0x336   : > { %631 = vperm.xlu1 %2843, %v2452_v44  }
 0x3a4   : > { %v616_v46 = vpop.permute.xlu1 %615 }
 0x3a5   : > { %v618_v47 = vmul.f32 %v2853_v36, %v616_v46  ;;  %v856_v36 = vstv %s756_s10 }
 0x3a6   : > { %vm857_vm5 = vcmp.lt.s32.totalorder %v856_v36, %v3084_v1 }
 0x3a7   : > { %620 = vrot.lane.b32.xlu0 %v618_v47, %s2984_s23  ;;  %v2464_v39 = vsel %vm857_vm5, 1.0, %v2982_v23 }
 0x3ab   : > { %747 = vperm.xlu0 %2842, %v2458_v48  }
 0x3b5   : > { %v632_v51 = vpop.permute.xlu1 %631 }
 0x419   : > { %v621_v49 = vpop.permute.xlu0 %620 }
 0x41a   : > { %v623_v50 = vadd.f32 %v2855_v41, %v621_v49  ;;  %v2460_v49 = vld [vmem:[%s3073_s9 + $0x30] sm:$0xff] }
 0x41c   : > { %v628_v52 = vsub.f32 %v623_v50, %v525_v62 }
 0x41e   : > { %v634_v53 = vmul.f32 %v632_v51, %v628_v52 }
 0x420   : > { %v635_v54 = vadd.f32 %v634_v53, %v525_v62 }
 0x422   : > { %636 = vst.msk [vmem:[#allocation2] sm:$0xff] %vm413_vm1, %v635_v54  ;;  %v637_v55 = vmul.f32 %v635_v54, %v632_v51 }
 0x424   : > { %2453 = vst.msk [vmem:[%s3078_s13 + $0x8] sm:$0xff] %vm413_vm1, %v637_v55 }
 0x429   : > { %v641_v56 = vld [vmem:[#allocation2] sm:$0xff] }
 0x42a   : > { %2456 = vmatmul.mubr.msk.f32.vlgmr.msra.gmra.mrb[2].mxu0 %vm413_vm1, %v641_v56  ;;  %v748_v44 = vpop.permute.xlu0 %747 }
 0x42b   : > { %2607 = vmatpush1.bf16.msra.mxu0 %v3144_v20  ;;  %944 = vmatprep.mubr.f32.mxu0 %v2982_v23 }
 0x42c   : > { %2609 = vmatprep.subr.bf16.mxu0 %v3148_v21 }
 0x42f   : > { %2611 = vmatpush1.bf16.msra.mxu0 %v3155_v22 }
 0x430   : > { %2613 = vmatprep.subr.bf16.mxu0 %v3161_v24 }
 0x433   : > { %2615 = vmatpush1.bf16.msra.mxu0 %v3169_v25 }
 0x434   : > { %2617 = vmatprep.subr.bf16.mxu0 %v3174_v26 }
 0x437   : > { %2619 = vmatpush1.bf16.msra.mxu0 %v3181_v27 }
 0x438   : > { %2637 = vmatprep.subr.bf16.mxu0 %v3140_v19 }
 0x4fd   : > { %v714_v58 = vpop.f32.mrb[2].mxu0 }
 0x4fe   : > { %v715_v59 = vadd.f32 %v714_v58, %v3201_v33  ;;  %v716_v60 = vpop.f32.mrb[3].mxu0 }
 0x4ff   : > { %v717_v28 = vadd.f32 %v716_v60, %v3206_v43 }
 0x500   : > { %v719_v61 = vadd.f32 %v2454_v57, %v715_v59  ;;  %v2461_v59 = vld [vmem:[%s3073_s9 + $0x38] sm:$0xff] }
 0x502   : > { %v2457_v62 = vmul.f32 -1.442695, %v719_v61 }
 0x504   : > { %2856 = vpow2.f32 %v2457_v62 }
 0x50e   : > { %v2857_v63 = vpop.eup %2856 }
 0x50f   : > { %v723_v0 = vadd.f32 1.0, %v2857_v63  ;;  %v972_v63 = vstv %s872_s14 }
 0x510   : > { %vm973_vm6 = vcmp.lt.s32.totalorder %v972_v63, %v3084_v1 }
 0x511   : > { %2858 = vrcp.f32 %v723_v0 }
 0x51b   : > { %v2859_v29 = vpop.eup %2858 }
 0x51c   : > { %v726_v31 = vmul.f32 %v2859_v29, %v717_v28 }
 0x51e   : > { %v727_v32 = vadd.f32 %v2455_v30, %v726_v31 }
 0x520   : > { %2860 = vtanh.f32 %v727_v32 }
 0x52a   : > { %v2861_v34 = vpop.eup %2860 }
 0x52b   : > { %v729_v35 = vsub.f32 %v641_v56, %v2861_v34 }
 0x52d   : > { %731 = vrot.lane.b32.xlu1 %v729_v35, %s2984_s23 }
 0x59f   : > { %v732_v37 = vpop.permute.xlu1 %731 }
 0x5a0   : > { %v734_v38 = vmul.f32 %v2859_v29, %v732_v37  ;;  %v2470_v29 = vsel %vm973_vm6, 1.0, %v2982_v23 }
 0x5a2   : > { %736 = vrot.lane.b32.xlu1 %v734_v38, %s2984_s23 }
 0x5a6   : > { %863 = vperm.xlu1 %2843, %v2464_v39   ;;  %v2466_v39 = vld [vmem:[%s3073_s9 + $0x40] sm:$0xff] }
 0x614   : > { %v737_v40 = vpop.permute.xlu1 %736 }
 0x615   : > { %v739_v41 = vadd.f32 %v2861_v34, %v737_v40 }
 0x617   : > { %v744_v42 = vsub.f32 %v739_v41, %v641_v56 }
 0x619   : > { %v750_v45 = vmul.f32 %v748_v44, %v744_v42 }
 0x61b   : > { %v751_v46 = vadd.f32 %v750_v45, %v641_v56 }
 0x61d   : > { %752 = vst.msk [vmem:[#allocation2] sm:$0xff] %vm413_vm1, %v751_v46  ;;  %v753_v47 = vmul.f32 %v751_v46, %v748_v44 }
 0x61f   : > { %2459 = vst.msk [vmem:[%s3078_s13 + $0x10] sm:$0xff] %vm413_vm1, %v753_v47 }
 0x624   : > { %v757_v48 = vld [vmem:[#allocation2] sm:$0xff] }
 0x625   : > { %2462 = vmatmul.mubr.msk.f32.vlgmr.msra.gmra.mrb[2].mxu1 %vm413_vm1, %v757_v48  ;;  %v864_v34 = vpop.permute.xlu1 %863 }
 0x626   : > { %2623 = vmatpush1.bf16.msra.mxu1 %v3144_v20  ;;  %1060 = vmatprep.mubr.f32.mxu1 %v2982_v23 }
 0x627   : > { %2625 = vmatprep.subr.bf16.mxu1 %v3148_v21 }
 0x62a   : > { %2627 = vmatpush1.bf16.msra.mxu1 %v3155_v22 }
 0x62b   : > { %2629 = vmatprep.subr.bf16.mxu1 %v3161_v24 }
 0x62e   : > { %2631 = vmatpush1.bf16.msra.mxu1 %v3169_v25 }
 0x62f   : > { %2633 = vmatprep.subr.bf16.mxu1 %v3174_v26 }
 0x632   : > { %2635 = vmatpush1.bf16.msra.mxu1 %v3181_v27 }
 0x633   : > { %2653 = vmatprep.subr.bf16.mxu1 %v3140_v19 }
 0x6f8   : > { %v830_v50 = vpop.f32.mrb[2].mxu1 }
 0x6f9   : > { %v831_v51 = vadd.f32 %v830_v50, %v3201_v33  ;;  %v832_v52 = vpop.f32.mrb[3].mxu1  ;;  %v2467_v50 = vld [vmem:[%s3073_s9 + $0x48] sm:$0xff] }
 0x6fa   : > { %v833_v57 = vadd.f32 %v832_v52, %v3206_v43 }
 0x6fb   : > { %v835_v53 = vadd.f32 %v2460_v49, %v831_v51 }
 0x6fd   : > { %v2463_v54 = vmul.f32 -1.442695, %v835_v53 }
 0x6ff   : > { %2862 = vpow2.f32 %v2463_v54 }
 0x709   : > { %v2863_v55 = vpop.eup %2862 }
 0x70a   : > { %v839_v56 = vadd.f32 1.0, %v2863_v55  ;;  %v1088_v55 = vstv %s988_s15 }
 0x70b   : > { %vm1089_vm7 = vcmp.lt.s32.totalorder %v1088_v55, %v3084_v1 }
 0x70c   : > { %2864 = vrcp.f32 %v839_v56 }
 0x716   : > { %v2865_v58 = vpop.eup %2864 }
 0x717   : > { %v842_v60 = vmul.f32 %v2865_v58, %v833_v57 }
 0x719   : > { %v843_v61 = vadd.f32 %v2461_v59, %v842_v60 }
 0x71b   : > { %2866 = vtanh.f32 %v843_v61 }
 0x725   : > { %v2867_v19 = vpop.eup %2866 }
 0x726   : > { %v845_v62 = vsub.f32 %v757_v48, %v2867_v19 }
 0x728   : > { %847 = vrot.lane.b32.xlu0 %v845_v62, %s2984_s23 }
 0x79a   : > { %v848_v0 = vpop.permute.xlu0 %847 }
 0x79b   : > { %v850_v28 = vmul.f32 %v2865_v58, %v848_v0  ;;  %v2476_v58 = vsel %vm1089_vm7, 1.0, %v2982_v23 }
 0x79d   : > { %852 = vrot.lane.b32.xlu0 %v850_v28, %s2984_s23 }
 0x7a1   : > { %979 = vperm.xlu0 %2842, %v2470_v29   ;;  %v2472_v29 = vld [vmem:[%s3073_s9 + $0x50] sm:$0xff] }
 0x80f   : > { %v853_v30 = vpop.permute.xlu0 %852 }
 0x810   : > { %v855_v31 = vadd.f32 %v2867_v19, %v853_v30 }
 0x812   : > { %v860_v32 = vsub.f32 %v855_v31, %v757_v48 }
 0x814   : > { %v866_v35 = vmul.f32 %v864_v34, %v860_v32 }
 0x816   : > { %v867_v36 = vadd.f32 %v866_v35, %v757_v48 }
 0x818   : > { %868 = vst.msk [vmem:[#allocation2] sm:$0xff] %vm413_vm1, %v867_v36  ;;  %v869_v37 = vmul.f32 %v867_v36, %v864_v34 }
 0x81a   : > { %2465 = vst.msk [vmem:[%s3078_s13 + $0x18] sm:$0xff] %vm413_vm1, %v869_v37 }
 0x81f   : > { %v873_v38 = vld [vmem:[#allocation2] sm:$0xff] }
 0x820   : > { %2468 = vmatmul.mubr.msk.f32.vlgmr.msra.gmra.mrb[4].mxu0 %vm413_vm1, %v873_v38  ;;  %v980_v19 = vpop.permute.xlu0 %979 }
 0x821   : > { %2639 = vmatpush1.bf16.msra.mxu0 %v3144_v20  ;;  %1176 = vmatprep.mubr.f32.mxu0 %v2982_v23 }
 0x822   : > { %2641 = vmatprep.subr.bf16.mxu0 %v3148_v21 }
 0x825   : > { %2643 = vmatpush1.bf16.msra.mxu0 %v3155_v22 }
 0x826   : > { %2645 = vmatprep.subr.bf16.mxu0 %v3161_v24 }
 0x829   : > { %2647 = vmatpush1.bf16.msra.mxu0 %v3169_v25 }
 0x82a   : > { %2649 = vmatprep.subr.bf16.mxu0 %v3174_v26 }
 0x82d   : > { %2651 = vmatpush1.bf16.msra.mxu0 %v3181_v27 }
 0x8f3   : > { %v946_v40 = vpop.f32.mrb[4].mxu0 }
 0x8f4   : > { %v947_v41 = vadd.f32 %v946_v40, %v3201_v33  ;;  %v948_v42 = vpop.f32.mrb[5].mxu0 }
 0x8f5   : > { %v949_v48 = vadd.f32 %v948_v42, %v3206_v43 }
 0x8f6   : > { %v951_v44 = vadd.f32 %v2466_v39, %v947_v41 }
 0x8f8   : > { %v2469_v45 = vmul.f32 -1.442695, %v951_v44 }
 0x8fa   : > { %2868 = vpow2.f32 %v2469_v45 }
 0x904   : > { %v2869_v46 = vpop.eup %2868 }
 0x905   : > { %v955_v47 = vadd.f32 1.0, %v2869_v46 }
 0x907   : > { %2870 = vrcp.f32 %v955_v47 }
 0x911   : > { %v2871_v49 = vpop.eup %2870 }
 0x912   : > { %v958_v51 = vmul.f32 %v2871_v49, %v949_v48 }
 0x914   : > { %v959_v52 = vadd.f32 %v2467_v50, %v958_v51  ;;  %v2478_v51 = vld [vmem:[%s3073_s9 + $0x60] sm:$0xff] }
 0x916   : > { %2872 = vtanh.f32 %v959_v52 }
 0x920   : > { %v2873_v53 = vpop.eup %2872 }
 0x921   : > { %v961_v54 = vsub.f32 %v873_v38, %v2873_v53 }
 0x923   : > { %963 = vrot.lane.b32.xlu1 %v961_v54, %s2984_s23 }
 0x995   : > { %v964_v56 = vpop.permute.xlu1 %963 }
 0x996   : > { %v966_v57 = vmul.f32 %v2871_v49, %v964_v56 }
 0x998   : > { %968 = vrot.lane.b32.xlu1 %v966_v57, %s2984_s23 }
 0x99c   : > { %1095 = vperm.xlu1 %2843, %v2476_v58  }
 0xa0a   : > { %v969_v59 = vpop.permute.xlu1 %968 }
 0xa0b   : > { %v971_v60 = vadd.f32 %v2873_v53, %v969_v59 }
 0xa0d   : > { %v976_v61 = vsub.f32 %v971_v60, %v873_v38 }
 0xa0f   : > { %v982_v62 = vmul.f32 %v980_v19, %v976_v61  ;;  %v2479_v61 = vld [vmem:[%s3073_s9 + $0x68] sm:$0xff] }
 0xa11   : > { %v983_v63 = vadd.f32 %v982_v62, %v873_v38  ;;  %v1204_v38 = vstv %s1104_s16 }
 0xa12   : > { %vm1205_vm8 = vcmp.lt.s32.totalorder %v1204_v38, %v3084_v1 }
 0xa13   : > { %984 = vst.msk [vmem:[#allocation2] sm:$0xff] %vm413_vm1, %v983_v63  ;;  %v985_v0 = vmul.f32 %v983_v63, %v980_v19  ;;  %v2482_v41 = vsel %vm1205_vm8, 1.0, %v2982_v23 }
 0xa15   : > { %2471 = vst.msk [vmem:[%s3078_s13 + $0x20] sm:$0xff] %vm413_vm1, %v985_v0 }
 0xa1a   : > { %v989_v28 = vld [vmem:[#allocation2] sm:$0xff] }
 0xa1b   : > { %2474 = vmatmul.mubr.msk.f32.vlgmr.msra.gmra.mrb[4].mxu1 %vm413_vm1, %v989_v28  ;;  %v1096_v46 = vpop.permute.xlu1 %1095 }
 0xa1c   : > { %2655 = vmatpush1.bf16.msra.mxu1 %v3144_v20  ;;  %1292 = vmatprep.mubr.f32.mxu1 %v2982_v23 }
 0xa1d   : > { %2657 = vmatprep.subr.bf16.mxu1 %v3148_v21 }
 0xa20   : > { %2659 = vmatpush1.bf16.msra.mxu1 %v3155_v22 }
 0xa21   : > { %2661 = vmatprep.subr.bf16.mxu1 %v3161_v24 }
 0xa24   : > { %2663 = vmatpush1.bf16.msra.mxu1 %v3169_v25  ;;  %v2473_v25 = vld [vmem:[%s3073_s9 + $0x58] sm:$0xff] }
 0xa25   : > { %2665 = vmatprep.subr.bf16.mxu1 %v3174_v26 }
 0xa28   : > { %2667 = vmatpush1.bf16.msra.mxu1 %v3181_v27 }
 0xaee   : > { %v1062_v30 = vpop.f32.mrb[4].mxu1 }
 0xaef   : > { %v1063_v31 = vadd.f32 %v1062_v30, %v3201_v33  ;;  %v1064_v20 = vpop.f32.mrb[5].mxu1 }
 0xaf0   : > { %v1065_v24 = vadd.f32 %v1064_v20, %v3206_v43 }
 0xaf1   : > { %v1067_v32 = vadd.f32 %v2472_v29, %v1063_v31 }
 0xaf3   : > { %v2475_v34 = vmul.f32 -1.442695, %v1067_v32 }
 0xaf5   : > { %2874 = vpow2.f32 %v2475_v34 }
 0xaff   : > { %v2875_v21 = vpop.eup %2874 }
 0xb00   : > { %v1071_v22 = vadd.f32 1.0, %v2875_v21 }
 0xb02   : > { %2876 = vrcp.f32 %v1071_v22 }
 0xb0c   : > { %v2877_v35 = vpop.eup %2876 }
 0xb0d   : > { %v1074_v36 = vmul.f32 %v2877_v35, %v1065_v24 }
 0xb0f   : > { %v1075_v26 = vadd.f32 %v2473_v25, %v1074_v36  ;;  %v2484_v36 = vld [vmem:[%s3073_s9 + $0x70] sm:$0xff] }
 0xb11   : > { %2878 = vtanh.f32 %v1075_v26 }
 0xb1b   : > { %v2879_v27 = vpop.eup %2878 }
 0xb1c   : > { %v1077_v37 = vsub.f32 %v989_v28, %v2879_v27 }
 0xb1e   : > { %1079 = vrot.lane.b32.xlu0 %v1077_v37, %s2984_s23 }
 0xb90   : > { %v1080_v39 = vpop.permute.xlu0 %1079 }
 0xb91   : > { %v1082_v40 = vmul.f32 %v2877_v35, %v1080_v39 }
 0xb93   : > { %1084 = vrot.lane.b32.xlu0 %v1082_v40, %s2984_s23 }
 0xb97   : > { %1211 = vperm.xlu0 %2842, %v2482_v41  }
 0xc05   : > { %v1085_v42 = vpop.permute.xlu0 %1084 }
 0xc06   : > { %v1087_v44 = vadd.f32 %v2879_v27, %v1085_v42 }
 0xc08   : > { %v1092_v45 = vsub.f32 %v1087_v44, %v989_v28  ;;  %v2485_v44 = vld [vmem:[%s3073_s9 + $0x78] sm:$0xff] }
 0xc0a   : > { %v1098_v47 = vmul.f32 %v1096_v46, %v1092_v45 }
 0xc0c   : > { %v1099_v48 = vadd.f32 %v1098_v47, %v989_v28  ;;  %v1320_v28 = vstv %s1220_s17 }
 0xc0d   : > { %vm1321_vm9 = vcmp.lt.s32.totalorder %v1320_v28, %v3084_v1 }
 0xc0e   : > { %1100 = vst.msk [vmem:[#allocation2] sm:$0xff] %vm413_vm1, %v1099_v48  ;;  %v1101_v49 = vmul.f32 %v1099_v48, %v1096_v46  ;;  %v2488_v31 = vsel %vm1321_vm9, 1.0, %v2982_v23 }
 0xc10   : > { %2477 = vst.msk [vmem:[%s3078_s13 + $0x28] sm:$0xff] %vm413_vm1, %v1101_v49 }
 0xc15   : > { %v1105_v50 = vld [vmem:[#allocation2] sm:$0xff] }
 0xc16   : > { %2480 = vmatmul.mubr.msk.f32.vlgmr.msra.gmra.mrb[6].mxu0 %vm413_vm1, %v1105_v50  ;;  %v1212_v21 = vpop.permute.xlu0 %1211 }
 0xce9   : > { %v1178_v52 = vpop.f32.mrb[6].mxu0 }
 0xcea   : > { %v1179_v53 = vadd.f32 %v1178_v52, %v3201_v33  ;;  %v1180_v54 = vpop.f32.mrb[7].mxu0 }
 0xceb   : > { %v1181_v59 = vadd.f32 %v1180_v54, %v3206_v43 }
 0xcec   : > { %v1183_v55 = vadd.f32 %v2478_v51, %v1179_v53 }
 0xcee   : > { %v2481_v56 = vmul.f32 -1.442695, %v1183_v55 }
 0xcf0   : > { %2880 = vpow2.f32 %v2481_v56 }
 0xcfa   : > { %v2881_v57 = vpop.eup %2880 }
 0xcfb   : > { %v1187_v58 = vadd.f32 1.0, %v2881_v57 }
 0xcfd   : > { %2882 = vrcp.f32 %v1187_v58 }
 0xd07   : > { %v2883_v60 = vpop.eup %2882 }
 0xd08   : > { %v1190_v19 = vmul.f32 %v2883_v60, %v1181_v59 }
 0xd0a   : > { %v1191_v62 = vadd.f32 %v2479_v61, %v1190_v19 }
 0xd0c   : > { %2884 = vtanh.f32 %v1191_v62 }
 0xd16   : > { %v2885_v63 = vpop.eup %2884 }
 0xd17   : > { %v1193_v0 = vsub.f32 %v1105_v50, %v2885_v63 }
 0xd19   : > { %1195 = vrot.lane.b32.xlu1 %v1193_v0, %s2984_s23 }
 0xd8b   : > { %v1196_v29 = vpop.permute.xlu1 %1195 }
 0xd8c   : > { %v1198_v30 = vmul.f32 %v2883_v60, %v1196_v29 }
 0xd8e   : > { %1200 = vrot.lane.b32.xlu1 %v1198_v30, %s2984_s23 }
 0xd92   : > { %1327 = vperm.xlu1 %2843, %v2488_v31  }
 0xe00   : > { %v1201_v20 = vpop.permute.xlu1 %1200 }
 0xe01   : > { %v1203_v32 = vadd.f32 %v2885_v63, %v1201_v20 }
 0xe03   : > { %v1208_v34 = vsub.f32 %v1203_v32, %v1105_v50 }
 0xe05   : > { %v1214_v22 = vmul.f32 %v1212_v21, %v1208_v34 }
 0xe07   : > { %v1215_v24 = vadd.f32 %v1214_v22, %v1105_v50 }
 0xe09   : > { %1216 = vst.msk [vmem:[#allocation2] sm:$0xff] %vm413_vm1, %v1215_v24  ;;  %v1217_v35 = vmul.f32 %v1215_v24, %v1212_v21 }
 0xe0b   : > { %2483 = vst.msk [vmem:[%s3078_s13 + $0x30] sm:$0xff] %vm413_vm1, %v1217_v35 }
 0xe10   : > { %v1221_v25 = vld [vmem:[#allocation2] sm:$0xff] }
 0xe11   : > { %2486 = vmatmul.mubr.msk.f32.vlgmr.msra.gmra.mrb[6].mxu1 %vm413_vm1, %v1221_v25  ;;  %v1328_v53 = vpop.permute.xlu1 %1327 }
 0xee4   : > { %v1294_v26 = vpop.f32.mrb[6].mxu1 }
 0xee5   : > { %v1295_v23 = vadd.f32 %v1294_v26, %v3201_v33  ;;  %v1296_v27 = vpop.f32.mrb[7].mxu1 }
 0xee6   : > { %v1297_v41 = vadd.f32 %v1296_v27, %v3206_v43 }
 0xee7   : > { %v1299_v37 = vadd.f32 %v2484_v36, %v1295_v23 }
 0xee9   : > { %v2487_v38 = vmul.f32 -1.442695, %v1299_v37 }
 0xeeb   : > { %2886 = vpow2.f32 %v2487_v38 }
 0xef5   : > { %v2887_v39 = vpop.eup %2886 }
 0xef6   : > { %v1303_v40 = vadd.f32 1.0, %v2887_v39 }
 0xef8   : > { %2888 = vrcp.f32 %v1303_v40 }
 0xf02   : > { %v2889_v42 = vpop.eup %2888 }
 0xf03   : > { %v1306_v45 = vmul.f32 %v2889_v42, %v1297_v41 }
 0xf05   : > { %v1307_v46 = vadd.f32 %v2485_v44, %v1306_v45 }
 0xf07   : > { %2890 = vtanh.f32 %v1307_v46 }
 0xf11   : > { %v2891_v47 = vpop.eup %2890 }
 0xf12   : > { %v1309_v48 = vsub.f32 %v1221_v25, %v2891_v47 }
 0xf14   : > { %1311 = vrot.lane.b32.xlu0 %v1309_v48, %s2984_s23 }
 0xf86   : > { %v1312_v33 = vpop.permute.xlu0 %1311 }
 0xf87   : > { %v1314_v49 = vmul.f32 %v2889_v42, %v1312_v33 }
 0xf89   : > { %1316 = vrot.lane.b32.xlu0 %v1314_v49, %s2984_s23 }
 0xffb   : > { %v1317_v50 = vpop.permute.xlu0 %1316 }
 0xffc   : > { %v1319_v51 = vadd.f32 %v2891_v47, %v1317_v50 }
 0xffe   : > { %v1324_v52 = vsub.f32 %v1319_v51, %v1221_v25 }
0x1000   : > { %v1330_v54 = vmul.f32 %v1328_v53, %v1324_v52 }
0x1002   : > { %v1331_v43 = vadd.f32 %v1330_v54, %v1221_v25 }
0x1004   : > { %1332 = vst.msk [vmem:[#allocation2] sm:$0xff] %vm413_vm1, %v1331_v43  ;;  %v1333_v55 = vmul.f32 %v1331_v43, %v1328_v53 }
0x1006   : > { %2489 = vst.msk [vmem:[%s3078_s13 + $0x38] sm:$0xff] %vm413_vm1, %v1333_v55 }
0x1007 PF: > { %p2490_p9 = scmp.ne.s32.totalorder %s2968_s19, 1 }
0x1008   : > { %v3358_v56 = vpack.c.bf16 (!%p2490_p9), %v3096_v5, %v3090_v3  ;;  %v3362_v57 = vpack.c.bf16 (!%p2490_p9), %v3093_v4, %v3087_v2  ;;  %v3366_v58 = vpack.c.bf16 (!%p2490_p9), %v3108_v9, %v3102_v7  ;;  %v3373_v59 = vpack.c.bf16 (!%p2490_p9), %v3105_v8, %v3099_v6  ;;  %v2493_v29 = vld [vmem:[%s3073_s9 + $0x78] sm:$0xff] (!%p2490_p9)  ;;  %s1340_s19 = ssub.s32 (!%p2490_p9), 1, %s2964_s18  ;;  %s2987_s27 = smov (!%p2490_p9), 64   ;;  %v2498_v38 = vld [vmem:[%s3073_s9 + $0x60] sm:$0xff] (!%p2490_p9)  ;;  %v2499_v33 = vld [vmem:[%s3073_s9 + $0x68] sm:$0xff] (!%p2490_p9) }
0x1009   : > { %1339 = sbr.rel (%p2490_p9) target bundleno = 8173 (0x1fed), region = 52  ;;  %v2985_v3 = vmov (!%p2490_p9), 0.0   ;;  %v3379_v2 = vpack.c.bf16 (!%p2490_p9), %v3120_v13, %v3114_v11  ;;  %v3387_v4 = vpack.c.bf16 (!%p2490_p9), %v3117_v12, %v3111_v10  ;;  %v3392_v5 = vpack.c.bf16 (!%p2490_p9), %v3132_v17, %v3126_v15  ;;  %v2492_v13 = vld [vmem:[%s3073_s9 + $0x70] sm:$0xff] (!%p2490_p9)  ;;  %s3429_s25 = sshll.u32 (!%p2490_p9), %s1340_s19, 3 }
0x100a   : > { %2669 = vmatprep.subr.bf16.mxu0 (!%p2490_p9), %v3358_v56  ;;  %2685 = vmatprep.subr.bf16.mxu1 (!%p2490_p9), %v3358_v56  ;;  %v3399_v6 = vpack.c.bf16 (!%p2490_p9), %v3129_v16, %v3123_v14  ;;  %vm1358_vm10 = vcmask (!%p2490_p9), 523264   ;;  %v2986_v8 = vmov (!%p2490_p9), 0   ;;  %v1348_v9 = vlaneseq (!%p2490_p9)  ;;  %s1342_s26 = sadd.s32 (!%p2490_p9), 7, %s3429_s25  ;;  %s1470_s18 = sadd.s32 (!%p2490_p9), 6, %s3429_s25 }
0x100b   : > { %2671 = vmatpush1.bf16.msra.mxu0 (!%p2490_p9), %v3362_v57  ;;  %1426 = vmatprep.mubr.f32.mxu0 (!%p2490_p9), %v2985_v3  ;;  %v1343_v7 = vld [vmem:[#allocation2] sm:$0xff] (!%p2490_p9)  ;;  %v1454_v20 = vstv (!%p2490_p9), %s1342_s26  ;;  %v1570_v51 = vstv (!%p2490_p9), %s1470_s18  ;;  %s1586_s29 = sadd.s32 (!%p2490_p9), 5, %s3429_s25  ;;  %s1702_s8 = sadd.s32 (!%p2490_p9), 4, %s3429_s25 }
0x100c   : > { %2673 = vmatprep.subr.bf16.mxu0 (!%p2490_p9), %v3366_v58  ;;  %2687 = vmatpush1.bf16.msra.mxu1 (!%p2490_p9), %v3362_v57  ;;  %v1349_v10 = vshrl.u32 (!%p2490_p9), %v1348_v9, 7  ;;  %vm1455_vm11 = vcmp.lt.s32.totalorder (!%p2490_p9), %v1454_v20, %v3084_v1  ;;  %vm1571_vm12 = vcmp.lt.s32.totalorder (!%p2490_p9), %v1570_v51, %v3084_v1  ;;  %v1686_v43 = vstv (!%p2490_p9), %s1586_s29  ;;  %s1818_s7 = sadd.s32 (!%p2490_p9), 3, %s3429_s25  ;;  %s1934_s12 = sadd.s32 (!%p2490_p9), 2, %s3429_s25 }
0x100d   : > { %2689 = vmatprep.subr.bf16.mxu1 (!%p2490_p9), %v3366_v58  ;;  %1542 = vmatprep.mubr.f32.mxu1 (!%p2490_p9), %v2985_v3  ;;  %v2502_v54 = vsel (!%p2490_p9), %vm1571_vm12, 1.0, %v2985_v3  ;;  %vm1687_vm13 = vcmp.lt.s32.totalorder (!%p2490_p9), %v1686_v43, %v3084_v1  ;;  %s2050_s11 = sadd.s32 (!%p2490_p9), 1, %s3429_s25 }
0x100e   : > { %2892 = vset.pattern.permute.xlu0 (!%p2490_p9), %v2986_v8  ;;  %2893 = vset.pattern.permute.xlu1 (!%p2490_p9), %v2986_v8  ;;  %v1350_v11 = vsub.s32 (!%p2490_p9), 0, %v1349_v10  ;;  %v1354_v62 = vsub.s32 (!%p2490_p9), 1, %v1349_v10  ;;  %v2508_v8 = vsel (!%p2490_p9), %vm1687_vm13, 1.0, %v2985_v3 }
0x100f   : > { %2675 = vmatpush1.bf16.msra.mxu0 (!%p2490_p9), %v3373_v59 }
0x1010   : > { %2677 = vmatprep.subr.bf16.mxu0 %v3379_v2  ;;  %2691 = vmatpush1.bf16.msra.mxu1 %v3373_v59  ;;  %v3419_v12 = vrot.slane %v3135_v18, %v1350_v11  ;;  %v3424_v63 = vrot.slane %v3135_v18, %v1354_v62  ;;  %v2496_v18 = vsel %vm1455_vm11, 1.0, %v2985_v3 }
0x1011   : > { %2693 = vmatprep.subr.bf16.mxu1 %v3379_v2 }
0x1013   : > { %2679 = vmatpush1.bf16.msra.mxu0 %v3387_v4 }
0x1014   : > { %2681 = vmatprep.subr.bf16.mxu0 %v3392_v5  ;;  %2695 = vmatpush1.bf16.msra.mxu1 %v3387_v4 }
0x1015   : > { %2697 = vmatprep.subr.bf16.mxu1 %v3392_v5 }
0x1017   : > { %2683 = vmatpush1.bf16.msra.mxu0 %v3399_v6 }
0x1018   : > { %2699 = vmatpush1.bf16.msra.mxu1 %v3399_v6  ;;  %2701 = vmatprep.subr.bf16.mxu0 %v3358_v56 }
0x1019   : > { %2717 = vmatprep.subr.bf16.mxu1 %v3358_v56 }
0x101a   : > { %2494 = vmatmul.mubr.msk.f32.vlgmr.msra.gmra.mrb[0].mxu0 %vm1358_vm10, %v1343_v7 }
0x101b   : > { %2703 = vmatpush1.bf16.msra.mxu0 %v3362_v57  ;;  %1658 = vmatprep.mubr.f32.mxu0 %v2985_v3 }
0x101c   : > { %2705 = vmatprep.subr.bf16.mxu0 %v3366_v58 }
0x101f   : > { %2707 = vmatpush1.bf16.msra.mxu0 %v3373_v59 }
0x1020   : > { %2709 = vmatprep.subr.bf16.mxu0 %v3379_v2 }
0x1023   : > { %2711 = vmatpush1.bf16.msra.mxu0 %v3387_v4 }
0x1024   : > { %2713 = vmatprep.subr.bf16.mxu0 %v3392_v5 }
0x1027   : > { %2715 = vmatpush1.bf16.msra.mxu0 %v3399_v6 }
0x1028   : > { %2733 = vmatprep.subr.bf16.mxu0 %v3358_v56 }
0x10ed   : > { %v1428_v14 = vpop.f32.mrb[0].mxu0 }
0x10ee   : > { %v1429_v15 = vadd.f32 %v1428_v14, %v3419_v12  ;;  %v1430_v16 = vpop.f32.mrb[1].mxu0 }
0x10ef   : > { %v1431_v0 = vadd.f32 %v1430_v16, %v3424_v63 }
0x10f0   : > { %v1433_v17 = vadd.f32 %v2492_v13, %v1429_v15 }
0x10f2   : > { %v2495_v60 = vmul.f32 -1.442695, %v1433_v17 }
0x10f4   : > { %2894 = vpow2.f32 %v2495_v60  ;;  %v2504_v60 = vld [vmem:[%s3073_s9 + $0x50] sm:$0xff] }
0x10fe   : > { %v2895_v61 = vpop.eup %2894 }
0x10ff   : > { %v1437_v19 = vadd.f32 1.0, %v2895_v61 }
0x1101   : > { %2896 = vrcp.f32 %v1437_v19 }
0x110b   : > { %v2897_v28 = vpop.eup %2896 }
0x110c   : > { %v1440_v30 = vmul.f32 %v2897_v28, %v1431_v0 }
0x110e   : > { %v1441_v31 = vadd.f32 %v2493_v29, %v1440_v30 }
0x1110   : > { %2898 = vtanh.f32 %v1441_v31 }
0x111a   : > { %v2899_v32 = vpop.eup %2898 }
0x111b   : > { %v1443_v34 = vsub.f32 %v1343_v7, %v2899_v32 }
0x111d   : > { %1445 = vrot.lane.b32.xlu0 %v1443_v34, %s2987_s27 }
0x1121   : > { %1461 = vperm.xlu0 %2892, %v2496_v18  }
0x118f   : > { %v1446_v21 = vpop.permute.xlu0 %1445 }
0x1190   : > { %v1448_v22 = vmul.f32 %v2897_v28, %v1446_v21 }
0x1192   : > { %1450 = vrot.lane.b32.xlu1 %v1448_v22, %s2987_s27 }
0x11a0   : > { %v1462_v25 = vpop.permute.xlu0 %1461 }
0x1204   : > { %v1451_v24 = vpop.permute.xlu1 %1450 }
0x1205   : > { %v1453_v35 = vadd.f32 %v2899_v32, %v1451_v24  ;;  %v2505_v32 = vld [vmem:[%s3073_s9 + $0x58] sm:$0xff]  ;;  %v1802_v24 = vstv %s1702_s8 }
0x1206   : > { %vm1803_vm14 = vcmp.lt.s32.totalorder %v1802_v24, %v3084_v1 }
0x1207   : > { %v1458_v36 = vsub.f32 %v1453_v35, %v1343_v7 }
0x1209   : > { %v1464_v26 = vmul.f32 %v1462_v25, %v1458_v36  ;;  %v2514_v36 = vsel %vm1803_vm14, 1.0, %v2985_v3 }
0x120b   : > { %v1465_v23 = vadd.f32 %v1464_v26, %v1343_v7 }
0x120d   : > { %1466 = vst.msk [vmem:[#allocation2] sm:$0xff] %vm1358_vm10, %v1465_v23  ;;  %v1467_v27 = vmul.f32 %v1465_v23, %v1462_v25 }
0x120f   : > { %2497 = vst.msk [vmem:[%s3078_s13 + $0x38] sm:$0xff] %vm1358_vm10, %v1467_v27 }
0x1214   : > { %v1471_v37 = vld [vmem:[#allocation2] sm:$0xff] }
0x1215   : > { %2500 = vmatmul.mubr.msk.f32.vlgmr.msra.gmra.mrb[0].mxu1 %vm1358_vm10, %v1471_v37 }
0x1216   : > { %2719 = vmatpush1.bf16.msra.mxu1 %v3362_v57  ;;  %1774 = vmatprep.mubr.f32.mxu1 %v2985_v3 }
0x1217   : > { %2721 = vmatprep.subr.bf16.mxu1 %v3366_v58 }
0x121a   : > { %2723 = vmatpush1.bf16.msra.mxu1 %v3373_v59 }
0x121b   : > { %2725 = vmatprep.subr.bf16.mxu1 %v3379_v2 }
0x121e   : > { %2727 = vmatpush1.bf16.msra.mxu1 %v3387_v4 }
0x121f   : > { %2729 = vmatprep.subr.bf16.mxu1 %v3392_v5 }
0x1222   : > { %2731 = vmatpush1.bf16.msra.mxu1 %v3399_v6 }
0x1223   : > { %2749 = vmatprep.subr.bf16.mxu1 %v3358_v56 }
0x12e8   : > { %v1544_v39 = vpop.f32.mrb[0].mxu1 }
0x12e9   : > { %v1545_v40 = vadd.f32 %v1544_v39, %v3419_v12  ;;  %v1546_v41 = vpop.f32.mrb[1].mxu1 }
0x12ea   : > { %v1547_v47 = vadd.f32 %v1546_v41, %v3424_v63 }
0x12eb   : > { %v1549_v42 = vadd.f32 %v2498_v38, %v1545_v40 }
0x12ed   : > { %v2501_v44 = vmul.f32 -1.442695, %v1549_v42  ;;  %v2510_v42 = vld [vmem:[%s3073_s9 + $0x40] sm:$0xff] }
0x12ef   : > { %2900 = vpow2.f32 %v2501_v44 }
0x12f9   : > { %v2901_v45 = vpop.eup %2900 }
0x12fa   : > { %v1553_v46 = vadd.f32 1.0, %v2901_v45 }
0x12fc   : > { %2902 = vrcp.f32 %v1553_v46 }
0x1306   : > { %v2903_v48 = vpop.eup %2902 }
0x1307   : > { %v1556_v49 = vmul.f32 %v2903_v48, %v1547_v47 }
0x1309   : > { %v1557_v50 = vadd.f32 %v2499_v33, %v1556_v49 }
0x130b   : > { %2904 = vtanh.f32 %v1557_v50 }
0x1315   : > { %v2905_v52 = vpop.eup %2904 }
0x1316   : > { %v1559_v53 = vsub.f32 %v1471_v37, %v2905_v52 }
0x1318   : > { %1561 = vrot.lane.b32.xlu1 %v1559_v53, %s2987_s27 }
0x131c   : > { %1577 = vperm.xlu1 %2893, %v2502_v54  }
0x138a   : > { %v1562_v55 = vpop.permute.xlu1 %1561 }
0x138b   : > { %v1564_v7 = vmul.f32 %v2903_v48, %v1562_v55  ;;  %v1918_v55 = vstv %s1818_s7 }
0x138c   : > { %vm1919_vm15 = vcmp.lt.s32.totalorder %v1918_v55, %v3084_v1 }
0x138d   : > { %1566 = vrot.lane.b32.xlu0 %v1564_v7, %s2987_s27 }
0x1391   : > { %1693 = vperm.xlu0 %2892, %v2508_v8  }
0x139b   : > { %v1578_v11 = vpop.permute.xlu1 %1577 }
0x13ff   : > { %v1567_v9 = vpop.permute.xlu0 %1566 }
0x1400   : > { %v1569_v10 = vadd.f32 %v2905_v52, %v1567_v9  ;;  %v2511_v52 = vld [vmem:[%s3073_s9 + $0x48] sm:$0xff]  ;;  %v2520_v9 = vsel %vm1919_vm15, 1.0, %v2985_v3 }
0x1402   : > { %v1574_v13 = vsub.f32 %v1569_v10, %v1471_v37 }
0x1404   : > { %v1580_v14 = vmul.f32 %v1578_v11, %v1574_v13 }
0x1406   : > { %v1581_v15 = vadd.f32 %v1580_v14, %v1471_v37 }
0x1408   : > { %1582 = vst.msk [vmem:[#allocation2] sm:$0xff] %vm1358_vm10, %v1581_v15  ;;  %v1583_v16 = vmul.f32 %v1581_v15, %v1578_v11 }
0x140a   : > { %2503 = vst.msk [vmem:[%s3078_s13 + $0x30] sm:$0xff] %vm1358_vm10, %v1583_v16 }
0x140f   : > { %v1587_v17 = vld [vmem:[#allocation2] sm:$0xff] }
0x1410   : > { %2506 = vmatmul.mubr.msk.f32.vlgmr.msra.gmra.mrb[2].mxu0 %vm1358_vm10, %v1587_v17  ;;  %v1694_v37 = vpop.permute.xlu0 %1693 }
0x1411   : > { %2735 = vmatpush1.bf16.msra.mxu0 %v3362_v57  ;;  %1890 = vmatprep.mubr.f32.mxu0 %v2985_v3 }
0x1412   : > { %2737 = vmatprep.subr.bf16.mxu0 %v3366_v58 }
0x1415   : > { %2739 = vmatpush1.bf16.msra.mxu0 %v3373_v59 }
0x1416   : > { %2741 = vmatprep.subr.bf16.mxu0 %v3379_v2 }
0x1419   : > { %2743 = vmatpush1.bf16.msra.mxu0 %v3387_v4 }
0x141a   : > { %2745 = vmatprep.subr.bf16.mxu0 %v3392_v5 }
0x141d   : > { %2747 = vmatpush1.bf16.msra.mxu0 %v3399_v6 }
0x141e   : > { %2765 = vmatprep.subr.bf16.mxu0 %v3358_v56 }
0x14e3   : > { %v1660_v61 = vpop.f32.mrb[2].mxu0 }
0x14e4   : > { %v1661_v19 = vadd.f32 %v1660_v61, %v3419_v12  ;;  %v1662_v62 = vpop.f32.mrb[3].mxu0  ;;  %v2516_v61 = vld [vmem:[%s3073_s9 + $0x30] sm:$0xff] }
0x14e5   : > { %v1663_v31 = vadd.f32 %v1662_v62, %v3424_v63 }
0x14e6   : > { %v1665_v0 = vadd.f32 %v2504_v60, %v1661_v19 }
0x14e8   : > { %v2507_v28 = vmul.f32 -1.442695, %v1665_v0 }
0x14ea   : > { %2906 = vpow2.f32 %v2507_v28 }
0x14f4   : > { %v2907_v29 = vpop.eup %2906 }
0x14f5   : > { %v1669_v30 = vadd.f32 1.0, %v2907_v29 }
0x14f7   : > { %2908 = vrcp.f32 %v1669_v30 }
0x1501   : > { %v2909_v20 = vpop.eup %2908 }
0x1502   : > { %v1672_v34 = vmul.f32 %v2909_v20, %v1663_v31 }
0x1504   : > { %v1673_v18 = vadd.f32 %v2505_v32, %v1672_v34  ;;  %v2517_v34 = vld [vmem:[%s3073_s9 + $0x38] sm:$0xff] }
0x1506   : > { %2910 = vtanh.f32 %v1673_v18 }
0x1510   : > { %v2911_v21 = vpop.eup %2910 }
0x1511   : > { %v1675_v22 = vsub.f32 %v1587_v17, %v2911_v21 }
0x1513   : > { %1677 = vrot.lane.b32.xlu1 %v1675_v22, %s2987_s27 }
0x1585   : > { %v1678_v35 = vpop.permute.xlu1 %1677 }
0x1586   : > { %v1680_v25 = vmul.f32 %v2909_v20, %v1678_v35  ;;  %v2034_v35 = vstv %s1934_s12 }
0x1587   : > { %vm2035_vm0 = vcmp.lt.s32.totalorder %v2034_v35, %v3084_v1 }
0x1588   : > { %1682 = vrot.lane.b32.xlu1 %v1680_v25, %s2987_s27 }
0x158c   : > { %1809 = vperm.xlu1 %2893, %v2514_v36  }
0x15fa   : > { %v1683_v26 = vpop.permute.xlu1 %1682 }
0x15fb   : > { %v1685_v23 = vadd.f32 %v2911_v21, %v1683_v26  ;;  %v2526_v26 = vsel %vm2035_vm0, 1.0, %v2985_v3 }
0x15fd   : > { %v1690_v27 = vsub.f32 %v1685_v23, %v1587_v17 }
0x15ff   : > { %v1696_v38 = vmul.f32 %v1694_v37, %v1690_v27 }
0x1601   : > { %v1697_v39 = vadd.f32 %v1696_v38, %v1587_v17 }
0x1603   : > { %1698 = vst.msk [vmem:[#allocation2] sm:$0xff] %vm1358_vm10, %v1697_v39  ;;  %v1699_v40 = vmul.f32 %v1697_v39, %v1694_v37 }
0x1605   : > { %2509 = vst.msk [vmem:[%s3078_s13 + $0x28] sm:$0xff] %vm1358_vm10, %v1699_v40 }
0x160a   : > { %v1703_v41 = vld [vmem:[#allocation2] sm:$0xff] }
0x160b   : > { %2512 = vmatmul.mubr.msk.f32.vlgmr.msra.gmra.mrb[2].mxu1 %vm1358_vm10, %v1703_v41  ;;  %v1810_v14 = vpop.permute.xlu1 %1809 }
0x160c   : > { %2751 = vmatpush1.bf16.msra.mxu1 %v3362_v57  ;;  %2006 = vmatprep.mubr.f32.mxu1 %v2985_v3 }
0x160d   : > { %2753 = vmatprep.subr.bf16.mxu1 %v3366_v58 }
0x1610   : > { %2755 = vmatpush1.bf16.msra.mxu1 %v3373_v59 }
0x1611   : > { %2757 = vmatprep.subr.bf16.mxu1 %v3379_v2 }
0x1614   : > { %2759 = vmatpush1.bf16.msra.mxu1 %v3387_v4 }
0x1615   : > { %2761 = vmatprep.subr.bf16.mxu1 %v3392_v5 }
0x1618   : > { %2763 = vmatpush1.bf16.msra.mxu1 %v3399_v6 }
0x1619   : > { %2781 = vmatprep.subr.bf16.mxu1 %v3358_v56 }
0x16de   : > { %v1776_v44 = vpop.f32.mrb[2].mxu1 }
0x16df   : > { %v1777_v45 = vadd.f32 %v1776_v44, %v3419_v12  ;;  %v1778_v46 = vpop.f32.mrb[3].mxu1  ;;  %v2522_v44 = vld [vmem:[%s3073_s9 + $0x20] sm:$0xff] }
0x16e0   : > { %v1779_v50 = vadd.f32 %v1778_v46, %v3424_v63 }
0x16e1   : > { %v1781_v47 = vadd.f32 %v2510_v42, %v1777_v45 }
0x16e3   : > { %v2513_v48 = vmul.f32 -1.442695, %v1781_v47 }
0x16e5   : > { %2912 = vpow2.f32 %v2513_v48 }
0x16ef   : > { %v2913_v33 = vpop.eup %2912 }
0x16f0   : > { %v1785_v49 = vadd.f32 1.0, %v2913_v33 }
0x16f2   : > { %2914 = vrcp.f32 %v1785_v49 }
0x16fc   : > { %v2915_v51 = vpop.eup %2914 }
0x16fd   : > { %v1788_v53 = vmul.f32 %v2915_v51, %v1779_v50 }
0x16ff   : > { %v1789_v54 = vadd.f32 %v2511_v52, %v1788_v53 }
0x1701   : > { %2916 = vtanh.f32 %v1789_v54 }
0x170b   : > { %v2917_v56 = vpop.eup %2916 }
0x170c   : > { %v1791_v43 = vsub.f32 %v1703_v41, %v2917_v56 }
0x170e   : > { %1793 = vrot.lane.b32.xlu0 %v1791_v43, %s2987_s27 }
0x1780   : > { %v1794_v7 = vpop.permute.xlu0 %1793 }
0x1781   : > { %v1796_v8 = vmul.f32 %v2915_v51, %v1794_v7  ;;  %v2150_v51 = vstv %s2050_s11 }
0x1782   : > { %vm2151_vm1 = vcmp.lt.s32.totalorder %v2150_v51, %v3084_v1 }
0x1783   : > { %1798 = vrot.lane.b32.xlu0 %v1796_v8, %s2987_s27  ;;  %v2532_v54 = vsel %vm2151_vm1, 1.0, %v2985_v3 }
0x1787   : > { %1925 = vperm.xlu0 %2892, %v2520_v9  }
0x17f5   : > { %v1799_v10 = vpop.permute.xlu0 %1798 }
0x17f6   : > { %v1801_v11 = vadd.f32 %v2917_v56, %v1799_v10 }
0x17f8   : > { %v1806_v13 = vsub.f32 %v1801_v11, %v1703_v41 }
0x17fa   : > { %v1812_v15 = vmul.f32 %v1810_v14, %v1806_v13  ;;  %v2528_v13 = vld [vmem:[%s3073_s9 + $0x10] sm:$0xff] }
0x17fc   : > { %v1813_v16 = vadd.f32 %v1812_v15, %v1703_v41 }
0x17fe   : > { %1814 = vst.msk [vmem:[#allocation2] sm:$0xff] %vm1358_vm10, %v1813_v16  ;;  %v1815_v17 = vmul.f32 %v1813_v16, %v1810_v14 }
0x1800   : > { %2515 = vst.msk [vmem:[%s3078_s13 + $0x20] sm:$0xff] %vm1358_vm10, %v1815_v17 }
0x1805   : > { %v1819_v60 = vld [vmem:[#allocation2] sm:$0xff] }
0x1806   : > { %2518 = vmatmul.mubr.msk.f32.vlgmr.msra.gmra.mrb[4].mxu0 %vm1358_vm10, %v1819_v60  ;;  %v1926_v38 = vpop.permute.xlu0 %1925 }
0x1807   : > { %2767 = vmatpush1.bf16.msra.mxu0 %v3362_v57  ;;  %2122 = vmatprep.mubr.f32.mxu0 %v2985_v3 }
0x1808   : > { %2769 = vmatprep.subr.bf16.mxu0 %v3366_v58 }
0x180b   : > { %2771 = vmatpush1.bf16.msra.mxu0 %v3373_v59 }
0x180c   : > { %2773 = vmatprep.subr.bf16.mxu0 %v3379_v2 }
0x180f   : > { %2775 = vmatpush1.bf16.msra.mxu0 %v3387_v4 }
0x1810   : > { %2777 = vmatprep.subr.bf16.mxu0 %v3392_v5 }
0x1813   : > { %2779 = vmatpush1.bf16.msra.mxu0 %v3399_v6 }
0x18d9   : > { %v1892_v19 = vpop.f32.mrb[4].mxu0 }
0x18da   : > { %v1893_v62 = vadd.f32 %v1892_v19, %v3419_v12  ;;  %v1894_v0 = vpop.f32.mrb[5].mxu0 }
0x18db   : > { %v1895_v20 = vadd.f32 %v1894_v0, %v3424_v63 }
0x18dc   : > { %v1897_v28 = vadd.f32 %v2516_v61, %v1893_v62 }
0x18de   : > { %v2519_v29 = vmul.f32 -1.442695, %v1897_v28  ;;  %v2529_v28 = vld [vmem:[%s3073_s9 + $0x18] sm:$0xff] }
0x18e0   : > { %2918 = vpow2.f32 %v2519_v29 }
0x18ea   : > { %v2919_v30 = vpop.eup %2918 }
0x18eb   : > { %v1901_v31 = vadd.f32 1.0, %v2919_v30 }
0x18ed   : > { %2920 = vrcp.f32 %v1901_v31 }
0x18f7   : > { %v2921_v32 = vpop.eup %2920 }
0x18f8   : > { %v1904_v18 = vmul.f32 %v2921_v32, %v1895_v20 }
0x18fa   : > { %v1905_v21 = vadd.f32 %v2517_v34, %v1904_v18 }
0x18fc   : > { %2922 = vtanh.f32 %v1905_v21 }
0x1906   : > { %v2923_v22 = vpop.eup %2922 }
0x1907   : > { %v1907_v24 = vsub.f32 %v1819_v60, %v2923_v22 }
0x1909   : > { %1909 = vrot.lane.b32.xlu1 %v1907_v24, %s2987_s27 }
0x197b   : > { %v1910_v25 = vpop.permute.xlu1 %1909 }
0x197c   : > { %v1912_v36 = vmul.f32 %v2921_v32, %v1910_v25  ;;  %v2264_v32 = vstv %s3429_s25 }
0x197d   : > { %vm2265_vm2 = vcmp.lt.s32.totalorder %v2264_v32, %v3084_v1  ;;  %v2167_v1 = vld [vmem:[%s3073_s9] sm:$0xff] }
0x197e   : > { %1914 = vrot.lane.b32.xlu1 %v1912_v36, %s2987_s27  ;;  %v2536_v21 = vsel %vm2265_vm2, 1.0, %v2985_v3 }
0x1982   : > { %2041 = vperm.xlu1 %2893, %v2526_v26  }
0x19f0   : > { %v1915_v23 = vpop.permute.xlu1 %1914 }
0x19f1   : > { %v1917_v27 = vadd.f32 %v2923_v22, %v1915_v23 }
0x19f3   : > { %v1922_v37 = vsub.f32 %v1917_v27, %v1819_v60 }
0x19f5   : > { %v1928_v39 = vmul.f32 %v1926_v38, %v1922_v37 }
0x19f7   : > { %v1929_v40 = vadd.f32 %v1928_v39, %v1819_v60 }
0x19f9   : > { %1930 = vst.msk [vmem:[#allocation2] sm:$0xff] %vm1358_vm10, %v1929_v40  ;;  %v1931_v41 = vmul.f32 %v1929_v40, %v1926_v38 }
0x19fb   : > { %2521 = vst.msk [vmem:[%s3078_s13 + $0x18] sm:$0xff] %vm1358_vm10, %v1931_v41 }
0x1a00   : > { %v1935_v42 = vld [vmem:[#allocation2] sm:$0xff] }
0x1a01   : > { %2524 = vmatmul.mubr.msk.f32.vlgmr.msra.gmra.mrb[4].mxu1 %vm1358_vm10, %v1935_v42  ;;  %v2042_v7 = vpop.permute.xlu1 %2041 }
0x1a02   : > { %2783 = vmatpush1.bf16.msra.mxu1 %v3362_v57  ;;  %2236 = vmatprep.mubr.f32.mxu1 %v2985_v3 }
0x1a03   : > { %2785 = vmatprep.subr.bf16.mxu1 %v3366_v58 }
0x1a06   : > { %2787 = vmatpush1.bf16.msra.mxu1 %v3373_v59 }
0x1a07   : > { %2789 = vmatprep.subr.bf16.mxu1 %v3379_v2 }
0x1a0a   : > { %2791 = vmatpush1.bf16.msra.mxu1 %v3387_v4  ;;  %v2523_v4 = vld [vmem:[%s3073_s9 + $0x28] sm:$0xff] }
0x1a0b   : > { %2793 = vmatprep.subr.bf16.mxu1 %v3392_v5 }
0x1a0e   : > { %2795 = vmatpush1.bf16.msra.mxu1 %v3399_v6 }
0x1ad4   : > { %v2008_v45 = vpop.f32.mrb[4].mxu1 }
0x1ad5   : > { %v2009_v46 = vadd.f32 %v2008_v45, %v3419_v12  ;;  %v2010_v57 = vpop.f32.mrb[5].mxu1 }
0x1ad6   : > { %v2011_v2 = vadd.f32 %v2010_v57, %v3424_v63 }
0x1ad7   : > { %v2013_v47 = vadd.f32 %v2522_v44, %v2009_v46  ;;  %v2168_v46 = vld [vmem:[%s3073_s9 + $0x8] sm:$0xff] }
0x1ad9   : > { %v2525_v48 = vmul.f32 -1.442695, %v2013_v47 }
0x1adb   : > { %2924 = vpow2.f32 %v2525_v48 }
0x1ae5   : > { %v2925_v58 = vpop.eup %2924 }
0x1ae6   : > { %v2017_v59 = vadd.f32 1.0, %v2925_v58 }
0x1ae8   : > { %2926 = vrcp.f32 %v2017_v59 }
0x1af2   : > { %v2927_v33 = vpop.eup %2926 }
0x1af3   : > { %v2020_v49 = vmul.f32 %v2927_v33, %v2011_v2 }
0x1af5   : > { %v2021_v5 = vadd.f32 %v2523_v4, %v2020_v49 }
0x1af7   : > { %2928 = vtanh.f32 %v2021_v5 }
0x1b01   : > { %v2929_v6 = vpop.eup %2928 }
0x1b02   : > { %v2023_v50 = vsub.f32 %v1935_v42, %v2929_v6 }
0x1b04   : > { %2025 = vrot.lane.b32.xlu0 %v2023_v50, %s2987_s27 }
0x1b76   : > { %v2026_v52 = vpop.permute.xlu0 %2025 }
0x1b77   : > { %v2028_v53 = vmul.f32 %v2927_v33, %v2026_v52 }
0x1b79   : > { %2030 = vrot.lane.b32.xlu0 %v2028_v53, %s2987_s27 }
0x1b7d   : > { %2157 = vperm.xlu0 %2892, %v2532_v54  }
0x1beb   : > { %v2031_v56 = vpop.permute.xlu0 %2030 }
0x1bec   : > { %v2033_v43 = vadd.f32 %v2929_v6, %v2031_v56 }
0x1bee   : > { %v2038_v55 = vsub.f32 %v2033_v43, %v1935_v42 }
0x1bf0   : > { %v2044_v8 = vmul.f32 %v2042_v7, %v2038_v55 }
0x1bf2   : > { %v2045_v9 = vadd.f32 %v2044_v8, %v1935_v42 }
0x1bf4   : > { %2046 = vst.msk [vmem:[#allocation2] sm:$0xff] %vm1358_vm10, %v2045_v9  ;;  %v2047_v10 = vmul.f32 %v2045_v9, %v2042_v7 }
0x1bf6   : > { %2527 = vst.msk [vmem:[%s3078_s13 + $0x10] sm:$0xff] %vm1358_vm10, %v2047_v10 }
0x1bfb   : > { %v2051_v11 = vld [vmem:[#allocation2] sm:$0xff] }
0x1bfc   : > { %2530 = vmatmul.mubr.msk.f32.vlgmr.msra.gmra.mrb[6].mxu0 %vm1358_vm10, %v2051_v11  ;;  %v2158_v25 = vpop.permute.xlu0 %2157 }
0x1ccf   : > { %v2124_v14 = vpop.f32.mrb[6].mxu0 }
0x1cd0   : > { %v2125_v15 = vadd.f32 %v2124_v14, %v3419_v12  ;;  %v2126_v16 = vpop.f32.mrb[7].mxu0 }
0x1cd1   : > { %v2127_v62 = vadd.f32 %v2126_v16, %v3424_v63 }
0x1cd2   : > { %v2129_v17 = vadd.f32 %v2528_v13, %v2125_v15 }
0x1cd4   : > { %v2531_v60 = vmul.f32 -1.442695, %v2129_v17 }
0x1cd6   : > { %2930 = vpow2.f32 %v2531_v60 }
0x1ce0   : > { %v2931_v61 = vpop.eup %2930 }
0x1ce1   : > { %v2133_v19 = vadd.f32 1.0, %v2931_v61 }
0x1ce3   : > { %2932 = vrcp.f32 %v2133_v19 }
0x1ced   : > { %v2933_v0 = vpop.eup %2932 }
0x1cee   : > { %v2136_v29 = vmul.f32 %v2933_v0, %v2127_v62 }
0x1cf0   : > { %v2137_v30 = vadd.f32 %v2529_v28, %v2136_v29 }
0x1cf2   : > { %2934 = vtanh.f32 %v2137_v30 }
0x1cfc   : > { %v2935_v31 = vpop.eup %2934 }
0x1cfd   : > { %v2139_v20 = vsub.f32 %v2051_v11, %v2935_v31 }
0x1cff   : > { %2141 = vrot.lane.b32.xlu1 %v2139_v20, %s2987_s27 }
0x1d71   : > { %v2142_v34 = vpop.permute.xlu1 %2141 }
0x1d72   : > { %v2144_v18 = vmul.f32 %v2933_v0, %v2142_v34 }
0x1d74   : > { %2146 = vrot.lane.b32.xlu1 %v2144_v18, %s2987_s27 }
0x1d78   : > { %2271 = vperm.xlu1 %2893, %v2536_v21  }
0x1de6   : > { %v2147_v22 = vpop.permute.xlu1 %2146 }
0x1de7   : > { %v2149_v24 = vadd.f32 %v2935_v31, %v2147_v22 }
0x1de9   : > { %v2154_v35 = vsub.f32 %v2149_v24, %v2051_v11 }
0x1deb   : > { %v2160_v36 = vmul.f32 %v2158_v25, %v2154_v35 }
0x1ded   : > { %v2161_v26 = vadd.f32 %v2160_v36, %v2051_v11 }
0x1def   : > { %2162 = vst.msk [vmem:[#allocation2] sm:$0xff] %vm1358_vm10, %v2161_v26  ;;  %v2163_v23 = vmul.f32 %v2161_v26, %v2158_v25 }
0x1df1   : > { %2533 = vst.msk [vmem:[%s3078_s13 + $0x8] sm:$0xff] %vm1358_vm10, %v2163_v23 }
0x1df6   : > { %v2166_v27 = vld [vmem:[#allocation2] sm:$0xff] }
0x1df7   : > { %2534 = vmatmul.mubr.msk.f32.vlgmr.msra.gmra.mrb[6].mxu1 %vm1358_vm10, %v2166_v27  ;;  %v2272_v49 = vpop.permute.xlu1 %2271 }
0x1eca   : > { %v2238_v37 = vpop.f32.mrb[6].mxu1 }
0x1ecb   : > { %v2239_v3 = vadd.f32 %v2238_v37, %v3419_v12  ;;  %v2240_v38 = vpop.f32.mrb[7].mxu1 }
0x1ecc   : > { %v2241_v44 = vadd.f32 %v2240_v38, %v3424_v63 }
0x1ecd   : > { %v2243_v39 = vadd.f32 %v2239_v3, %v2167_v1 }
0x1ecf   : > { %v2535_v40 = vmul.f32 -1.442695, %v2243_v39 }
0x1ed1   : > { %2936 = vpow2.f32 %v2535_v40 }
0x1edb   : > { %v2937_v41 = vpop.eup %2936 }
0x1edc   : > { %v2247_v42 = vadd.f32 1.0, %v2937_v41 }
0x1ede   : > { %2938 = vrcp.f32 %v2247_v42 }
0x1ee8   : > { %v2939_v45 = vpop.eup %2938 }
0x1ee9   : > { %v2250_v57 = vmul.f32 %v2939_v45, %v2241_v44 }
0x1eeb   : > { %v2251_v47 = vadd.f32 %v2250_v57, %v2168_v46 }
0x1eed   : > { %2940 = vtanh.f32 %v2251_v47 }
0x1ef7   : > { %v2941_v48 = vpop.eup %2940 }
0x1ef8   : > { %v2253_v58 = vsub.f32 %v2166_v27, %v2941_v48 }
0x1efa   : > { %2255 = vrot.lane.b32.xlu0 %v2253_v58, %s2987_s27 }
0x1f6c   : > { %v2256_v12 = vpop.permute.xlu0 %2255 }
0x1f6d   : > { %v2258_v59 = vmul.f32 %v2939_v45, %v2256_v12 }
0x1f6f   : > { %2260 = vrot.lane.b32.xlu0 %v2258_v59, %s2987_s27 }
0x1fe1   : > { %v2261_v2 = vpop.permute.xlu0 %2260 }
0x1fe2   : > { %v2263_v33 = vadd.f32 %v2941_v48, %v2261_v2 }
0x1fe4   : > { %v2268_v4 = vsub.f32 %v2263_v33, %v2166_v27 }
0x1fe6   : > { %v2274_v5 = vmul.f32 %v2272_v49, %v2268_v4 }
0x1fe8   : > { %v2275_v63 = vadd.f32 %v2274_v5, %v2166_v27 }
0x1fea   : > { %2276 = vst.msk [vmem:[#allocation2] sm:$0xff] %vm1358_vm10, %v2275_v63  ;;  %v2277_v6 = vmul.f32 %v2275_v63, %v2272_v49 }
0x1fec   : > { %2278 = vst.msk [vmem:[%s3078_s13] sm:$0xff] %vm1358_vm10, %v2277_v6 }
0x1fed PF: > { %s15_s22 = sadd.s32 1, %s2980_s22   ;;  %s3598_s9 = sld [smem:[#allocation3_spill]] }
0x1fee   : > { %p12_p10 = scmp.ge.s32.totalorder %s15_s22, 6   ;;  %s3599_s28 = sld [smem:[#allocation4_spill]] }
0x1fef   : > { %s3600_s18 = smov %s2972_s20  ;;  %s3601_s19 = smov %s2976_s21 }
0x1ff0   :  { %14 = sbr.rel (!%p12_p10) target bundleno = 3 (0x3), region = 119 }
0x1ff3   : > { %s3602_s20 = smov %s3598_s9 }
0x1ff4   : > { %s3603_s21 = smov %s3599_s28 }

</bundles_post_ra>
